<compile_context>
chip_gen: v7x
topology: tpu7x:2x2x1
jax: 0.10.0
libtpu: 0.0.40
codegen_flags: <defaults>
</compile_context>

<pallas_src>
import functools

import jax
import jax.numpy as jnp
from jax.experimental import pallas as pl
from jax.experimental.pallas import tpu as pltpu

CPAD = 128                 # lane-dense padded output-channel width for convs
FC_HIDDEN_PAD = 512        # fc1 hidden 500 -> 512 (lane-dense intermediate)
N_CLASSES = 10
VMEM_LIMIT = 32 * 1024 * 1024   # explicit; safe on v5e/v6e (128 MiB) and v7x (64 MiB)


def _round_up(x, m):
    return ((x + m - 1) // m) * m


# ----------------------------- Pallas kernels ------------------------------

def _conv_relu_pool_kernel(p0_ref, p1_ref, p2_ref, p3_ref, w_ref, b_ref, o_ref):
    """Fused conv-as-matmul + bias + ReLU + 2x2 max-pool.

    p{q}_ref : [TILE_M, K]   bf16  im2col rows for pooling-window quadrant q
    w_ref    : [K, CPAD]     bf16  conv weight, OC zero-padded to 128
    b_ref    : [1, CPAD]     f32
    o_ref    : [TILE_M, CPAD] bf16 pooled+ReLU'd NHWC rows
    """
    w = w_ref[...]
    z0 = jnp.dot(p0_ref[...], w, preferred_element_type=jnp.float32)
    z1 = jnp.dot(p1_ref[...], w, preferred_element_type=jnp.float32)
    z2 = jnp.dot(p2_ref[...], w, preferred_element_type=jnp.float32)
    z3 = jnp.dot(p3_ref[...], w, preferred_element_type=jnp.float32)
    z = jnp.maximum(jnp.maximum(z0, z1), jnp.maximum(z2, z3))   # 2x2 max-pool
    z = jnp.maximum(z + b_ref[...], 0.0)                        # bias + ReLU (f32)
    o_ref[...] = z.astype(o_ref.dtype)


def _fc_head_kernel(x_ref, w1_ref, b1_ref, w2_ref, b2_ref, o_ref, *, n_classes):
    """Fused fc1(+bias+ReLU) -> fc2(+bias) -> log_softmax over real classes."""
    h = jnp.dot(x_ref[...], w1_ref[...], preferred_element_type=jnp.float32)
    h = jnp.maximum(h + b1_ref[...], 0.0)
    z = jnp.dot(h.astype(w2_ref.dtype), w2_ref[...],
                preferred_element_type=jnp.float32) + b2_ref[...]
    col = jax.lax.broadcasted_iota(jnp.int32, z.shape, 1)
    valid = col < n_classes
    z = jnp.where(valid, z, -jnp.inf)                 # mask padded class lanes
    m = jnp.max(z, axis=1, keepdims=True)
    e = jnp.where(valid, jnp.exp(z - m), 0.0)
    s = jnp.sum(e, axis=1, keepdims=True)
    o_ref[...] = z - m - jnp.log(s)                   # log_softmax (f32 epilogue)


# ------------------------------ thin wrappers -------------------------------

def conv_relu_pool(x, w2, b2, *, k, c_in, tile_m=512):
    """x: [B, H, W, C>=c_in] bf16 (NHWC).  Returns [B, PH, PW, CPAD] bf16."""
    B, H, W, C = x.shape
    if C != c_in:
        x = x[..., :c_in]                      # drop padded channels of prev layer
    OH, OW = H - k + 1, W - k + 1
    PH, PW = OH // 2, OW // 2                  # floor, matches F.max_pool2d(x,2,2)
    K = k * k * c_in
    M = B * PH * PW
    tile_m = min(tile_m, _round_up(M, 16))
    Mpad = _round_up(M, tile_m)

    # Four im2col patch sets, one per position in each 2x2 pooling window.
    quads = []
    for qy in range(2):
        for qx in range(2):
            cols = []
            for dy in range(k):
                for dx in range(k):
                    cols.append(
                        x[:, qy + dy:qy + dy + 2 * PH:2,
                             qx + dx:qx + dx + 2 * PW:2, :])
            p = jnp.stack(cols, axis=3).reshape(M, K)      # (dy,dx,c) order
            quads.append(jnp.pad(p, ((0, Mpad - M), (0, 0))))

    patch_spec = pl.BlockSpec((tile_m, K), lambda i: (i, 0))
    out = pl.pallas_call(
        _conv_relu_pool_kernel,
        out_shape=jax.ShapeDtypeStruct((Mpad, CPAD), jnp.bfloat16),
        grid_spec=pltpu.PrefetchScalarGridSpec(
            num_scalar_prefetch=0,
            grid=(Mpad // tile_m,),
            in_specs=[patch_spec] * 4 + [
                pl.BlockSpec((K, CPAD), lambda i: (0, 0)),
                pl.BlockSpec((1, CPAD), lambda i: (0, 0)),
            ],
            out_specs=pl.BlockSpec((tile_m, CPAD), lambda i: (i, 0)),
        ),
        compiler_params=pltpu.CompilerParams(
            dimension_semantics=("parallel",),
            vmem_limit_bytes=VMEM_LIMIT),
    )(*quads, w2, b2)
    return out[:M].reshape(B, PH, PW, CPAD)


def fc_head(x, w1, b1, w2, b2, *, n_classes=N_CLASSES, tile_b=256):
    """x: [B, 5*5*CPAD] bf16.  Returns [B, n_classes] f32 log-probs."""
    B, K = x.shape
    tile_b = min(tile_b, _round_up(B, 16))
    Bpad = _round_up(B, tile_b)
    x = jnp.pad(x, ((0, Bpad - B), (0, 0)))
    out = pl.pallas_call(
        functools.partial(_fc_head_kernel, n_classes=n_classes),
        out_shape=jax.ShapeDtypeStruct((Bpad, CPAD), jnp.float32),
        grid_spec=pltpu.PrefetchScalarGridSpec(
            num_scalar_prefetch=0,
            grid=(Bpad // tile_b,),
            in_specs=[
                pl.BlockSpec((tile_b, K), lambda i: (i, 0)),
                pl.BlockSpec((K, FC_HIDDEN_PAD), lambda i: (0, 0)),
                pl.BlockSpec((1, FC_HIDDEN_PAD), lambda i: (0, 0)),
                pl.BlockSpec((FC_HIDDEN_PAD, CPAD), lambda i: (0, 0)),
                pl.BlockSpec((1, CPAD), lambda i: (0, 0)),
            ],
            out_specs=pl.BlockSpec((tile_b, CPAD), lambda i: (i, 0)),
        ),
        compiler_params=pltpu.CompilerParams(
            dimension_semantics=("parallel",),
            vmem_limit_bytes=VMEM_LIMIT),
    )(x, w1, b1, w2, b2)
    return out[:B, :n_classes]


# ------------------------------ params --------------------------------------

def init_params(key):
    """PyTorch-layout LeNet params (same distributions as nn.Conv2d/Linear)."""
    ks = jax.random.split(key, 8)

    def u(k, shape, fan_in):
        bound = 1.0 / jnp.sqrt(jnp.float32(fan_in))
        return jax.random.uniform(k, shape, jnp.float32, -bound, bound)

    return {
        "conv1_w": u(ks[0], (20, 1, 3, 3), 1 * 9),
        "conv1_b": u(ks[1], (20,), 1 * 9),
        "conv2_w": u(ks[2], (50, 20, 3, 3), 20 * 9),
        "conv2_b": u(ks[3], (50,), 20 * 9),
        "fc1_w": u(ks[4], (500, 5 * 5 * 50), 5 * 5 * 50),
        "fc1_b": u(ks[5], (500,), 5 * 5 * 50),
        "fc2_w": u(ks[6], (10, 500), 500),
        "fc2_b": u(ks[7], (10,), 500),
    }


def prepare_params(p):
    """One-time (outside jit) reorder / pad / bf16-cast of PyTorch-layout params."""
    def prep_conv(w, b):
        oc, c, kh, kw = w.shape
        # rows ordered (dy, dx, c) to match the im2col patch layout.
        w2 = jnp.transpose(w, (2, 3, 1, 0)).reshape(kh * kw * c, oc)
        w2 = jnp.pad(w2, ((0, 0), (0, CPAD - oc))).astype(jnp.bfloat16)
        b2 = jnp.pad(b, (0, CPAD - oc)).astype(jnp.float32).reshape(1, CPAD)
        return w2, b2

    c1w, c1b = prep_conv(p["conv1_w"], p["conv1_b"])
    c2w, c2b = prep_conv(p["conv2_w"], p["conv2_b"])

    # fc1: PyTorch flatten order is (c, h, w) over [B,50,5,5]; our kernel feeds
    # (h, w, c_padded) over [B,5,5,CPAD] -> permute + zero-pad rows once here.
    w1 = p["fc1_w"].reshape(500, 50, 5, 5)             # [out, c, h, w]
    w1 = jnp.transpose(w1, (2, 3, 1, 0))               # [h, w, c, out]
    w1 = jnp.pad(w1, ((0, 0), (0, 0), (0, CPAD - 50), (0, FC_HIDDEN_PAD - 500)))
    w1 = w1.reshape(5 * 5 * CPAD, FC_HIDDEN_PAD).astype(jnp.bfloat16)
    b1 = jnp.pad(p["fc1_b"], (0, FC_HIDDEN_PAD - 500)).astype(jnp.float32)
    b1 = b1.reshape(1, FC_HIDDEN_PAD)

    w2 = jnp.pad(p["fc2_w"].T, ((0, FC_HIDDEN_PAD - 500), (0, CPAD - N_CLASSES)))
    w2 = w2.astype(jnp.bfloat16)
    b2 = jnp.pad(p["fc2_b"], (0, CPAD - N_CLASSES)).astype(jnp.float32)
    b2 = b2.reshape(1, CPAD)

    return {"conv1_w": c1w, "conv1_b": c1b, "conv2_w": c2w, "conv2_b": c2b,
            "fc1_w": w1, "fc1_b": b1, "fc2_w": w2, "fc2_b": b2}


# ------------------------------ model ---------------------------------------

def lenet_forward(params, x):
    # x: [B, 1, 28, 28] f32 NCHW (PyTorch) — single boundary reorder to NHWC bf16.
    x = jnp.transpose(x, (0, 2, 3, 1)).astype(jnp.bfloat16)                 # [B,28,28,1]
    x = conv_relu_pool(x, params["conv1_w"], params["conv1_b"], k=3, c_in=1)   # [B,13,13,128]
    x = conv_relu_pool(x, params["conv2_w"], params["conv2_b"], k=3, c_in=20)  # [B,5,5,128]
    B = x.shape[0]
    x = x.reshape(B, 5 * 5 * CPAD)          # contiguous flatten (padded channels
                                            # handled by zero rows in fc1_w)
    return fc_head(x, params["fc1_w"], params["fc1_b"],
                   params["fc2_w"], params["fc2_b"])                           # [B,10]


if __name__ == "__main__":
    key = jax.random.PRNGKey(0)
    pkey, xkey = jax.random.split(key)
    params = prepare_params(init_params(pkey))
    # MNIST-shaped input: fc1's 5*5*50 fan-in requires 28x28 spatial input.
    x = jax.random.normal(xkey, (2, 1, 28, 28), dtype=jnp.float32)

    logp = jax.jit(lenet_forward)(params, x)
    jax.block_until_ready(logp)

    assert logp.shape == (2, 10), logp.shape
    # log_softmax rows should (approximately) exponentiate-and-sum to 1.
    assert jnp.allclose(jnp.sum(jnp.exp(logp), axis=1), 1.0, atol=1e-3)
    print("KERNEL_OK")
</pallas_src>

<mosaic_0001>
module attributes {stable_mosaic.version = 11 : i64} {
  func.func @_conv_relu_pool_kernel(%arg0: i32, %arg1: memref<352x9xbf16, #tpu.memory_space<vmem>>, %arg2: memref<352x9xbf16, #tpu.memory_space<vmem>>, %arg3: memref<352x9xbf16, #tpu.memory_space<vmem>>, %arg4: memref<352x9xbf16, #tpu.memory_space<vmem>>, %arg5: memref<9x128xbf16, #tpu.memory_space<vmem>>, %arg6: memref<1x128xf32, #tpu.memory_space<vmem>>, %arg7: memref<352x128xbf16, #tpu.memory_space<vmem>>) attributes {dimension_semantics = [#tpu.dimension_semantics<parallel>], iteration_bounds = array<i64: 1>, scalar_prefetch = 0 : i64, scratch_operands = 0 : i64, tpu.core_type = #tpu.core_type<tc>, window_params = [{transform_indices = @transform_0, window_bounds = array<i64: 352, 9>}, {transform_indices = @transform_1, window_bounds = array<i64: 352, 9>}, {transform_indices = @transform_2, window_bounds = array<i64: 352, 9>}, {transform_indices = @transform_3, window_bounds = array<i64: 352, 9>}, {pipeline_mode = #tpu.pipeline_mode<synchronous>, transform_indices = @transform_4, window_bounds = array<i64: 9, 128>}, {pipeline_mode = #tpu.pipeline_mode<synchronous>, transform_indices = @transform_5, window_bounds = array<i64: 1, 128>}, {transform_indices = @transform_6, window_bounds = array<i64: 352, 128>}]} {
    %c0 = arith.constant 0 : index
    %c0_0 = arith.constant 0 : index
    %0 = vector.load %arg5[%c0, %c0_0] : memref<9x128xbf16, #tpu.memory_space<vmem>>, vector<9x128xbf16>
    %c0_1 = arith.constant 0 : index
    %c0_2 = arith.constant 0 : index
    %1 = vector.load %arg1[%c0_1, %c0_2] : memref<352x9xbf16, #tpu.memory_space<vmem>>, vector<352x9xbf16>
    %cst = arith.constant dense<0.000000e+00> : vector<352x128xf32>
    %2 = tpu.matmul %1, %0, %cst {dimension_numbers = #tpu.dot_dimension_numbers<[1], [0], [0], [1], [0, 0, 1, 1], [], []>} : vector<352x9xbf16>, vector<9x128xbf16>, vector<352x128xf32> -> vector<352x128xf32>
    %c0_3 = arith.constant 0 : index
    %c0_4 = arith.constant 0 : index
    %3 = vector.load %arg2[%c0_3, %c0_4] : memref<352x9xbf16, #tpu.memory_space<vmem>>, vector<352x9xbf16>
    %cst_5 = arith.constant dense<0.000000e+00> : vector<352x128xf32>
    %4 = tpu.matmul %3, %0, %cst_5 {dimension_numbers = #tpu.dot_dimension_numbers<[1], [0], [0], [1], [0, 0, 1, 1], [], []>} : vector<352x9xbf16>, vector<9x128xbf16>, vector<352x128xf32> -> vector<352x128xf32>
    %c0_6 = arith.constant 0 : index
    %c0_7 = arith.constant 0 : index
    %5 = vector.load %arg3[%c0_6, %c0_7] : memref<352x9xbf16, #tpu.memory_space<vmem>>, vector<352x9xbf16>
    %cst_8 = arith.constant dense<0.000000e+00> : vector<352x128xf32>
    %6 = tpu.matmul %5, %0, %cst_8 {dimension_numbers = #tpu.dot_dimension_numbers<[1], [0], [0], [1], [0, 0, 1, 1], [], []>} : vector<352x9xbf16>, vector<9x128xbf16>, vector<352x128xf32> -> vector<352x128xf32>
    %c0_9 = arith.constant 0 : index
    %c0_10 = arith.constant 0 : index
    %7 = vector.load %arg4[%c0_9, %c0_10] : memref<352x9xbf16, #tpu.memory_space<vmem>>, vector<352x9xbf16>
    %cst_11 = arith.constant dense<0.000000e+00> : vector<352x128xf32>
    %8 = tpu.matmul %7, %0, %cst_11 {dimension_numbers = #tpu.dot_dimension_numbers<[1], [0], [0], [1], [0, 0, 1, 1], [], []>} : vector<352x9xbf16>, vector<9x128xbf16>, vector<352x128xf32> -> vector<352x128xf32>
    %9 = arith.maximumf %2, %4 : vector<352x128xf32>
    %10 = arith.maximumf %6, %8 : vector<352x128xf32>
    %11 = arith.maximumf %9, %10 : vector<352x128xf32>
    %c0_12 = arith.constant 0 : index
    %c0_13 = arith.constant 0 : index
    %12 = vector.load %arg6[%c0_12, %c0_13] : memref<1x128xf32, #tpu.memory_space<vmem>>, vector<1x128xf32>
    %13 = vector.broadcast %12 : vector<1x128xf32> to vector<352x128xf32>
    %14 = arith.addf %11, %13 : vector<352x128xf32>
    %cst_14 = arith.constant 0.000000e+00 : f32
    %15 = vector.broadcast %cst_14 : f32 to vector<352x128xf32>
    %16 = arith.maximumf %14, %15 : vector<352x128xf32>
    %17 = arith.truncf %16 : vector<352x128xf32> to vector<352x128xbf16>
    %c0_15 = arith.constant 0 : index
    %c0_16 = arith.constant 0 : index
    %18 = vector.load %arg7[%c0_15, %c0_16] : memref<352x128xbf16, #tpu.memory_space<vmem>>, vector<352x128xbf16>
    tpu.vector_store %arg7[%c0_15, %c0_16], %17 {strides = array<i32>} : memref<352x128xbf16, #tpu.memory_space<vmem>>, vector<352x128xbf16>,
    return
  }
  func.func @transform_0(%arg0: i32) -> (i32, i32) {
    %c0_i32 = arith.constant 0 : i32
    %c0_i32_0 = arith.constant 0 : i32
    return %arg0, %c0_i32 : i32, i32
  }
  func.func @transform_1(%arg0: i32) -> (i32, i32) {
    %c0_i32 = arith.constant 0 : i32
    %c0_i32_0 = arith.constant 0 : i32
    return %arg0, %c0_i32 : i32, i32
  }
  func.func @transform_2(%arg0: i32) -> (i32, i32) {
    %c0_i32 = arith.constant 0 : i32
    %c0_i32_0 = arith.constant 0 : i32
    return %arg0, %c0_i32 : i32, i32
  }
  func.func @transform_3(%arg0: i32) -> (i32, i32) {
    %c0_i32 = arith.constant 0 : i32
    %c0_i32_0 = arith.constant 0 : i32
    return %arg0, %c0_i32 : i32, i32
  }
  func.func @transform_4(%arg0: i32) -> (i32, i32) {
    %c0_i32 = arith.constant 0 : i32
    %c0_i32_0 = arith.constant 0 : i32
    %c0_i32_1 = arith.constant 0 : i32
    return %c0_i32, %c0_i32_0 : i32, i32
  }
  func.func @transform_5(%arg0: i32) -> (i32, i32) {
    %c0_i32 = arith.constant 0 : i32
    %c0_i32_0 = arith.constant 0 : i32
    %c0_i32_1 = arith.constant 0 : i32
    return %c0_i32, %c0_i32_0 : i32, i32
  }
  func.func @transform_6(%arg0: i32) -> (i32, i32) {
    %c0_i32 = arith.constant 0 : i32
    %c0_i32_0 = arith.constant 0 : i32
    return %arg0, %c0_i32 : i32, i32
  }
}

module attributes {stable_mosaic.version = 11 : i64} {
  func.func @_conv_relu_pool_kernel(%arg0: i32, %arg1: memref<64x180xbf16, #tpu.memory_space<vmem>>, %arg2: memref<64x180xbf16, #tpu.memory_space<vmem>>, %arg3: memref<64x180xbf16, #tpu.memory_space<vmem>>, %arg4: memref<64x180xbf16, #tpu.memory_space<vmem>>, %arg5: memref<180x128xbf16, #tpu.memory_space<vmem>>, %arg6: memref<1x128xf32, #tpu.memory_space<vmem>>, %arg7: memref<64x128xbf16, #tpu.memory_space<vmem>>) attributes {dimension_semantics = [#tpu.dimension_semantics<parallel>], iteration_bounds = array<i64: 1>, scalar_prefetch = 0 : i64, scratch_operands = 0 : i64, tpu.core_type = #tpu.core_type<tc>, window_params = [{transform_indices = @transform_0, window_bounds = array<i64: 64, 180>}, {transform_indices = @transform_1, window_bounds = array<i64: 64, 180>}, {transform_indices = @transform_2, window_bounds = array<i64: 64, 180>}, {transform_indices = @transform_3, window_bounds = array<i64: 64, 180>}, {pipeline_mode = #tpu.pipeline_mode<synchronous>, transform_indices = @transform_4, window_bounds = array<i64: 180, 128>}, {pipeline_mode = #tpu.pipeline_mode<synchronous>, transform_indices = @transform_5, window_bounds = array<i64: 1, 128>}, {transform_indices = @transform_6, window_bounds = array<i64: 64, 128>}]} {
    %c0 = arith.constant 0 : index
    %c0_0 = arith.constant 0 : index
    %0 = vector.load %arg5[%c0, %c0_0] : memref<180x128xbf16, #tpu.memory_space<vmem>>, vector<180x128xbf16>
    %c0_1 = arith.constant 0 : index
    %c0_2 = arith.constant 0 : index
    %1 = vector.load %arg1[%c0_1, %c0_2] : memref<64x180xbf16, #tpu.memory_space<vmem>>, vector<64x180xbf16>
    %cst = arith.constant dense<0.000000e+00> : vector<64x128xf32>
    %2 = tpu.matmul %1, %0, %cst {dimension_numbers = #tpu.dot_dimension_numbers<[1], [0], [0], [1], [0, 0, 1, 1], [], []>} : vector<64x180xbf16>, vector<180x128xbf16>, vector<64x128xf32> -> vector<64x128xf32>
    %c0_3 = arith.constant 0 : index
    %c0_4 = arith.constant 0 : index
    %3 = vector.load %arg2[%c0_3, %c0_4] : memref<64x180xbf16, #tpu.memory_space<vmem>>, vector<64x180xbf16>
    %cst_5 = arith.constant dense<0.000000e+00> : vector<64x128xf32>
    %4 = tpu.matmul %3, %0, %cst_5 {dimension_numbers = #tpu.dot_dimension_numbers<[1], [0], [0], [1], [0, 0, 1, 1], [], []>} : vector<64x180xbf16>, vector<180x128xbf16>, vector<64x128xf32> -> vector<64x128xf32>
    %c0_6 = arith.constant 0 : index
    %c0_7 = arith.constant 0 : index
    %5 = vector.load %arg3[%c0_6, %c0_7] : memref<64x180xbf16, #tpu.memory_space<vmem>>, vector<64x180xbf16>
    %cst_8 = arith.constant dense<0.000000e+00> : vector<64x128xf32>
    %6 = tpu.matmul %5, %0, %cst_8 {dimension_numbers = #tpu.dot_dimension_numbers<[1], [0], [0], [1], [0, 0, 1, 1], [], []>} : vector<64x180xbf16>, vector<180x128xbf16>, vector<64x128xf32> -> vector<64x128xf32>
    %c0_9 = arith.constant 0 : index
    %c0_10 = arith.constant 0 : index
    %7 = vector.load %arg4[%c0_9, %c0_10] : memref<64x180xbf16, #tpu.memory_space<vmem>>, vector<64x180xbf16>
    %cst_11 = arith.constant dense<0.000000e+00> : vector<64x128xf32>
    %8 = tpu.matmul %7, %0, %cst_11 {dimension_numbers = #tpu.dot_dimension_numbers<[1], [0], [0], [1], [0, 0, 1, 1], [], []>} : vector<64x180xbf16>, vector<180x128xbf16>, vector<64x128xf32> -> vector<64x128xf32>
    %9 = arith.maximumf %2, %4 : vector<64x128xf32>
    %10 = arith.maximumf %6, %8 : vector<64x128xf32>
    %11 = arith.maximumf %9, %10 : vector<64x128xf32>
    %c0_12 = arith.constant 0 : index
    %c0_13 = arith.constant 0 : index
    %12 = vector.load %arg6[%c0_12, %c0_13] : memref<1x128xf32, #tpu.memory_space<vmem>>, vector<1x128xf32>
    %13 = vector.broadcast %12 : vector<1x128xf32> to vector<64x128xf32>
    %14 = arith.addf %11, %13 : vector<64x128xf32>
    %cst_14 = arith.constant 0.000000e+00 : f32
    %15 = vector.broadcast %cst_14 : f32 to vector<64x128xf32>
    %16 = arith.maximumf %14, %15 : vector<64x128xf32>
    %17 = arith.truncf %16 : vector<64x128xf32> to vector<64x128xbf16>
    %c0_15 = arith.constant 0 : index
    %c0_16 = arith.constant 0 : index
    %18 = vector.load %arg7[%c0_15, %c0_16] : memref<64x128xbf16, #tpu.memory_space<vmem>>, vector<64x128xbf16>
    tpu.vector_store %arg7[%c0_15, %c0_16], %17 {strides = array<i32>} : memref<64x128xbf16, #tpu.memory_space<vmem>>, vector<64x128xbf16>,
    return
  }
  func.func @transform_0(%arg0: i32) -> (i32, i32) {
    %c0_i32 = arith.constant 0 : i32
    %c0_i32_0 = arith.constant 0 : i32
    return %arg0, %c0_i32 : i32, i32
  }
  func.func @transform_1(%arg0: i32) -> (i32, i32) {
    %c0_i32 = arith.constant 0 : i32
    %c0_i32_0 = arith.constant 0 : i32
    return %arg0, %c0_i32 : i32, i32
  }
  func.func @transform_2(%arg0: i32) -> (i32, i32) {
    %c0_i32 = arith.constant 0 : i32
    %c0_i32_0 = arith.constant 0 : i32
    return %arg0, %c0_i32 : i32, i32
  }
  func.func @transform_3(%arg0: i32) -> (i32, i32) {
    %c0_i32 = arith.constant 0 : i32
    %c0_i32_0 = arith.constant 0 : i32
    return %arg0, %c0_i32 : i32, i32
  }
  func.func @transform_4(%arg0: i32) -> (i32, i32) {
    %c0_i32 = arith.constant 0 : i32
    %c0_i32_0 = arith.constant 0 : i32
    %c0_i32_1 = arith.constant 0 : i32
    return %c0_i32, %c0_i32_0 : i32, i32
  }
  func.func @transform_5(%arg0: i32) -> (i32, i32) {
    %c0_i32 = arith.constant 0 : i32
    %c0_i32_0 = arith.constant 0 : i32
    %c0_i32_1 = arith.constant 0 : i32
    return %c0_i32, %c0_i32_0 : i32, i32
  }
  func.func @transform_6(%arg0: i32) -> (i32, i32) {
    %c0_i32 = arith.constant 0 : i32
    %c0_i32_0 = arith.constant 0 : i32
    return %arg0, %c0_i32 : i32, i32
  }
}

module attributes {stable_mosaic.version = 11 : i64} {
  func.func @_fc_head_kernel(%arg0: i32, %arg1: memref<16x3200xbf16, #tpu.memory_space<vmem>>, %arg2: memref<3200x512xbf16, #tpu.memory_space<vmem>>, %arg3: memref<1x512xf32, #tpu.memory_space<vmem>>, %arg4: memref<512x128xbf16, #tpu.memory_space<vmem>>, %arg5: memref<1x128xf32, #tpu.memory_space<vmem>>, %arg6: memref<16x128xf32, #tpu.memory_space<vmem>>) attributes {dimension_semantics = [#tpu.dimension_semantics<parallel>], iteration_bounds = array<i64: 1>, scalar_prefetch = 0 : i64, scratch_operands = 0 : i64, tpu.core_type = #tpu.core_type<tc>, window_params = [{transform_indices = @transform_0, window_bounds = array<i64: 16, 3200>}, {pipeline_mode = #tpu.pipeline_mode<synchronous>, transform_indices = @transform_1, window_bounds = array<i64: 3200, 512>}, {pipeline_mode = #tpu.pipeline_mode<synchronous>, transform_indices = @transform_2, window_bounds = array<i64: 1, 512>}, {pipeline_mode = #tpu.pipeline_mode<synchronous>, transform_indices = @transform_3, window_bounds = array<i64: 512, 128>}, {pipeline_mode = #tpu.pipeline_mode<synchronous>, transform_indices = @transform_4, window_bounds = array<i64: 1, 128>}, {transform_indices = @transform_5, window_bounds = array<i64: 16, 128>}]} {
    %c0 = arith.constant 0 : index
    %c0_0 = arith.constant 0 : index
    %0 = vector.load %arg1[%c0, %c0_0] : memref<16x3200xbf16, #tpu.memory_space<vmem>>, vector<16x3200xbf16>
    %c0_1 = arith.constant 0 : index
    %c0_2 = arith.constant 0 : index
    %1 = vector.load %arg2[%c0_1, %c0_2] : memref<3200x512xbf16, #tpu.memory_space<vmem>>, vector<3200x512xbf16>
    %cst = arith.constant dense<0.000000e+00> : vector<16x512xf32>
    %2 = tpu.matmul %0, %1, %cst {dimension_numbers = #tpu.dot_dimension_numbers<[1], [0], [0], [1], [0, 0, 1, 1], [], []>} : vector<16x3200xbf16>, vector<3200x512xbf16>, vector<16x512xf32> -> vector<16x512xf32>
    %c0_3 = arith.constant 0 : index
    %c0_4 = arith.constant 0 : index
    %3 = vector.load %arg3[%c0_3, %c0_4] : memref<1x512xf32, #tpu.memory_space<vmem>>, vector<1x512xf32>
    %4 = vector.broadcast %3 : vector<1x512xf32> to vector<16x512xf32>
    %5 = arith.addf %2, %4 : vector<16x512xf32>
    %cst_5 = arith.constant 0.000000e+00 : f32
    %6 = vector.broadcast %cst_5 : f32 to vector<16x512xf32>
    %7 = arith.maximumf %5, %6 : vector<16x512xf32>
    %8 = arith.truncf %7 : vector<16x512xf32> to vector<16x512xbf16>
    %c0_6 = arith.constant 0 : index
    %c0_7 = arith.constant 0 : index
    %9 = vector.load %arg4[%c0_6, %c0_7] : memref<512x128xbf16, #tpu.memory_space<vmem>>, vector<512x128xbf16>
    %cst_8 = arith.constant dense<0.000000e+00> : vector<16x128xf32>
    %10 = tpu.matmul %8, %9, %cst_8 {dimension_numbers = #tpu.dot_dimension_numbers<[1], [0], [0], [1], [0, 0, 1, 1], [], []>} : vector<16x512xbf16>, vector<512x128xbf16>, vector<16x128xf32> -> vector<16x128xf32>
    %c0_9 = arith.constant 0 : index
    %c0_10 = arith.constant 0 : index
    %11 = vector.load %arg5[%c0_9, %c0_10] : memref<1x128xf32, #tpu.memory_space<vmem>>, vector<1x128xf32>
    %12 = vector.broadcast %11 : vector<1x128xf32> to vector<16x128xf32>
    %13 = arith.addf %10, %12 : vector<16x128xf32>
    %14 = tpu.iota {dimensions = array<i32: 1>} : vector<16x128xi32>
    %c10_i32 = arith.constant 10 : i32
    %15 = vector.broadcast %c10_i32 : i32 to vector<16x128xi32>
    %16 = arith.cmpi slt, %14, %15 : vector<16x128xi32>
    %cst_11 = arith.constant 0xFF800000 : f32
    %17 = vector.broadcast %cst_11 : f32 to vector<16x128xf32>
    %18 = arith.select %16, %13, %17 : vector<16x128xi1>, vector<16x128xf32>
    %cst_12 = arith.constant dense<0xFF800000> : vector<16xf32>
    %19 = vector.multi_reduction <maximumf>, %18, %cst_12 [1] : vector<16x128xf32> to vector<16xf32>
    %20 = vector.shape_cast %19 : vector<16xf32> to vector<16x1xf32>
    %21 = vector.broadcast %20 : vector<16x1xf32> to vector<16x128xf32>
    %22 = arith.subf %18, %21 : vector<16x128xf32>
    %23 = math.exp %22 : vector<16x128xf32>
    %cst_13 = arith.constant 0.000000e+00 : f32
    %24 = vector.broadcast %cst_13 : f32 to vector<16x128xf32>
    %25 = arith.select %16, %23, %24 : vector<16x128xi1>, vector<16x128xf32>
    %cst_14 = arith.constant dense<0.000000e+00> : vector<16xf32>
    %26 = vector.multi_reduction <add>, %25, %cst_14 [1] : vector<16x128xf32> to vector<16xf32>
    %27 = vector.shape_cast %26 : vector<16xf32> to vector<16x1xf32>
    %28 = vector.broadcast %20 : vector<16x1xf32> to vector<16x128xf32>
    %29 = arith.subf %18, %28 : vector<16x128xf32>
    %30 = math.log %27 : vector<16x1xf32>
    %31 = vector.broadcast %30 : vector<16x1xf32> to vector<16x128xf32>
    %32 = arith.subf %29, %31 : vector<16x128xf32>
    %c0_15 = arith.constant 0 : index
    %c0_16 = arith.constant 0 : index
    %33 = vector.load %arg6[%c0_15, %c0_16] : memref<16x128xf32, #tpu.memory_space<vmem>>, vector<16x128xf32>
    tpu.vector_store %arg6[%c0_15, %c0_16], %32 {strides = array<i32>} : memref<16x128xf32, #tpu.memory_space<vmem>>, vector<16x128xf32>,
    return
  }
  func.func @transform_0(%arg0: i32) -> (i32, i32) {
    %c0_i32 = arith.constant 0 : i32
    %c0_i32_0 = arith.constant 0 : i32
    return %arg0, %c0_i32 : i32, i32
  }
  func.func @transform_1(%arg0: i32) -> (i32, i32) {
    %c0_i32 = arith.constant 0 : i32
    %c0_i32_0 = arith.constant 0 : i32
    %c0_i32_1 = arith.constant 0 : i32
    return %c0_i32, %c0_i32_0 : i32, i32
  }
  func.func @transform_2(%arg0: i32) -> (i32, i32) {
    %c0_i32 = arith.constant 0 : i32
    %c0_i32_0 = arith.constant 0 : i32
    %c0_i32_1 = arith.constant 0 : i32
    return %c0_i32, %c0_i32_0 : i32, i32
  }
  func.func @transform_3(%arg0: i32) -> (i32, i32) {
    %c0_i32 = arith.constant 0 : i32
    %c0_i32_0 = arith.constant 0 : i32
    %c0_i32_1 = arith.constant 0 : i32
    return %c0_i32, %c0_i32_0 : i32, i32
  }
  func.func @transform_4(%arg0: i32) -> (i32, i32) {
    %c0_i32 = arith.constant 0 : i32
    %c0_i32_0 = arith.constant 0 : i32
    %c0_i32_1 = arith.constant 0 : i32
    return %c0_i32, %c0_i32_0 : i32, i32
  }
  func.func @transform_5(%arg0: i32) -> (i32, i32) {
    %c0_i32 = arith.constant 0 : i32
    %c0_i32_0 = arith.constant 0 : i32
    return %arg0, %c0_i32 : i32, i32
  }
}

</mosaic_0001>

<bundles_post_ra>
// kernel: lenet_forward.3
= control target key start
LH: loop header
LB: loop body
LE: loop exit
PB: predicated region body
PF: predicated region fallthrough
CT: control target
= control target key end

     0   :  { %11 = vsyncpa [#allocation3], 0  ;;  %s3973_s0 = inlined_call_operand.vmem [shape: bf16[352,9], index: 0, kind: input, shape index: {}]   ;;  %s3974_s1 = inlined_call_operand.vmem [shape: bf16[352,9], index: 1, kind: input, shape index: {}]   ;;  %s3975_s2 = inlined_call_operand.vmem [shape: bf16[352,9], index: 2, kind: input, shape index: {}]   ;;  %s3976_s3 = inlined_call_operand.vmem [shape: bf16[352,9], index: 3, kind: input, shape index: {}]   ;;  %s3977_s4 = inlined_call_operand.hbm [shape: bf16[9,128], index: 4, kind: input, shape index: {}]   ;;  %s3978_s5 = inlined_call_operand.hbm [shape: f32[1,128], index: 5, kind: input, shape index: {}]   ;;  %s3979_s6 = inlined_call_operand.vmem [shape: bf16[352,128], index: 6, kind: output, shape index: {}]  }
   0x1   :  { %12 = vsyncpa [#allocation5], 0  ;;  %s3049_s21 = smov [#allocation2]   ;;  %s3001_s25 = scalar_lea.hbm %s3977_s4, 128 }
   0x2   :  { %s26_s22 = sshll.u32 %s3049_s21, 4  ;;  %p3002_p0 = scmp.ne.s32.totalorder %s3977_s4, %s3001_s25  ;;  %s27_s22 = int_to_ptr.vmem [resolvable:$true] %s26_s22 }
   0x3   :  { %p3005_p1 = scmp.lt.u32.totalorder %s3001_s25, %s3977_s4 }
   0x5   :  { %p3007_p2 = pnand %p3005_p1, %p3002_p0 }
   0x7   :  { %3010 = shalt.err (!%p3007_p2)
}
   0x8   :  { %s3011_s30 = scalar_lea.vmem %s27_s22, 128  ;;  %p3016_p4 = scmp.lt.s32.totalorder %s27_s22, %s27_s22 }
   0x9   :  { %p3012_p3 = scmp.ne.s32.totalorder %s27_s22, %s3011_s30  ;;  %p3017_p5 = scmp.lt.s32.totalorder %s3011_s30, %s3011_s30 }
   0xb   :  { %p3018_p6 = por %p3017_p5, %p3016_p4 }
   0xd   :  { %p3019_p7 = pnand %p3018_p6, %p3012_p3 }
   0xf   :  { %3022 = shalt.err (!%p3019_p7)
}
  0x10   :  { %s3050_s7 = smov 64   ;;  %s3051_s8 = smov 4  }
  0x11   :  { %32 = dma.hbm_to_vmem [thread:$0]  %s3977_s4, 128, %s27_s22, [#allocation3], %s3050_s7, %s3050_s7, %s3051_s8  }
  0x12   :  { %s3052_s11 = smov [#allocation4]   ;;  %s3023_s15 = scalar_lea.hbm %s3978_s5, 16 }
  0x13   :  { %s39_s12 = sshll.u32 %s3052_s11, 4  ;;  %p3024_p8 = scmp.ne.s32.totalorder %s3978_s5, %s3023_s15  ;;  %s40_s12 = int_to_ptr.vmem [resolvable:$true] %s39_s12 }
  0x14   :  { %p3027_p9 = scmp.lt.u32.totalorder %s3023_s15, %s3978_s5 }
  0x16   :  { %p3029_p10 = pnand %p3027_p9, %p3024_p8 }
  0x18   :  { %3032 = shalt.err (!%p3029_p10)
}
  0x19   :  { %s3033_s20 = scalar_lea.vmem %s40_s12, 16  ;;  %s3037_s4 = scalar_lea.vmem %s40_s12, 32 }
  0x1a   :  { %p3034_p11 = scmp.ne.s32.totalorder %s40_s12, %s3033_s20  ;;  %p3038_p12 = scmp.lt.s32.totalorder %s40_s12, %s40_s12 }
  0x1b   :  { %p3039_p13 = scmp.lt.s32.totalorder %s3037_s4, %s3033_s20 }
  0x1d   :  { %p3040_p0 = por %p3039_p13, %p3038_p12 }
  0x1f   :  { %p3041_p1 = pnand %p3040_p0, %p3034_p11 }
  0x21   :  { %3044 = shalt.err (!%p3041_p1)
}
  0x22   :  { %42 = dma.hbm_to_vmem [thread:$0]  %s3978_s5, 16, %s40_s12, [#allocation5]  }
  0x23   :  { %3045 = dma.done.wait [#allocation3], 128  }
  0x24   :  { %3046 = vsyncadd [#allocation3], 4294967168 }
  0x25   :  { %3047 = dma.done.wait [#allocation5], 16  }
  0x26   :  { %3048 = vsyncadd [#allocation5], 4294967280  ;;  %vm278_vm0 = vcmask 1043456   ;;  %vm279_vm1 = vcmask 1044480   ;;  %v3053_v0 = vmov 65535   ;;  %vm211_vm2 = vcmask 72704  }
  0x27   :  { %v280_v1 = vsel %vm278_vm0, 4294967295, %v3053_v0  ;;  %v2912_v3 = vld [vmem:[#allocation2] sm:$0x1f]   ;;  %v2915_v7 = vld [vmem:[%s3973_s0 + $0x8] sm:$0xff]   ;;  %v2917_v9 = vld [vmem:[%s3973_s0 + $0x10] sm:$0xff]  }
  0x28   :  { %v281_v2 = vsel %vm279_vm1, %v280_v1, 0  ;;  %v2913_v4 = vld [vmem:[%s3973_s0] sm:$0xff]   ;;  %v2916_v8 = vld [vmem:[%s3974_s1 + $0x8] sm:$0xff]   ;;  %v2918_v10 = vld [vmem:[%s3974_s1 + $0x10] sm:$0xff]  }
  0x29   :  { %v283_v5 = vand.u32 %v2912_v3, %v281_v2  ;;  %v2914_v6 = vld [vmem:[%s3974_s1] sm:$0xff]   ;;  %2725 = vmatprep.mubr.msk.bf16.mxu0 %vm211_vm2, %v2913_v4  ;;  %v2919_v11 = vld [vmem:[%s3973_s0 + $0x18] sm:$0xff]   ;;  %v2923_v15 = vld [vmem:[%s3973_s0 + $0x28] sm:$0xff]  }
  0x2a   :  { %2771 = vmatprep.mubr.msk.bf16.mxu1 %vm211_vm2, %v2914_v6  ;;  %v2920_v12 = vld [vmem:[%s3974_s1 + $0x18] sm:$0xff]   ;;  %v2921_v13 = vld [vmem:[%s3973_s0 + $0x20] sm:$0xff]   ;;  %v2924_v16 = vld [vmem:[%s3974_s1 + $0x28] sm:$0xff]  }
  0x2b   :  { %2723 = vmatprep.subr.bf16.mxu0 %v283_v5  ;;  %2769 = vmatprep.subr.bf16.mxu1 %v283_v5  ;;  %v2922_v14 = vld [vmem:[%s3974_s1 + $0x20] sm:$0xff]   ;;  %v2925_v17 = vld [vmem:[%s3973_s0 + $0x30] sm:$0xff]   ;;  %v2927_v19 = vld [vmem:[%s3973_s0 + $0x38] sm:$0xff]  }
  0x2c   :  { %2724 = vmatpush3.bf16.msra.mxu0 %v283_v5  ;;  %2770 = vmatpush3.bf16.msra.mxu1 %v283_v5  ;;  %v2926_v18 = vld [vmem:[%s3974_s1 + $0x30] sm:$0xff]   ;;  %v2928_v20 = vld [vmem:[%s3974_s1 + $0x38] sm:$0xff]   ;;  %v2929_v21 = vld [vmem:[%s3973_s0 + $0x40] sm:$0xff]  }
  0x2d   :  { %2815 = vmatprep.subr.bf16.mxu0 %v283_v5  ;;  %2861 = vmatprep.subr.bf16.mxu1 %v283_v5  ;;  %v2930_v22 = vld [vmem:[%s3974_s1 + $0x40] sm:$0xff]   ;;  %v2931_v23 = vld [vmem:[%s3973_s0 + $0x48] sm:$0xff]   ;;  %v2933_v25 = vld [vmem:[%s3973_s0 + $0x50] sm:$0xff]  }
  0x2e   :  { %v2932_v24 = vld [vmem:[%s3974_s1 + $0x48] sm:$0xff]   ;;  %v2934_v26 = vld [vmem:[%s3974_s1 + $0x50] sm:$0xff]   ;;  %v2935_v27 = vld [vmem:[%s3973_s0 + $0x58] sm:$0xff]  }
  0x2f   :  { %2726 = vmatmul.mubr.msk.bf16.vlgmr.msra.gmra.mrb[0].mxu0 %vm211_vm2, %v2915_v7  ;;  %2772 = vmatmul.mubr.msk.bf16.vlgmr.msra.gmra.mrb[0].mxu1 %vm211_vm2, %v2916_v8  ;;  %v2936_v28 = vld [vmem:[%s3974_s1 + $0x58] sm:$0xff]   ;;  %v2937_v29 = vld [vmem:[%s3973_s0 + $0x60] sm:$0xff]   ;;  %v2939_v31 = vld [vmem:[%s3973_s0 + $0x68] sm:$0xff]  }
  0x30   :  { %2816 = vmatpush3.bf16.msra.mxu0 %v283_v5  ;;  %2862 = vmatpush3.bf16.msra.mxu1 %v283_v5  ;;  %v2938_v30 = vld [vmem:[%s3974_s1 + $0x60] sm:$0xff]   ;;  %v2940_v32 = vld [vmem:[%s3974_s1 + $0x68] sm:$0xff]   ;;  %v2941_v33 = vld [vmem:[%s3973_s0 + $0x70] sm:$0xff]  }
  0x31   :  { %2729 = vmatprep.mubr.msk.bf16.mxu0 %vm211_vm2, %v2917_v9  ;;  %2775 = vmatprep.mubr.msk.bf16.mxu1 %vm211_vm2, %v2918_v10  ;;  %v2942_v34 = vld [vmem:[%s3974_s1 + $0x70] sm:$0xff]   ;;  %v2943_v35 = vld [vmem:[%s3973_s0 + $0x78] sm:$0xff]   ;;  %v2945_v37 = vld [vmem:[%s3973_s0 + $0x80] sm:$0xff]  }
  0x32   :  { %v2944_v36 = vld [vmem:[%s3974_s1 + $0x78] sm:$0xff]   ;;  %v2946_v38 = vld [vmem:[%s3974_s1 + $0x80] sm:$0xff]   ;;  %v2947_v39 = vld [vmem:[%s3973_s0 + $0x88] sm:$0xff]  }
  0x33   :  { %v2948_v40 = vld [vmem:[%s3974_s1 + $0x88] sm:$0xff]   ;;  %v2949_v41 = vld [vmem:[%s3973_s0 + $0x90] sm:$0xff]   ;;  %v2951_v43 = vld [vmem:[%s3973_s0 + $0x98] sm:$0xff]  }
  0x34   :  { %v2950_v42 = vld [vmem:[%s3974_s1 + $0x90] sm:$0xff]   ;;  %v2952_v44 = vld [vmem:[%s3974_s1 + $0x98] sm:$0xff]   ;;  %v2953_v45 = vld [vmem:[%s3973_s0 + $0xa0] sm:$0xff]  }
  0x35   :  { %v2954_v46 = vld [vmem:[%s3974_s1 + $0xa0] sm:$0xff]   ;;  %v2955_v47 = vld [vmem:[%s3973_s0 + $0xa8] sm:$0xff]   ;;  %v2961_v53 = vld [vmem:[%s3975_s2 + $0x10] sm:$0xff]  }
  0x36   :  { %v2956_v48 = vld [vmem:[%s3974_s1 + $0xa8] sm:$0xff]   ;;  %v2957_v49 = vld [vmem:[%s3975_s2] sm:$0xff]   ;;  %v2962_v54 = vld [vmem:[%s3976_s3 + $0x10] sm:$0xff]  }
  0x37   :  { %2730 = vmatmul.mubr.msk.bf16.gmra.mrb[4].mxu0 %vm211_vm2, %v2919_v11  ;;  %2776 = vmatmul.mubr.msk.bf16.gmra.mrb[4].mxu1 %vm211_vm2, %v2920_v12  ;;  %v2958_v50 = vld [vmem:[%s3976_s3] sm:$0xff]   ;;  %v2959_v51 = vld [vmem:[%s3975_s2 + $0x8] sm:$0xff]   ;;  %v2963_v55 = vld [vmem:[%s3975_s2 + $0x18] sm:$0xff]  }
  0x38   :  { %2733 = vmatprep.mubr.msk.bf16.mxu0 %vm211_vm2, %v2921_v13  ;;  %2779 = vmatprep.mubr.msk.bf16.mxu1 %vm211_vm2, %v2922_v14  ;;  %v2960_v52 = vld [vmem:[%s3976_s3 + $0x8] sm:$0xff]   ;;  %v2964_v56 = vld [vmem:[%s3976_s3 + $0x18] sm:$0xff]   ;;  %v2965_v57 = vld [vmem:[%s3975_s2 + $0x20] sm:$0xff]  }
  0x39   :  { %v2966_v58 = vld [vmem:[%s3976_s3 + $0x20] sm:$0xff]   ;;  %v2967_v59 = vld [vmem:[%s3975_s2 + $0x28] sm:$0xff]   ;;  %v2969_v61 = vld [vmem:[%s3975_s2 + $0x30] sm:$0xff]  }
  0x3a   :  { %v2968_v60 = vld [vmem:[%s3976_s3 + $0x28] sm:$0xff]   ;;  %v2970_v62 = vld [vmem:[%s3976_s3 + $0x30] sm:$0xff]   ;;  %v2971_v63 = vld [vmem:[%s3975_s2 + $0x38] sm:$0xff]  }
  0x3b   :  { %v2972_v0 = vld [vmem:[%s3976_s3 + $0x38] sm:$0xff]   ;;  %v2973_v1 = vld [vmem:[%s3975_s2 + $0x40] sm:$0xff]   ;;  %v2975_v3 = vld [vmem:[%s3975_s2 + $0x48] sm:$0xff]  }
  0x3c   :  { %v2974_v2 = vld [vmem:[%s3976_s3 + $0x40] sm:$0xff]   ;;  %v2976_v4 = vld [vmem:[%s3976_s3 + $0x48] sm:$0xff]   ;;  %v2977_v5 = vld [vmem:[%s3975_s2 + $0x50] sm:$0xff]  }
  0x3d   :  { %v2978_v6 = vld [vmem:[%s3976_s3 + $0x50] sm:$0xff]   ;;  %v2979_v7 = vld [vmem:[%s3975_s2 + $0x58] sm:$0xff]   ;;  %v2981_v9 = vld [vmem:[%s3975_s2 + $0x60] sm:$0xff]  }
  0x3e   :  { %v2980_v8 = vld [vmem:[%s3976_s3 + $0x58] sm:$0xff]   ;;  %v2982_v10 = vld [vmem:[%s3976_s3 + $0x60] sm:$0xff]   ;;  %v2983_v11 = vld [vmem:[%s3975_s2 + $0x68] sm:$0xff]  }
  0x3f   :  { %2734 = vmatmul.mubr.msk.bf16.gmra.mrb[8].mxu0 %vm211_vm2, %v2923_v15  ;;  %2780 = vmatmul.mubr.msk.bf16.gmra.mrb[8].mxu1 %vm211_vm2, %v2924_v16  ;;  %v2984_v12 = vld [vmem:[%s3976_s3 + $0x68] sm:$0xff]   ;;  %v2985_v13 = vld [vmem:[%s3975_s2 + $0x70] sm:$0xff]   ;;  %v2987_v15 = vld [vmem:[%s3975_s2 + $0x78] sm:$0xff]  }
  0x40   :  { %2737 = vmatprep.mubr.msk.bf16.mxu0 %vm211_vm2, %v2925_v17  ;;  %2783 = vmatprep.mubr.msk.bf16.mxu1 %vm211_vm2, %v2926_v18  ;;  %v2986_v14 = vld [vmem:[%s3976_s3 + $0x70] sm:$0xff]   ;;  %v2988_v16 = vld [vmem:[%s3976_s3 + $0x78] sm:$0xff]   ;;  %v2989_v17 = vld [vmem:[%s3975_s2 + $0x80] sm:$0xff]  }
  0x41   :  { %v2990_v18 = vld [vmem:[%s3976_s3 + $0x80] sm:$0xff]  }
  0x47   :  { %2738 = vmatmul.mubr.msk.bf16.gmra.mrb[12].mxu0 %vm211_vm2, %v2927_v19  ;;  %2784 = vmatmul.mubr.msk.bf16.gmra.mrb[12].mxu1 %vm211_vm2, %v2928_v20  ;;  %v2991_v19 = vld [vmem:[%s3975_s2 + $0x88] sm:$0xff]  }
  0x48   :  { %2741 = vmatprep.mubr.msk.bf16.mxu0 %vm211_vm2, %v2929_v21  ;;  %2787 = vmatprep.mubr.msk.bf16.mxu1 %vm211_vm2, %v2930_v22  ;;  %v2992_v20 = vld [vmem:[%s3976_s3 + $0x88] sm:$0xff]   ;;  %v2993_v21 = vld [vmem:[%s3975_s2 + $0x90] sm:$0xff]  }
  0x49   :  { %v2994_v22 = vld [vmem:[%s3976_s3 + $0x90] sm:$0xff]  }
  0x4f   :  { %2742 = vmatmul.mubr.msk.bf16.gmra.mrb[16].mxu0 %vm211_vm2, %v2931_v23  ;;  %2788 = vmatmul.mubr.msk.bf16.gmra.mrb[16].mxu1 %vm211_vm2, %v2932_v24  ;;  %v2995_v23 = vld [vmem:[%s3975_s2 + $0x98] sm:$0xff]  }
  0x50   :  { %2745 = vmatprep.mubr.msk.bf16.mxu0 %vm211_vm2, %v2933_v25  ;;  %2791 = vmatprep.mubr.msk.bf16.mxu1 %vm211_vm2, %v2934_v26  ;;  %v2996_v24 = vld [vmem:[%s3976_s3 + $0x98] sm:$0xff]   ;;  %v2997_v25 = vld [vmem:[%s3975_s2 + $0xa0] sm:$0xff]  }
  0x51   :  { %v2998_v26 = vld [vmem:[%s3976_s3 + $0xa0] sm:$0xff]  }
  0x57   :  { %2746 = vmatmul.mubr.msk.bf16.gmra.mrb[20].mxu0 %vm211_vm2, %v2935_v27  ;;  %2792 = vmatmul.mubr.msk.bf16.gmra.mrb[20].mxu1 %vm211_vm2, %v2936_v28  ;;  %v2999_v27 = vld [vmem:[%s3975_s2 + $0xa8] sm:$0xff]  }
  0x58   :  { %2749 = vmatprep.mubr.msk.bf16.mxu0 %vm211_vm2, %v2937_v29  ;;  %2795 = vmatprep.mubr.msk.bf16.mxu1 %vm211_vm2, %v2938_v30  ;;  %v3000_v28 = vld [vmem:[%s3976_s3 + $0xa8] sm:$0xff]  }
  0x5f   :  { %2750 = vmatmul.mubr.msk.bf16.gmra.mrb[24].mxu0 %vm211_vm2, %v2939_v31  ;;  %2796 = vmatmul.mubr.msk.bf16.gmra.mrb[24].mxu1 %vm211_vm2, %v2940_v32 }
  0x60   :  { %2753 = vmatprep.mubr.msk.bf16.mxu0 %vm211_vm2, %v2941_v33  ;;  %2799 = vmatprep.mubr.msk.bf16.mxu1 %vm211_vm2, %v2942_v34 }
  0x67   :  { %2754 = vmatmul.mubr.msk.bf16.gmra.mrb[28].mxu0 %vm211_vm2, %v2943_v35  ;;  %2800 = vmatmul.mubr.msk.bf16.gmra.mrb[28].mxu1 %vm211_vm2, %v2944_v36 }
  0x68   :  { %2757 = vmatprep.mubr.msk.bf16.mxu0 %vm211_vm2, %v2945_v37  ;;  %2803 = vmatprep.mubr.msk.bf16.mxu1 %vm211_vm2, %v2946_v38 }
  0x6f   :  { %2758 = vmatmul.mubr.msk.bf16.gmra.mrb[32].mxu0 %vm211_vm2, %v2947_v39  ;;  %2804 = vmatmul.mubr.msk.bf16.gmra.mrb[32].mxu1 %vm211_vm2, %v2948_v40 }
  0x70   :  { %2761 = vmatprep.mubr.msk.bf16.mxu0 %vm211_vm2, %v2949_v41  ;;  %2807 = vmatprep.mubr.msk.bf16.mxu1 %vm211_vm2, %v2950_v42 }
  0x77   :  { %2762 = vmatmul.mubr.msk.bf16.gmra.mrb[36].mxu0 %vm211_vm2, %v2951_v43  ;;  %2808 = vmatmul.mubr.msk.bf16.gmra.mrb[36].mxu1 %vm211_vm2, %v2952_v44 }
  0x78   :  { %2765 = vmatprep.mubr.msk.bf16.mxu0 %vm211_vm2, %v2953_v45  ;;  %2811 = vmatprep.mubr.msk.bf16.mxu1 %vm211_vm2, %v2954_v46 }
  0x7f   :  { %2766 = vmatmul.mubr.msk.bf16.gmra.mrb[40].mxu0 %vm211_vm2, %v2955_v47  ;;  %2812 = vmatmul.mubr.msk.bf16.gmra.mrb[40].mxu1 %vm211_vm2, %v2956_v48 }
  0x80   :  { %2817 = vmatprep.mubr.msk.bf16.mxu0 %vm211_vm2, %v2957_v49  ;;  %2863 = vmatprep.mubr.msk.bf16.mxu1 %vm211_vm2, %v2958_v50 }
  0x87   :  { %2818 = vmatmul.mubr.msk.bf16.vlgmr.msra.gmra.mrb[44].mxu0 %vm211_vm2, %v2959_v51  ;;  %2864 = vmatmul.mubr.msk.bf16.vlgmr.msra.gmra.mrb[44].mxu1 %vm211_vm2, %v2960_v52 }
  0x88   :  { %2821 = vmatprep.mubr.msk.bf16.mxu0 %vm211_vm2, %v2961_v53  ;;  %2867 = vmatprep.mubr.msk.bf16.mxu1 %vm211_vm2, %v2962_v54 }
  0x8f   :  { %2822 = vmatmul.mubr.msk.bf16.gmra.mrb[48].mxu0 %vm211_vm2, %v2963_v55  ;;  %2868 = vmatmul.mubr.msk.bf16.gmra.mrb[48].mxu1 %vm211_vm2, %v2964_v56 }
  0x90   :  { %2825 = vmatprep.mubr.msk.bf16.mxu0 %vm211_vm2, %v2965_v57  ;;  %2871 = vmatprep.mubr.msk.bf16.mxu1 %vm211_vm2, %v2966_v58 }
  0x97   :  { %2826 = vmatmul.mubr.msk.bf16.gmra.mrb[52].mxu0 %vm211_vm2, %v2967_v59  ;;  %2872 = vmatmul.mubr.msk.bf16.gmra.mrb[52].mxu1 %vm211_vm2, %v2968_v60 }
  0x98   :  { %2829 = vmatprep.mubr.msk.bf16.mxu0 %vm211_vm2, %v2969_v61  ;;  %2875 = vmatprep.mubr.msk.bf16.mxu1 %vm211_vm2, %v2970_v62 }
  0x9f   :  { %2830 = vmatmul.mubr.msk.bf16.gmra.mrb[56].mxu0 %vm211_vm2, %v2971_v63  ;;  %2876 = vmatmul.mubr.msk.bf16.gmra.mrb[56].mxu1 %vm211_vm2, %v2972_v0 }
  0xa0   :  { %2833 = vmatprep.mubr.msk.bf16.mxu0 %vm211_vm2, %v2973_v1  ;;  %2879 = vmatprep.mubr.msk.bf16.mxu1 %vm211_vm2, %v2974_v2 }
  0xa7   :  { %2834 = vmatmul.mubr.msk.bf16.gmra.mrb[60].mxu0 %vm211_vm2, %v2975_v3  ;;  %2880 = vmatmul.mubr.msk.bf16.gmra.mrb[60].mxu1 %vm211_vm2, %v2976_v4 }
  0xa8   :  { %2837 = vmatprep.mubr.msk.bf16.mxu0 %vm211_vm2, %v2977_v5  ;;  %2883 = vmatprep.mubr.msk.bf16.mxu1 %vm211_vm2, %v2978_v6 }
  0xaf   :  { %2838 = vmatmul.mubr.msk.bf16.gmra.mrb[64].mxu0 %vm211_vm2, %v2979_v7  ;;  %2884 = vmatmul.mubr.msk.bf16.gmra.mrb[64].mxu1 %vm211_vm2, %v2980_v8 }
  0xb0   :  { %2841 = vmatprep.mubr.msk.bf16.mxu0 %vm211_vm2, %v2981_v9  ;;  %2887 = vmatprep.mubr.msk.bf16.mxu1 %vm211_vm2, %v2982_v10 }
  0xb7   :  { %2842 = vmatmul.mubr.msk.bf16.gmra.mrb[68].mxu0 %vm211_vm2, %v2983_v11  ;;  %2888 = vmatmul.mubr.msk.bf16.gmra.mrb[68].mxu1 %vm211_vm2, %v2984_v12 }
  0xb8   :  { %2845 = vmatprep.mubr.msk.bf16.mxu0 %vm211_vm2, %v2985_v13  ;;  %2891 = vmatprep.mubr.msk.bf16.mxu1 %vm211_vm2, %v2986_v14 }
  0xbf   :  { %2846 = vmatmul.mubr.msk.bf16.gmra.mrb[72].mxu0 %vm211_vm2, %v2987_v15  ;;  %2892 = vmatmul.mubr.msk.bf16.gmra.mrb[72].mxu1 %vm211_vm2, %v2988_v16 }
  0xc0   :  { %2849 = vmatprep.mubr.msk.bf16.mxu0 %vm211_vm2, %v2989_v17  ;;  %2895 = vmatprep.mubr.msk.bf16.mxu1 %vm211_vm2, %v2990_v18 }
  0xc7   :  { %2850 = vmatmul.mubr.msk.bf16.gmra.mrb[76].mxu0 %vm211_vm2, %v2991_v19  ;;  %2896 = vmatmul.mubr.msk.bf16.gmra.mrb[76].mxu1 %vm211_vm2, %v2992_v20 }
  0xc8   :  { %2853 = vmatprep.mubr.msk.bf16.mxu0 %vm211_vm2, %v2993_v21  ;;  %2899 = vmatprep.mubr.msk.bf16.mxu1 %vm211_vm2, %v2994_v22 }
  0xcf   :  { %2854 = vmatmul.mubr.msk.bf16.gmra.mrb[80].mxu0 %vm211_vm2, %v2995_v23  ;;  %2900 = vmatmul.mubr.msk.bf16.gmra.mrb[80].mxu1 %vm211_vm2, %v2996_v24 }
  0xd0   :  { %2857 = vmatprep.mubr.msk.bf16.mxu0 %vm211_vm2, %v2997_v25  ;;  %2903 = vmatprep.mubr.msk.bf16.mxu1 %vm211_vm2, %v2998_v26 }
  0xd7   :  { %2858 = vmatmul.mubr.msk.bf16.gmra.mrb[84].mxu0 %vm211_vm2, %v2999_v27  ;;  %2904 = vmatmul.mubr.msk.bf16.gmra.mrb[84].mxu1 %vm211_vm2, %v3000_v28  ;;  %v3729_v27 = vld [vmem:[#allocation4] ss:$0 sm:$0xff] }
 0x102   :  { %v3465_v29 = vpop.f32.mrb[0].mxu0  ;;  %v3467_v30 = vpop.f32.mrb[0].mxu1 }
 0x103   :  { %v3471_v32 = vpop.f32.mrb[1].mxu0  ;;  %v3473_v33 = vpop.f32.mrb[1].mxu1  ;;  %v4062_v21 = vmax.f32 %v3465_v29, %v3467_v30 }
 0x104   :  { %v3477_v35 = vpop.f32.mrb[2].mxu0  ;;  %v3479_v36 = vpop.f32.mrb[2].mxu1  ;;  %v4063_v24 = vmax.f32 %v3471_v32, %v3473_v33 }
 0x105   :  { %v3483_v38 = vpop.f32.mrb[3].mxu0  ;;  %v3485_v39 = vpop.f32.mrb[3].mxu1 }
 0x106   :  { %v4065_v29 = vmax.f32 %v3483_v38, %v3485_v39 }
 0x10a   :  { %v3489_v41 = vpop.f32.mrb[4].mxu0  ;;  %v3491_v42 = vpop.f32.mrb[4].mxu1 }
 0x10b   :  { %v3495_v44 = vpop.f32.mrb[5].mxu0  ;;  %v3497_v45 = vpop.f32.mrb[5].mxu1  ;;  %v4066_v38 = vmax.f32 %v3489_v41, %v3491_v42 }
 0x10c   :  { %v3501_v47 = vpop.f32.mrb[6].mxu0  ;;  %v3503_v48 = vpop.f32.mrb[6].mxu1 }
 0x10d   :  { %v3507_v50 = vpop.f32.mrb[7].mxu0  ;;  %v3509_v51 = vpop.f32.mrb[7].mxu1 }
 0x112   :  { %v3513_v53 = vpop.f32.mrb[8].mxu0  ;;  %v3515_v54 = vpop.f32.mrb[8].mxu1 }
 0x113   :  { %v3519_v56 = vpop.f32.mrb[9].mxu0  ;;  %v3521_v57 = vpop.f32.mrb[9].mxu1 }
 0x114   :  { %v3525_v59 = vpop.f32.mrb[10].mxu0  ;;  %v3527_v60 = vpop.f32.mrb[10].mxu1 }
 0x115   :  { %v3531_v62 = vpop.f32.mrb[11].mxu0  ;;  %v3533_v63 = vpop.f32.mrb[11].mxu1 }
 0x11a   :  { %v3537_v1 = vpop.f32.mrb[12].mxu0  ;;  %v3539_v2 = vpop.f32.mrb[12].mxu1 }
 0x11b   :  { %v3543_v4 = vpop.f32.mrb[13].mxu0  ;;  %v3545_v5 = vpop.f32.mrb[13].mxu1 }
 0x11c   :  { %v3549_v7 = vpop.f32.mrb[14].mxu0  ;;  %v3551_v8 = vpop.f32.mrb[14].mxu1 }
 0x11d   :  { %v3555_v10 = vpop.f32.mrb[15].mxu0  ;;  %v3557_v11 = vpop.f32.mrb[15].mxu1 }
 0x122   :  { %v3561_v13 = vpop.f32.mrb[16].mxu0  ;;  %v3563_v14 = vpop.f32.mrb[16].mxu1 }
 0x123   :  { %v3567_v16 = vpop.f32.mrb[17].mxu0  ;;  %v3569_v17 = vpop.f32.mrb[17].mxu1 }
 0x124   :  { %v3573_v19 = vpop.f32.mrb[18].mxu0  ;;  %v3575_v20 = vpop.f32.mrb[18].mxu1 }
 0x125   :  { %v3579_v22 = vpop.f32.mrb[19].mxu0  ;;  %v3581_v23 = vpop.f32.mrb[19].mxu1 }
 0x12a   :  { %v3585_v25 = vpop.f32.mrb[20].mxu0  ;;  %v3587_v26 = vpop.f32.mrb[20].mxu1 }
 0x12b   :  { %v3591_v28 = vpop.f32.mrb[21].mxu0  ;;  %v3593_v18 = vpop.f32.mrb[21].mxu1 }
 0x12c   :  { %v3597_v15 = vpop.f32.mrb[22].mxu0  ;;  %v3599_v12 = vpop.f32.mrb[22].mxu1 }
 0x12d   :  { %v3603_v9 = vpop.f32.mrb[23].mxu0  ;;  %v3605_v6 = vpop.f32.mrb[23].mxu1 }
 0x12e   :  { %4021 = vst [vmem:[#allocation8_spill] sm:$0xff] %v3605_v6 }
 0x132   :  { %v3609_v3 = vpop.f32.mrb[24].mxu0  ;;  %v3611_v0 = vpop.f32.mrb[24].mxu1 }
 0x133   :  { %4022 = vst [vmem:[#allocation9_spill] sm:$0xff] %v3609_v3  ;;  %4023 = vst [vmem:[#allocation10_spill] sm:$0xff] %v3611_v0  ;;  %v3615_v61 = vpop.f32.mrb[25].mxu0  ;;  %v3617_v58 = vpop.f32.mrb[25].mxu1 }
 0x134   :  { %4024 = vst [vmem:[#allocation11_spill] sm:$0xff] %v3615_v61  ;;  %4025 = vst [vmem:[#allocation12_spill] sm:$0xff] %v3617_v58  ;;  %v3621_v55 = vpop.f32.mrb[26].mxu0  ;;  %v3623_v52 = vpop.f32.mrb[26].mxu1 }
 0x135   :  { %4026 = vst [vmem:[#allocation13_spill] sm:$0xff] %v3621_v55  ;;  %4027 = vst [vmem:[#allocation14_spill] sm:$0xff] %v3623_v52  ;;  %v3627_v49 = vpop.f32.mrb[27].mxu0  ;;  %v3629_v46 = vpop.f32.mrb[27].mxu1 }
 0x136   :  { %4028 = vst [vmem:[#allocation15_spill] sm:$0xff] %v3627_v49  ;;  %4029 = vst [vmem:[#allocation16_spill] sm:$0xff] %v3629_v46 }
 0x13a   :  { %v3633_v43 = vpop.f32.mrb[28].mxu0  ;;  %v3635_v40 = vpop.f32.mrb[28].mxu1 }
 0x13b   :  { %4030 = vst [vmem:[#allocation17_spill] sm:$0xff] %v3633_v43  ;;  %4031 = vst [vmem:[#allocation18_spill] sm:$0xff] %v3635_v40  ;;  %v3639_v37 = vpop.f32.mrb[29].mxu0  ;;  %v3641_v34 = vpop.f32.mrb[29].mxu1 }
 0x13c   :  { %4032 = vst [vmem:[#allocation19_spill] sm:$0xff] %v3639_v37  ;;  %4033 = vst [vmem:[#allocation20_spill] sm:$0xff] %v3641_v34  ;;  %v3645_v31 = vpop.f32.mrb[30].mxu0  ;;  %v3647_v52 = vpop.f32.mrb[30].mxu1 }
 0x13d   :  { %4034 = vst [vmem:[#allocation21_spill] sm:$0xff] %v3645_v31  ;;  %4035 = vst [vmem:[#allocation22_spill] sm:$0xff] %v3647_v52  ;;  %v3651_v46 = vpop.f32.mrb[31].mxu0  ;;  %v3653_v49 = vpop.f32.mrb[31].mxu1 }
 0x13e   :  { %4036 = vst [vmem:[#allocation23_spill] sm:$0xff] %v3651_v46  ;;  %4037 = vst [vmem:[#allocation24_spill] sm:$0xff] %v3653_v49 }
 0x142   :  { %v3657_v40 = vpop.f32.mrb[32].mxu0  ;;  %v3659_v43 = vpop.f32.mrb[32].mxu1 }
 0x143   :  { %4038 = vst [vmem:[#allocation25_spill] sm:$0xff] %v3657_v40  ;;  %4039 = vst [vmem:[#allocation26_spill] sm:$0xff] %v3659_v43  ;;  %v3663_v34 = vpop.f32.mrb[33].mxu0  ;;  %v3665_v37 = vpop.f32.mrb[33].mxu1 }
 0x144   :  { %4040 = vst [vmem:[#allocation27_spill] sm:$0xff] %v3663_v34  ;;  %4041 = vst [vmem:[#allocation28_spill] sm:$0xff] %v3665_v37  ;;  %v3669_v52 = vpop.f32.mrb[34].mxu0  ;;  %v3671_v31 = vpop.f32.mrb[34].mxu1 }
 0x145   :  { %4042 = vst [vmem:[#allocation29_spill] sm:$0xff] %v3669_v52  ;;  %4043 = vst [vmem:[#allocation30_spill] sm:$0xff] %v3671_v31  ;;  %v3675_v49 = vpop.f32.mrb[35].mxu0  ;;  %v3677_v46 = vpop.f32.mrb[35].mxu1 }
 0x146   :  { %4044 = vst [vmem:[#allocation31_spill] sm:$0xff] %v3675_v49  ;;  %4045 = vst [vmem:[#allocation32_spill] sm:$0xff] %v3677_v46 }
 0x14a   :  { %v3681_v43 = vpop.f32.mrb[36].mxu0  ;;  %v3683_v40 = vpop.f32.mrb[36].mxu1 }
 0x14b   :  { %4046 = vst [vmem:[#allocation33_spill] sm:$0xff] %v3681_v43  ;;  %4047 = vst [vmem:[#allocation34_spill] sm:$0xff] %v3683_v40  ;;  %v3687_v37 = vpop.f32.mrb[37].mxu0  ;;  %v3689_v34 = vpop.f32.mrb[37].mxu1 }
 0x14c   :  { %4048 = vst [vmem:[#allocation35_spill] sm:$0xff] %v3687_v37  ;;  %4049 = vst [vmem:[#allocation36_spill] sm:$0xff] %v3689_v34  ;;  %v3693_v31 = vpop.f32.mrb[38].mxu0  ;;  %v3695_v52 = vpop.f32.mrb[38].mxu1 }
 0x14d   :  { %4050 = vst [vmem:[#allocation37_spill] sm:$0xff] %v3693_v31  ;;  %4051 = vst [vmem:[#allocation38_spill] sm:$0xff] %v3695_v52  ;;  %v3699_v46 = vpop.f32.mrb[39].mxu0  ;;  %v3701_v49 = vpop.f32.mrb[39].mxu1 }
 0x14e   :  { %4052 = vst [vmem:[#allocation39_spill] sm:$0xff] %v3699_v46  ;;  %4053 = vst [vmem:[#allocation40_spill] sm:$0xff] %v3701_v49 }
 0x152   :  { %v3705_v40 = vpop.f32.mrb[40].mxu0  ;;  %v3707_v43 = vpop.f32.mrb[40].mxu1 }
 0x153   :  { %4054 = vst [vmem:[#allocation41_spill] sm:$0xff] %v3705_v40  ;;  %4055 = vst [vmem:[#allocation42_spill] sm:$0xff] %v3707_v43  ;;  %v3711_v34 = vpop.f32.mrb[41].mxu0  ;;  %v3713_v37 = vpop.f32.mrb[41].mxu1 }
 0x154   :  { %4056 = vst [vmem:[#allocation43_spill] sm:$0xff] %v3711_v34  ;;  %4057 = vst [vmem:[#allocation44_spill] sm:$0xff] %v3713_v37  ;;  %v3717_v52 = vpop.f32.mrb[42].mxu0  ;;  %v3719_v31 = vpop.f32.mrb[42].mxu1 }
 0x155   :  { %4058 = vst [vmem:[#allocation45_spill] sm:$0xff] %v3717_v52  ;;  %4059 = vst [vmem:[#allocation46_spill] sm:$0xff] %v3719_v31  ;;  %v3723_v49 = vpop.f32.mrb[43].mxu0  ;;  %v3725_v46 = vpop.f32.mrb[43].mxu1 }
 0x156   :  { %4060 = vst [vmem:[#allocation47_spill] sm:$0xff] %v3723_v49  ;;  %4061 = vst [vmem:[#allocation48_spill] sm:$0xff] %v3725_v46 }
 0x15a   :  { %v2819_v43 = vpop.f32.mrb[44].mxu0  ;;  %v2865_v40 = vpop.f32.mrb[44].mxu1 }
 0x15b   :  { %v1827_v55 = vmax.f32 %v2819_v43, %v2865_v40  ;;  %v1177_v58 = vpop.f32.mrb[45].mxu0  ;;  %v1606_v61 = vpop.f32.mrb[45].mxu1  ;;  %v4064_v43 = vmax.f32 %v3477_v35, %v3479_v36 }
 0x15c   :  { %v1825_v37 = vmax.f32 %v1177_v58, %v1606_v61  ;;  %v2820_v34 = vpop.f32.mrb[46].mxu0  ;;  %v2866_v0 = vpop.f32.mrb[46].mxu1 }
 0x15d   :  { %v1871_v31 = vmax.f32 %v4062_v21, %v1827_v55  ;;  %v1828_v52 = vmax.f32 %v2820_v34, %v2866_v0  ;;  %v1180_v3 = vpop.f32.mrb[47].mxu0  ;;  %v1609_v6 = vpop.f32.mrb[47].mxu1 }
 0x15e   :  { %v1869_v46 = vmax.f32 %v4063_v24, %v1825_v37  ;;  %v1826_v49 = vmax.f32 %v1180_v3, %v1609_v6 }
 0x15f   :  { %v1922_v40 = vadd.f32 %v3729_v27, %v1871_v31  ;;  %v1872_v58 = vmax.f32 %v4064_v43, %v1828_v52 }
 0x160   :  { %v1920_v61 = vadd.f32 %v3729_v27, %v1869_v46  ;;  %v1870_v30 = vmax.f32 %v4065_v29, %v1826_v49 }
 0x161   :  { %v1923_v34 = vadd.f32 %v3729_v27, %v1872_v58  ;;  %v1966_v33 = vmax.f32 %v1922_v40, 0.0  ;;  %v4067_v40 = vmax.f32 %v3495_v44, %v3497_v45  ;;  %v4069_v44 = vmax.f32 %v3507_v50, %v3509_v51 }
 0x162   :  { %v1921_v55 = vadd.f32 %v3729_v27, %v1870_v30  ;;  %v2823_v0 = vpop.f32.mrb[48].mxu0  ;;  %v2869_v32 = vpop.f32.mrb[48].mxu1  ;;  %v1964_v21 = vmax.f32 %v1920_v61, 0.0  ;;  %v4070_v50 = vmax.f32 %v3513_v53, %v3515_v54 }
 0x163   :  { %v1967_v37 = vmax.f32 %v1923_v34, 0.0  ;;  %v1831_v3 = vmax.f32 %v2823_v0, %v2869_v32  ;;  %v1193_v31 = vpop.f32.mrb[49].mxu0  ;;  %v1622_v6 = vpop.f32.mrb[49].mxu1 }
 0x164   :  { %v1965_v35 = vmax.f32 %v1921_v55, 0.0  ;;  %v1829_v36 = vmax.f32 %v1193_v31, %v1622_v6  ;;  %v2824_v52 = vpop.f32.mrb[50].mxu0  ;;  %v2870_v46 = vpop.f32.mrb[50].mxu1  ;;  %v4068_v55 = vmax.f32 %v3501_v47, %v3503_v48 }
 0x165   :  { %v2508_v24 = vpack.c.bf16 %v1967_v37, %v1966_v33  ;;  %v1875_v39 = vmax.f32 %v4066_v38, %v1831_v3  ;;  %v1832_v49 = vmax.f32 %v2824_v52, %v2870_v46  ;;  %v1196_v43 = vpop.f32.mrb[51].mxu0  ;;  %v1625_v58 = vpop.f32.mrb[51].mxu1 }
 0x166   :  { %v2503_v29 = vpack.c.bf16 %v1965_v35, %v1964_v21  ;;  %v1873_v30 = vmax.f32 %v4067_v40, %v1829_v36  ;;  %v1830_v34 = vmax.f32 %v1196_v43, %v1625_v58  ;;  %v4071_v58 = vmax.f32 %v3519_v56, %v3521_v57 }
 0x167   :  { %2610 = vst [vmem:[%s3979_s6 + $0x8] sm:$0xff] %v2508_v24   ;;  %v1926_v61 = vadd.f32 %v3729_v27, %v1875_v39  ;;  %v1876_v41 = vmax.f32 %v4068_v55, %v1832_v49  ;;  %v4073_v56 = vmax.f32 %v3531_v62, %v3533_v63  ;;  %v4074_v62 = vmax.f32 %v3537_v1, %v3539_v2 }
 0x168   :  { %2504 = vst [vmem:[%s3979_s6] sm:$0xff] %v2503_v29   ;;  %v1924_v42 = vadd.f32 %v3729_v27, %v1873_v30  ;;  %v1874_v45 = vmax.f32 %v4069_v44, %v1830_v34  ;;  %v4072_v34 = vmax.f32 %v3525_v59, %v3527_v60 }
 0x169   :  { %v1927_v0 = vadd.f32 %v3729_v27, %v1876_v41  ;;  %v1970_v3 = vmax.f32 %v1926_v61, 0.0 }
 0x16a   :  { %v1925_v32 = vadd.f32 %v3729_v27, %v1874_v45  ;;  %v2827_v33 = vpop.f32.mrb[52].mxu0  ;;  %v2873_v37 = vpop.f32.mrb[52].mxu1  ;;  %v1968_v21 = vmax.f32 %v1924_v42, 0.0 }
 0x16b   :  { %v1971_v31 = vmax.f32 %v1927_v0, 0.0  ;;  %v1835_v47 = vmax.f32 %v2827_v33, %v2873_v37  ;;  %v1209_v48 = vpop.f32.mrb[53].mxu0  ;;  %v1638_v6 = vpop.f32.mrb[53].mxu1 }
 0x16c   :  { %v1969_v35 = vmax.f32 %v1925_v32, 0.0  ;;  %v1833_v36 = vmax.f32 %v1209_v48, %v1638_v6  ;;  %v2828_v52 = vpop.f32.mrb[54].mxu0  ;;  %v2874_v46 = vpop.f32.mrb[54].mxu1 }
 0x16d   :  { %v2518_v24 = vpack.c.bf16 %v1971_v31, %v1970_v3  ;;  %v1879_v51 = vmax.f32 %v4070_v50, %v1835_v47  ;;  %v1836_v38 = vmax.f32 %v2828_v52, %v2874_v46  ;;  %v1212_v39 = vpop.f32.mrb[55].mxu0  ;;  %v1641_v49 = vpop.f32.mrb[55].mxu1  ;;  %v4076_v50 = vmax.f32 %v3549_v7, %v3551_v8 }
 0x16e   :  { %v2513_v43 = vpack.c.bf16 %v1969_v35, %v1968_v21  ;;  %v1877_v29 = vmax.f32 %v4071_v58, %v1833_v36  ;;  %v1834_v40 = vmax.f32 %v1212_v39, %v1641_v49  ;;  %v4075_v36 = vmax.f32 %v3543_v4, %v3545_v5 }
 0x16f   :  { %2612 = vst [vmem:[%s3979_s6 + $0x18] sm:$0xff] %v2518_v24   ;;  %v1930_v30 = vadd.f32 %v3729_v27, %v1879_v51  ;;  %v1880_v53 = vmax.f32 %v4072_v34, %v1836_v38  ;;  %v4077_v4 = vmax.f32 %v3555_v10, %v3557_v11  ;;  %v4078_v10 = vmax.f32 %v3561_v13, %v3563_v14 }
 0x170   :  { %2611 = vst [vmem:[%s3979_s6 + $0x10] sm:$0xff] %v2513_v43   ;;  %v1928_v54 = vadd.f32 %v3729_v27, %v1877_v29  ;;  %v1878_v57 = vmax.f32 %v4073_v56, %v1834_v40 }
 0x171   :  { %v1931_v61 = vadd.f32 %v3729_v27, %v1880_v53  ;;  %v1974_v44 = vmax.f32 %v1930_v30, 0.0 }
 0x172   :  { %v1929_v55 = vadd.f32 %v3729_v27, %v1878_v57  ;;  %v2831_v41 = vpop.f32.mrb[56].mxu0  ;;  %v2877_v42 = vpop.f32.mrb[56].mxu1  ;;  %v1972_v32 = vmax.f32 %v1928_v54, 0.0 }
 0x173   :  { %v1975_v45 = vmax.f32 %v1931_v61, 0.0  ;;  %v1839_v59 = vmax.f32 %v2831_v41, %v2877_v42  ;;  %v1225_v60 = vpop.f32.mrb[57].mxu0  ;;  %v1654_v0 = vpop.f32.mrb[57].mxu1  ;;  %v4079_v42 = vmax.f32 %v3567_v16, %v3569_v17  ;;  %v4081_v16 = vmax.f32 %v3579_v22, %v3581_v23 }
 0x174   :  { %v1973_v33 = vmax.f32 %v1929_v55, 0.0  ;;  %v1837_v37 = vmax.f32 %v1225_v60, %v1654_v0  ;;  %v2832_v3 = vpop.f32.mrb[58].mxu0  ;;  %v2878_v31 = vpop.f32.mrb[58].mxu1  ;;  %v4080_v60 = vmax.f32 %v3573_v19, %v3575_v20  ;;  %v4082_v22 = vmax.f32 %v3585_v25, %v3587_v26 }
 0x175   :  { %v2528_v47 = vpack.c.bf16 %v1975_v45, %v1974_v44  ;;  %v1883_v63 = vmax.f32 %v4074_v62, %v1839_v59  ;;  %v1840_v48 = vmax.f32 %v2832_v3, %v2878_v31  ;;  %v1228_v6 = vpop.f32.mrb[59].mxu0  ;;  %v1657_v21 = vpop.f32.mrb[59].mxu1 }
 0x176   :  { %v2523_v35 = vpack.c.bf16 %v1973_v33, %v1972_v32  ;;  %v1881_v52 = vmax.f32 %v4075_v36, %v1837_v37  ;;  %v1838_v46 = vmax.f32 %v1228_v6, %v1657_v21 }
 0x177   :  { %2614 = vst [vmem:[%s3979_s6 + $0x28] sm:$0xff] %v2528_v47   ;;  %v1934_v24 = vadd.f32 %v3729_v27, %v1883_v63  ;;  %v1884_v1 = vmax.f32 %v4076_v50, %v1840_v48  ;;  %v4083_v50 = vmax.f32 %v3591_v28, %v3593_v18  ;;  %v4085_v18 = vld [vmem:[#allocation8_spill] sm:$0xff] }
 0x178   :  { %2613 = vst [vmem:[%s3979_s6 + $0x20] sm:$0xff] %v2523_v35   ;;  %v1932_v2 = vadd.f32 %v3729_v27, %v1881_v52  ;;  %v1882_v5 = vmax.f32 %v4077_v4, %v1838_v46  ;;  %v4086_v28 = vmax.f32 %v3603_v9, %v4085_v18  ;;  %v4088_v9 = vld [vmem:[#allocation10_spill] sm:$0xff] }
 0x179   :  { %v1935_v51 = vadd.f32 %v3729_v27, %v1884_v1  ;;  %v1978_v43 = vmax.f32 %v1934_v24, 0.0 }
 0x17a   :  { %v1933_v38 = vadd.f32 %v3729_v27, %v1882_v5  ;;  %v2835_v39 = vpop.f32.mrb[60].mxu0  ;;  %v2881_v49 = vpop.f32.mrb[60].mxu1  ;;  %v1976_v40 = vmax.f32 %v1932_v2, 0.0  ;;  %v4084_v5 = vmax.f32 %v3597_v15, %v3599_v12 }
 0x17b   :  { %v1979_v58 = vmax.f32 %v1935_v51, 0.0  ;;  %v1843_v7 = vmax.f32 %v2835_v39, %v2881_v49  ;;  %v1241_v8 = vpop.f32.mrb[61].mxu0  ;;  %v1670_v29 = vpop.f32.mrb[61].mxu1 }
 0x17c   :  { %v1977_v30 = vmax.f32 %v1933_v38, 0.0  ;;  %v1841_v34 = vmax.f32 %v1241_v8, %v1670_v29  ;;  %v2836_v53 = vpop.f32.mrb[62].mxu0  ;;  %v2882_v54 = vpop.f32.mrb[62].mxu1 }
 0x17d   :  { %v2538_v56 = vpack.c.bf16 %v1979_v58, %v1978_v43  ;;  %v1887_v11 = vmax.f32 %v4078_v10, %v1843_v7  ;;  %v1844_v57 = vmax.f32 %v2836_v53, %v2882_v54  ;;  %v1244_v61 = vpop.f32.mrb[63].mxu0  ;;  %v1673_v55 = vpop.f32.mrb[63].mxu1 }
 0x17e   :  { %v2533_v41 = vpack.c.bf16 %v1977_v30, %v1976_v40  ;;  %v1885_v44 = vmax.f32 %v4079_v42, %v1841_v34  ;;  %v1842_v45 = vmax.f32 %v1244_v61, %v1673_v55  ;;  %v4090_v42 = vld [vmem:[#allocation11_spill] sm:$0xff] }
 0x17f   :  { %2616 = vst [vmem:[%s3979_s6 + $0x38] sm:$0xff] %v2538_v56   ;;  %v1938_v59 = vadd.f32 %v3729_v27, %v1887_v11  ;;  %v1888_v13 = vmax.f32 %v4080_v60, %v1844_v57  ;;  %v4087_v56 = vld [vmem:[#allocation9_spill] sm:$0xff] }
 0x180   :  { %2615 = vst [vmem:[%s3979_s6 + $0x30] sm:$0xff] %v2533_v41   ;;  %v1936_v14 = vadd.f32 %v3729_v27, %v1885_v44  ;;  %v1886_v17 = vmax.f32 %v4081_v16, %v1842_v45  ;;  %v4089_v10 = vmax.f32 %v4087_v56, %v4088_v9  ;;  %v4091_v44 = vld [vmem:[#allocation12_spill] sm:$0xff]  ;;  %v4094_v16 = vld [vmem:[#allocation14_spill] sm:$0xff] }
 0x181   :  { %v1939_v0 = vadd.f32 %v3729_v27, %v1888_v13  ;;  %v1982_v3 = vmax.f32 %v1938_v59, 0.0  ;;  %v4092_v45 = vmax.f32 %v4090_v42, %v4091_v44 }
 0x182   :  { %v1937_v32 = vadd.f32 %v3729_v27, %v1886_v17  ;;  %v2839_v33 = vpop.f32.mrb[64].mxu0  ;;  %v2885_v37 = vpop.f32.mrb[64].mxu1  ;;  %v1980_v62 = vmax.f32 %v1936_v14, 0.0  ;;  %v4093_v14 = vld [vmem:[#allocation13_spill] sm:$0xff] }
 0x183   :  { %v1983_v31 = vmax.f32 %v1939_v0, 0.0  ;;  %v1847_v19 = vmax.f32 %v2839_v33, %v2885_v37  ;;  %v1257_v20 = vpop.f32.mrb[65].mxu0  ;;  %v1686_v47 = vpop.f32.mrb[65].mxu1  ;;  %v4095_v17 = vmax.f32 %v4093_v14, %v4094_v16  ;;  %v4096_v33 = vld [vmem:[#allocation15_spill] sm:$0xff]  ;;  %v4097_v37 = vld [vmem:[#allocation16_spill] sm:$0xff]  ;;  %v4112_v14 = vld [vmem:[#allocation26_spill] sm:$0xff] }
 0x184   :  { %v1981_v63 = vmax.f32 %v1937_v32, 0.0  ;;  %v1845_v48 = vmax.f32 %v1257_v20, %v1686_v47  ;;  %v2840_v6 = vpop.f32.mrb[66].mxu0  ;;  %v2886_v21 = vpop.f32.mrb[66].mxu1 }
 0x185   :  { %v2548_v35 = vpack.c.bf16 %v1983_v31, %v1982_v3  ;;  %v1891_v23 = vmax.f32 %v4082_v22, %v1847_v19  ;;  %v1848_v36 = vmax.f32 %v2840_v6, %v2886_v21  ;;  %v1260_v52 = vpop.f32.mrb[67].mxu0  ;;  %v1689_v46 = vpop.f32.mrb[67].mxu1  ;;  %v4098_v3 = vmax.f32 %v4096_v33, %v4097_v37 }
 0x186   :  { %v2543_v24 = vpack.c.bf16 %v1981_v63, %v1980_v62  ;;  %v1889_v1 = vmax.f32 %v4083_v50, %v1845_v48  ;;  %v1846_v2 = vmax.f32 %v1260_v52, %v1689_v46  ;;  %v4099_v50 = vld [vmem:[#allocation17_spill] sm:$0xff] }
 0x187   :  { %2618 = vst [vmem:[%s3979_s6 + $0x48] sm:$0xff] %v2548_v35   ;;  %v1942_v4 = vadd.f32 %v3729_v27, %v1891_v23  ;;  %v1892_v25 = vmax.f32 %v4084_v5, %v1848_v36 }
 0x188   :  { %2617 = vst [vmem:[%s3979_s6 + $0x40] sm:$0xff] %v2543_v24   ;;  %v1940_v26 = vadd.f32 %v3729_v27, %v1889_v1  ;;  %v1890_v51 = vmax.f32 %v4086_v28, %v1846_v2  ;;  %v4100_v1 = vld [vmem:[#allocation18_spill] sm:$0xff]  ;;  %v4102_v28 = vld [vmem:[#allocation19_spill] sm:$0xff] }
 0x189   :  { %v1943_v38 = vadd.f32 %v3729_v27, %v1892_v25  ;;  %v1986_v58 = vmax.f32 %v1942_v4, 0.0  ;;  %v4101_v2 = vmax.f32 %v4099_v50, %v4100_v1 }
 0x18a   :  { %v1941_v39 = vadd.f32 %v3729_v27, %v1890_v51  ;;  %v2843_v49 = vpop.f32.mrb[68].mxu0  ;;  %v2889_v43 = vpop.f32.mrb[68].mxu1  ;;  %v1984_v29 = vmax.f32 %v1940_v26, 0.0  ;;  %v4103_v51 = vld [vmem:[#allocation20_spill] sm:$0xff] }
 0x18b   :  { %v1987_v7 = vmax.f32 %v1943_v38, 0.0  ;;  %v1851_v12 = vmax.f32 %v2843_v49, %v2889_v43  ;;  %v1273_v15 = vpop.f32.mrb[69].mxu0  ;;  %v1702_v8 = vpop.f32.mrb[69].mxu1  ;;  %v4104_v38 = vmax.f32 %v4102_v28, %v4103_v51 }
 0x18c   :  { %v1985_v40 = vmax.f32 %v1941_v39, 0.0  ;;  %v1849_v30 = vmax.f32 %v1273_v15, %v1702_v8  ;;  %v2844_v34 = vpop.f32.mrb[70].mxu0  ;;  %v2890_v53 = vpop.f32.mrb[70].mxu1 }
 0x18d   :  { %v2558_v54 = vpack.c.bf16 %v1987_v7, %v1986_v58  ;;  %v1895_v11 = vmax.f32 %v4089_v10, %v1851_v12  ;;  %v1852_v57 = vmax.f32 %v2844_v34, %v2890_v53  ;;  %v1276_v61 = vpop.f32.mrb[71].mxu0  ;;  %v1705_v55 = vpop.f32.mrb[71].mxu1  ;;  %v4105_v58 = vld [vmem:[#allocation21_spill] sm:$0xff]  ;;  %v4106_v7 = vld [vmem:[#allocation22_spill] sm:$0xff] }
 0x18e   :  { %v2553_v41 = vpack.c.bf16 %v1985_v40, %v1984_v29  ;;  %v1893_v59 = vmax.f32 %v4092_v45, %v1849_v30  ;;  %v1850_v60 = vmax.f32 %v1276_v61, %v1705_v55  ;;  %v4107_v12 = vmax.f32 %v4105_v58, %v4106_v7  ;;  %v4108_v29 = vld [vmem:[#allocation23_spill] sm:$0xff]  ;;  %v4109_v40 = vld [vmem:[#allocation24_spill] sm:$0xff]  ;;  %v4124_v58 = vld [vmem:[#allocation34_spill] sm:$0xff] }
 0x18f   :  { %2620 = vst [vmem:[%s3979_s6 + $0x58] sm:$0xff] %v2558_v54   ;;  %v1946_v13 = vadd.f32 %v3729_v27, %v1895_v11  ;;  %v1896_v0 = vmax.f32 %v4095_v17, %v1852_v57  ;;  %v4110_v30 = vmax.f32 %v4108_v29, %v4109_v40 }
 0x190   :  { %2619 = vst [vmem:[%s3979_s6 + $0x50] sm:$0xff] %v2553_v41   ;;  %v1944_v32 = vadd.f32 %v3729_v27, %v1893_v59  ;;  %v1894_v31 = vmax.f32 %v4098_v3, %v1850_v60  ;;  %v4114_v3 = vld [vmem:[#allocation27_spill] sm:$0xff] }
 0x191   :  { %v1947_v19 = vadd.f32 %v3729_v27, %v1896_v0  ;;  %v1990_v63 = vmax.f32 %v1946_v13, 0.0  ;;  %v4111_v13 = vld [vmem:[#allocation25_spill] sm:$0xff] }
 0x192   :  { %v1945_v20 = vadd.f32 %v3729_v27, %v1894_v31  ;;  %v2847_v47 = vpop.f32.mrb[72].mxu0  ;;  %v2893_v62 = vpop.f32.mrb[72].mxu1  ;;  %v1988_v22 = vmax.f32 %v1944_v32, 0.0  ;;  %v4113_v16 = vmax.f32 %v4111_v13, %v4112_v14  ;;  %v4115_v31 = vld [vmem:[#allocation28_spill] sm:$0xff] }
 0x193   :  { %v1991_v48 = vmax.f32 %v1947_v19, 0.0  ;;  %v1855_v6 = vmax.f32 %v2847_v47, %v2893_v62  ;;  %v1289_v21 = vpop.f32.mrb[73].mxu0  ;;  %v1718_v35 = vpop.f32.mrb[73].mxu1  ;;  %v4116_v19 = vmax.f32 %v4114_v3, %v4115_v31 }
 0x194   :  { %v1989_v23 = vmax.f32 %v1945_v20, 0.0  ;;  %v1853_v36 = vmax.f32 %v1289_v21, %v1718_v35  ;;  %v2848_v52 = vpop.f32.mrb[74].mxu0  ;;  %v2894_v46 = vpop.f32.mrb[74].mxu1 }
 0x195   :  { %v2568_v24 = vpack.c.bf16 %v1991_v48, %v1990_v63  ;;  %v1899_v4 = vmax.f32 %v4101_v2, %v1855_v6  ;;  %v1856_v5 = vmax.f32 %v2848_v52, %v2894_v46  ;;  %v1292_v25 = vpop.f32.mrb[75].mxu0  ;;  %v1721_v26 = vpop.f32.mrb[75].mxu1  ;;  %v4117_v63 = vld [vmem:[#allocation29_spill] sm:$0xff]  ;;  %v4118_v48 = vld [vmem:[#allocation30_spill] sm:$0xff] }
 0x196   :  { %v2563_v18 = vpack.c.bf16 %v1989_v23, %v1988_v22  ;;  %v1897_v39 = vmax.f32 %v4104_v38, %v1853_v36  ;;  %v1854_v49 = vmax.f32 %v1292_v25, %v1721_v26  ;;  %v4119_v6 = vmax.f32 %v4117_v63, %v4118_v48  ;;  %v4120_v22 = vld [vmem:[#allocation31_spill] sm:$0xff]  ;;  %v4121_v23 = vld [vmem:[#allocation32_spill] sm:$0xff]  ;;  %v4136_v63 = vld [vmem:[#allocation42_spill] sm:$0xff] }
 0x197   :  { %2622 = vst [vmem:[%s3979_s6 + $0x68] sm:$0xff] %v2568_v24   ;;  %v1950_v43 = vadd.f32 %v3729_v27, %v1899_v4  ;;  %v1900_v15 = vmax.f32 %v4107_v12, %v1856_v5  ;;  %v4122_v36 = vmax.f32 %v4120_v22, %v4121_v23 }
 0x198   :  { %2621 = vst [vmem:[%s3979_s6 + $0x60] sm:$0xff] %v2563_v18   ;;  %v1948_v8 = vadd.f32 %v3729_v27, %v1897_v39  ;;  %v1898_v34 = vmax.f32 %v4110_v30, %v1854_v49  ;;  %v4126_v30 = vld [vmem:[#allocation35_spill] sm:$0xff] }
 0x199   :  { %v1951_v53 = vadd.f32 %v3729_v27, %v1900_v15  ;;  %v1994_v10 = vmax.f32 %v1950_v43, 0.0  ;;  %v4123_v43 = vld [vmem:[#allocation33_spill] sm:$0xff] }
 0x19a   :  { %v1949_v54 = vadd.f32 %v3729_v27, %v1898_v34  ;;  %v2851_v56 = vpop.f32.mrb[76].mxu0  ;;  %v2897_v9 = vpop.f32.mrb[76].mxu1  ;;  %v1992_v41 = vmax.f32 %v1948_v8, 0.0  ;;  %v4125_v7 = vmax.f32 %v4123_v43, %v4124_v58  ;;  %v4127_v34 = vld [vmem:[#allocation36_spill] sm:$0xff] }
 0x19b   :  { %v1995_v11 = vmax.f32 %v1951_v53, 0.0  ;;  %v1859_v57 = vmax.f32 %v2851_v56, %v2897_v9  ;;  %v1305_v61 = vpop.f32.mrb[77].mxu0  ;;  %v1734_v55 = vpop.f32.mrb[77].mxu1  ;;  %v4128_v53 = vmax.f32 %v4126_v30, %v4127_v34 }
 0x19c   :  { %v1993_v42 = vmax.f32 %v1949_v54, 0.0  ;;  %v1857_v44 = vmax.f32 %v1305_v61, %v1734_v55  ;;  %v2852_v45 = vpop.f32.mrb[78].mxu0  ;;  %v2898_v59 = vpop.f32.mrb[78].mxu1 }
 0x19d   :  { %v2578_v60 = vpack.c.bf16 %v1995_v11, %v1994_v10  ;;  %v1903_v17 = vmax.f32 %v4113_v16, %v1859_v57  ;;  %v1860_v0 = vmax.f32 %v2852_v45, %v2898_v59  ;;  %v1308_v32 = vpop.f32.mrb[79].mxu0  ;;  %v1737_v33 = vpop.f32.mrb[79].mxu1  ;;  %v4129_v10 = vld [vmem:[#allocation37_spill] sm:$0xff]  ;;  %v4130_v11 = vld [vmem:[#allocation38_spill] sm:$0xff] }
 0x19e   :  { %v2573_v37 = vpack.c.bf16 %v1993_v42, %v1992_v41  ;;  %v1901_v20 = vmax.f32 %v4116_v19, %v1857_v44  ;;  %v1858_v47 = vmax.f32 %v1308_v32, %v1737_v33  ;;  %v4131_v57 = vmax.f32 %v4129_v10, %v4130_v11  ;;  %v4132_v41 = vld [vmem:[#allocation39_spill] sm:$0xff]  ;;  %v4133_v42 = vld [vmem:[#allocation40_spill] sm:$0xff] }
 0x19f   :  { %2624 = vst [vmem:[%s3979_s6 + $0x78] sm:$0xff] %v2578_v60   ;;  %v1954_v62 = vadd.f32 %v3729_v27, %v1903_v17  ;;  %v1904_v21 = vmax.f32 %v4119_v6, %v1860_v0  ;;  %v4134_v44 = vmax.f32 %v4132_v41, %v4133_v42 }
 0x1a0   :  { %2623 = vst [vmem:[%s3979_s6 + $0x70] sm:$0xff] %v2573_v37   ;;  %v1952_v35 = vadd.f32 %v3729_v27, %v1901_v20  ;;  %v1902_v52 = vmax.f32 %v4122_v36, %v1858_v47  ;;  %v4138_v36 = vld [vmem:[#allocation43_spill] sm:$0xff] }
 0x1a1   :  { %v1955_v46 = vadd.f32 %v3729_v27, %v1904_v21  ;;  %v1998_v2 = vmax.f32 %v1954_v62, 0.0  ;;  %v4135_v62 = vld [vmem:[#allocation41_spill] sm:$0xff] }
 0x1a2   :  { %v1953_v24 = vadd.f32 %v3729_v27, %v1902_v52  ;;  %v2855_v50 = vpop.f32.mrb[80].mxu0  ;;  %v2901_v1 = vpop.f32.mrb[80].mxu1  ;;  %v1996_v18 = vmax.f32 %v1952_v35, 0.0  ;;  %v4137_v48 = vmax.f32 %v4135_v62, %v4136_v63  ;;  %v4139_v52 = vld [vmem:[#allocation44_spill] sm:$0xff] }
 0x1a3   :  { %v1999_v4 = vmax.f32 %v1955_v46, 0.0  ;;  %v1863_v5 = vmax.f32 %v2855_v50, %v2901_v1  ;;  %v1321_v25 = vpop.f32.mrb[81].mxu0  ;;  %v1750_v26 = vpop.f32.mrb[81].mxu1  ;;  %v4140_v46 = vmax.f32 %v4138_v36, %v4139_v52 }
 0x1a4   :  { %v1997_v28 = vmax.f32 %v1953_v24, 0.0  ;;  %v1861_v51 = vmax.f32 %v1321_v25, %v1750_v26  ;;  %v2856_v38 = vpop.f32.mrb[82].mxu0  ;;  %v2902_v39 = vpop.f32.mrb[82].mxu1 }
 0x1a5   :  { %v2588_v49 = vpack.c.bf16 %v1999_v4, %v1998_v2  ;;  %v1907_v12 = vmax.f32 %v4125_v7, %v1863_v5  ;;  %v1864_v15 = vmax.f32 %v2856_v38, %v2902_v39  ;;  %v1324_v8 = vpop.f32.mrb[83].mxu0  ;;  %v1753_v29 = vpop.f32.mrb[83].mxu1  ;;  %v4141_v2 = vld [vmem:[#allocation45_spill] sm:$0xff]  ;;  %v4142_v4 = vld [vmem:[#allocation46_spill] sm:$0xff] }
 0x1a6   :  { %v2583_v40 = vpack.c.bf16 %v1997_v28, %v1996_v18  ;;  %v1905_v54 = vmax.f32 %v4128_v53, %v1861_v51  ;;  %v1862_v56 = vmax.f32 %v1324_v8, %v1753_v29  ;;  %v4143_v5 = vmax.f32 %v4141_v2, %v4142_v4  ;;  %v4144_v18 = vld [vmem:[#allocation47_spill] sm:$0xff]  ;;  %v4145_v28 = vld [vmem:[#allocation48_spill] sm:$0xff] }
 0x1a7   :  { %2626 = vst [vmem:[%s3979_s6 + $0x88] sm:$0xff] %v2588_v49   ;;  %v1958_v9 = vadd.f32 %v3729_v27, %v1907_v12  ;;  %v1908_v61 = vmax.f32 %v4131_v57, %v1864_v15  ;;  %v4146_v51 = vmax.f32 %v4144_v18, %v4145_v28 }
 0x1a8   :  { %2625 = vst [vmem:[%s3979_s6 + $0x80] sm:$0xff] %v2583_v40   ;;  %v1956_v55 = vadd.f32 %v3729_v27, %v1905_v54  ;;  %v1906_v45 = vmax.f32 %v4134_v44, %v1862_v56 }
 0x1a9   :  { %v1959_v59 = vadd.f32 %v3729_v27, %v1908_v61  ;;  %v2002_v16 = vmax.f32 %v1958_v9, 0.0 }
 0x1aa   :  { %v1957_v60 = vadd.f32 %v3729_v27, %v1906_v45  ;;  %v2859_v13 = vpop.f32.mrb[84].mxu0  ;;  %v2905_v14 = vpop.f32.mrb[84].mxu1  ;;  %v2000_v37 = vmax.f32 %v1956_v55, 0.0 }
 0x1ab   :  { %v2003_v17 = vmax.f32 %v1959_v59, 0.0  ;;  %v1867_v0 = vmax.f32 %v2859_v13, %v2905_v14  ;;  %v1337_v32 = vpop.f32.mrb[85].mxu0  ;;  %v1766_v33 = vpop.f32.mrb[85].mxu1 }
 0x1ac   :  { %v2001_v3 = vmax.f32 %v1957_v60, 0.0  ;;  %v1865_v31 = vmax.f32 %v1337_v32, %v1766_v33  ;;  %v2860_v19 = vpop.f32.mrb[86].mxu0  ;;  %v2906_v20 = vpop.f32.mrb[86].mxu1 }
 0x1ad   :  { %v2598_v47 = vpack.c.bf16 %v2003_v17, %v2002_v16  ;;  %v1911_v6 = vmax.f32 %v4137_v48, %v1867_v0  ;;  %v1868_v21 = vmax.f32 %v2860_v19, %v2906_v20  ;;  %v1340_v35 = vpop.f32.mrb[87].mxu0  ;;  %v1769_v22 = vpop.f32.mrb[87].mxu1 }
 0x1ae   :  { %v2593_v23 = vpack.c.bf16 %v2001_v3, %v2000_v37  ;;  %v1909_v24 = vmax.f32 %v4140_v46, %v1865_v31  ;;  %v1866_v50 = vmax.f32 %v1340_v35, %v1769_v22 }
 0x1af   :  { %2628 = vst [vmem:[%s3979_s6 + $0x98] sm:$0xff] %v2598_v47   ;;  %v1962_v1 = vadd.f32 %v3729_v27, %v1911_v6  ;;  %v1912_v25 = vmax.f32 %v4143_v5, %v1868_v21 }
 0x1b0   :  { %2627 = vst [vmem:[%s3979_s6 + $0x90] sm:$0xff] %v2593_v23   ;;  %v1960_v26 = vadd.f32 %v3729_v27, %v1909_v24  ;;  %v1910_v38 = vmax.f32 %v4146_v51, %v1866_v50 }
 0x1b1   :  { %v1963_v39 = vadd.f32 %v3729_v27, %v1912_v25  ;;  %v2006_v43 = vmax.f32 %v1962_v1, 0.0 }
 0x1b2   :  { %v1961_v49 = vadd.f32 %v3729_v27, %v1910_v38  ;;  %v2004_v7 = vmax.f32 %v1960_v26, 0.0 }
 0x1b3   :  { %v2007_v58 = vmax.f32 %v1963_v39, 0.0 }
 0x1b4   :  { %v2005_v12 = vmax.f32 %v1961_v49, 0.0 }
 0x1b5   :  { %v2608_v15 = vpack.c.bf16 %v2007_v58, %v2006_v43 }
 0x1b6   :  { %v2603_v8 = vpack.c.bf16 %v2005_v12, %v2004_v7 }
 0x1b7   :  { %2630 = vst [vmem:[%s3979_s6 + $0xa8] sm:$0xff] %v2608_v15  }
 0x1b8   :  { %2629 = vst [vmem:[%s3979_s6 + $0xa0] sm:$0xff] %v2603_v8  }
 0x1b9   :  { %2232 = vsyncpa [#allocation3], 1 }
 0x1ba   :  { %2233 = vsyncpa [#allocation5], 1 }

// kernel: lenet_forward.4
= control target key start
LH: loop header
LB: loop body
LE: loop exit
PB: predicated region body
PF: predicated region fallthrough
CT: control target
= control target key end

     0   :  { %v857_v0 = vmov 0   ;;  %vm160_vm0 = vcmask 424960   ;;  %vm173_vm1 = vcmask 1041408   ;;  %s1222_s4 = inlined_call_operand.vmem [shape: bf16[180,128], index: 4, kind: input, shape index: {}]   ;;  %s1223_s0 = inlined_call_operand.vmem [shape: bf16[64,180], index: 0, kind: input, shape index: {}]   ;;  %s1224_s1 = inlined_call_operand.vmem [shape: bf16[64,180], index: 1, kind: input, shape index: {}]   ;;  %s1225_s2 = inlined_call_operand.vmem [shape: bf16[64,180], index: 2, kind: input, shape index: {}]   ;;  %s1226_s3 = inlined_call_operand.vmem [shape: bf16[64,180], index: 3, kind: input, shape index: {}]   ;;  %s1227_s5 = inlined_call_operand.vmem [shape: f32[1,128], index: 5, kind: input, shape index: {}]   ;;  %s1228_s6 = inlined_call_operand.vmem [shape: bf16[64,128], index: 6, kind: output, shape index: {}]  }
   0x1   :  { %177 = vmatprep.subr.bf16.mxu0 %v857_v0  ;;  %298 = vmatprep.subr.bf16.mxu1 %v857_v0  ;;  %v898_v1 = vld [vmem:[%s1222_s4] sm:$0xff]   ;;  %v905_v2 = vld [vmem:[%s1222_s4 + $0x8] sm:$0xff]   ;;  %v914_v3 = vld [vmem:[%s1222_s4 + $0x10] sm:$0xff]  }
   0x2   :  { %178 = vmatpush1.bf16.msra.mxu0 %v898_v1  ;;  %299 = vmatpush1.bf16.msra.mxu1 %v898_v1  ;;  %v923_v4 = vld [vmem:[%s1222_s4 + $0x18] sm:$0xff]   ;;  %v811_v5 = vld [vmem:[%s1223_s0 + $0x4] ss:$8 sps:$4 sm:$0xff]   ;;  %v958_v9 = vld [vmem:[%s1222_s4 + $0x30] sm:$0xff]  }
   0x3   :  { %179 = vmatprep.subr.bf16.mxu0 %v857_v0  ;;  %300 = vmatprep.subr.bf16.mxu1 %v857_v0  ;;  %v933_v6 = vld [vmem:[%s1222_s4 + $0x20] sm:$0xff]   ;;  %v949_v8 = vld [vmem:[%s1222_s4 + $0x28] sm:$0xff]   ;;  %v967_v10 = vld [vmem:[%s1222_s4 + $0x38] sm:$0xff]  }
   0x4   :  { %v814_v7 = vld [vmem:[%s1224_s1 + $0x4] ss:$8 sps:$4 sm:$0xff]   ;;  %716 = vmatprep.mubr.msk.bf16.mxu0 %vm160_vm0, %v811_v5  ;;  %v994_v13 = vld [vmem:[%s1222_s4 + $0x50] sm:$0xff]   ;;  %v808_v14 = vld [vmem:[%s1222_s4 + $0x58] ss:$0 sps:$4 sm:$0x33]  }
   0x5   :  { %728 = vmatprep.mubr.msk.bf16.mxu1 %vm160_vm0, %v814_v7  ;;  %v976_v11 = vld [vmem:[%s1222_s4 + $0x40] sm:$0xff]   ;;  %v985_v12 = vld [vmem:[%s1222_s4 + $0x48] sm:$0xff]   ;;  %v1005_v15 = vsel %vm173_vm1, %v808_v14, 0  ;;  %v815_v18 = vld [vmem:[%s1223_s0 + $0x14] ss:$8 sps:$4 sm:$0xff]  }
   0x6   :  { %180 = vmatpush1.bf16.msra.mxu0 %v905_v2  ;;  %301 = vmatpush1.bf16.msra.mxu1 %v905_v2  ;;  %v809_v16 = vld [vmem:[%s1223_s0] ss:$8 sps:$4 sm:$0xff]   ;;  %v817_v19 = vld [vmem:[%s1224_s1 + $0x14] ss:$8 sps:$4 sm:$0xff]   ;;  %v819_v20 = vld [vmem:[%s1223_s0 + $0x10] ss:$8 sps:$4 sm:$0xff]  }
   0x7   :  { %181 = vmatprep.subr.bf16.mxu0 %v857_v0  ;;  %302 = vmatprep.subr.bf16.mxu1 %v857_v0  ;;  %v812_v17 = vld [vmem:[%s1224_s1] ss:$8 sps:$4 sm:$0xff]   ;;  %v820_v21 = vld [vmem:[%s1224_s1 + $0x10] ss:$8 sps:$4 sm:$0xff]   ;;  %v821_v22 = vld [vmem:[%s1223_s0 + $0x24] ss:$8 sps:$4 sm:$0xff]  }
   0x8   :  { %v823_v23 = vld [vmem:[%s1224_s1 + $0x24] ss:$8 sps:$4 sm:$0xff]   ;;  %v825_v24 = vld [vmem:[%s1223_s0 + $0x20] ss:$8 sps:$4 sm:$0xff]   ;;  %v827_v26 = vld [vmem:[%s1223_s0 + $0x34] ss:$8 sps:$4 sm:$0xff]  }
   0x9   :  { %v826_v25 = vld [vmem:[%s1224_s1 + $0x20] ss:$8 sps:$4 sm:$0xff]   ;;  %v829_v27 = vld [vmem:[%s1224_s1 + $0x34] ss:$8 sps:$4 sm:$0xff]   ;;  %v831_v28 = vld [vmem:[%s1223_s0 + $0x30] ss:$8 sps:$4 sm:$0xff]  }
   0xa   :  { %182 = vmatpush1.bf16.msra.mxu0 %v914_v3  ;;  %303 = vmatpush1.bf16.msra.mxu1 %v914_v3  ;;  %v832_v29 = vld [vmem:[%s1224_s1 + $0x30] ss:$8 sps:$4 sm:$0xff]   ;;  %v835_v30 = vld [vmem:[%s1225_s2 + $0x4] ss:$8 sps:$4 sm:$0xff]   ;;  %v833_v32 = vld [vmem:[%s1225_s2] ss:$8 sps:$4 sm:$0xff]  }
   0xb   :  { %183 = vmatprep.subr.bf16.mxu0 %v857_v0  ;;  %304 = vmatprep.subr.bf16.mxu1 %v857_v0  ;;  %v838_v31 = vld [vmem:[%s1226_s3 + $0x4] ss:$8 sps:$4 sm:$0xff]   ;;  %v836_v33 = vld [vmem:[%s1226_s3] ss:$8 sps:$4 sm:$0xff]   ;;  %v839_v34 = vld [vmem:[%s1225_s2 + $0x14] ss:$8 sps:$4 sm:$0xff]  }
   0xc   :  { %v841_v35 = vld [vmem:[%s1226_s3 + $0x14] ss:$8 sps:$4 sm:$0xff]   ;;  %v843_v36 = vld [vmem:[%s1225_s2 + $0x10] ss:$8 sps:$4 sm:$0xff]   ;;  %v845_v38 = vld [vmem:[%s1225_s2 + $0x24] ss:$8 sps:$4 sm:$0xff]  }
   0xd   :  { %v844_v37 = vld [vmem:[%s1226_s3 + $0x10] ss:$8 sps:$4 sm:$0xff]   ;;  %v847_v39 = vld [vmem:[%s1226_s3 + $0x24] ss:$8 sps:$4 sm:$0xff]   ;;  %v849_v40 = vld [vmem:[%s1225_s2 + $0x20] ss:$8 sps:$4 sm:$0xff]  }
   0xe   :  { %184 = vmatpush1.bf16.msra.mxu0 %v923_v4  ;;  %305 = vmatpush1.bf16.msra.mxu1 %v923_v4  ;;  %v850_v41 = vld [vmem:[%s1226_s3 + $0x20] ss:$8 sps:$4 sm:$0xff]   ;;  %v851_v42 = vld [vmem:[%s1225_s2 + $0x34] ss:$8 sps:$4 sm:$0xff]   ;;  %v855_v44 = vld [vmem:[%s1225_s2 + $0x30] ss:$8 sps:$4 sm:$0xff]  }
   0xf   :  { %185 = vmatprep.subr.bf16.mxu0 %v857_v0  ;;  %306 = vmatprep.subr.bf16.mxu1 %v857_v0  ;;  %v853_v43 = vld [vmem:[%s1226_s3 + $0x34] ss:$8 sps:$4 sm:$0xff]   ;;  %v856_v45 = vld [vmem:[%s1226_s3 + $0x30] ss:$8 sps:$4 sm:$0xff]  }
  0x12   :  { %186 = vmatpush1.bf16.msra.mxu0 %v933_v6  ;;  %307 = vmatpush1.bf16.msra.mxu1 %v933_v6 }
  0x13   :  { %187 = vmatprep.subr.bf16.mxu0 %v857_v0  ;;  %308 = vmatprep.subr.bf16.mxu1 %v857_v0 }
  0x16   :  { %188 = vmatpush1.bf16.msra.mxu0 %v949_v8  ;;  %309 = vmatpush1.bf16.msra.mxu1 %v949_v8 }
  0x17   :  { %189 = vmatprep.subr.bf16.mxu0 %v857_v0  ;;  %310 = vmatprep.subr.bf16.mxu1 %v857_v0 }
  0x1a   :  { %190 = vmatpush1.bf16.msra.mxu0 %v958_v9  ;;  %311 = vmatpush1.bf16.msra.mxu1 %v958_v9 }
  0x1b   :  { %191 = vmatprep.subr.bf16.mxu0 %v857_v0  ;;  %312 = vmatprep.subr.bf16.mxu1 %v857_v0 }
  0x1e   :  { %192 = vmatpush1.bf16.msra.mxu0 %v967_v10  ;;  %313 = vmatpush1.bf16.msra.mxu1 %v967_v10 }
  0x1f   :  { %193 = vmatprep.subr.bf16.mxu0 %v857_v0  ;;  %314 = vmatprep.subr.bf16.mxu1 %v857_v0 }
  0x22   :  { %194 = vmatpush1.bf16.msra.mxu0 %v976_v11  ;;  %315 = vmatpush1.bf16.msra.mxu1 %v976_v11 }
  0x23   :  { %195 = vmatprep.subr.bf16.mxu0 %v857_v0  ;;  %316 = vmatprep.subr.bf16.mxu1 %v857_v0 }
  0x26   :  { %196 = vmatpush1.bf16.msra.mxu0 %v985_v12  ;;  %317 = vmatpush1.bf16.msra.mxu1 %v985_v12 }
  0x27   :  { %197 = vmatprep.subr.bf16.mxu0 %v857_v0  ;;  %318 = vmatprep.subr.bf16.mxu1 %v857_v0 }
  0x2a   :  { %198 = vmatpush1.bf16.msra.mxu0 %v994_v13  ;;  %319 = vmatpush1.bf16.msra.mxu1 %v994_v13 }
  0x2b   :  { %199 = vmatprep.subr.bf16.mxu0 %v857_v0  ;;  %320 = vmatprep.subr.bf16.mxu1 %v857_v0 }
  0x2e   :  { %200 = vmatpush1.bf16.msra.mxu0 %v1005_v15  ;;  %321 = vmatpush1.bf16.msra.mxu1 %v1005_v15 }
  0x2f   :  { %419 = vmatprep.subr.bf16.mxu0 %v857_v0  ;;  %540 = vmatprep.subr.bf16.mxu1 %v857_v0 }
  0x31   :  { %210 = vmatmul.mubr.bf16.vlgmr.msra.gmra.mrb[0].mxu0 %v809_v16  ;;  %331 = vmatmul.mubr.bf16.vlgmr.msra.gmra.mrb[0].mxu1 %v812_v17 }
  0x32   :  { %420 = vmatpush1.bf16.msra.mxu0 %v898_v1  ;;  %541 = vmatpush1.bf16.msra.mxu1 %v898_v1 }
  0x33   :  { %421 = vmatprep.subr.bf16.mxu0 %v857_v0  ;;  %542 = vmatprep.subr.bf16.mxu1 %v857_v0 }
  0x34   :  { %717 = vmatprep.mubr.msk.bf16.mxu0 %vm160_vm0, %v815_v18  ;;  %729 = vmatprep.mubr.msk.bf16.mxu1 %vm160_vm0, %v817_v19 }
  0x36   :  { %422 = vmatpush1.bf16.msra.mxu0 %v905_v2  ;;  %543 = vmatpush1.bf16.msra.mxu1 %v905_v2 }
  0x37   :  { %423 = vmatprep.subr.bf16.mxu0 %v857_v0  ;;  %544 = vmatprep.subr.bf16.mxu1 %v857_v0 }
  0x39   :  { %218 = vmatmul.mubr.bf16.gmra.mrb[4].mxu0 %v819_v20  ;;  %339 = vmatmul.mubr.bf16.gmra.mrb[4].mxu1 %v820_v21 }
  0x3a   :  { %424 = vmatpush1.bf16.msra.mxu0 %v914_v3  ;;  %545 = vmatpush1.bf16.msra.mxu1 %v914_v3 }
  0x3b   :  { %425 = vmatprep.subr.bf16.mxu0 %v857_v0  ;;  %546 = vmatprep.subr.bf16.mxu1 %v857_v0 }
  0x3c   :  { %718 = vmatprep.mubr.msk.bf16.mxu0 %vm160_vm0, %v821_v22  ;;  %730 = vmatprep.mubr.msk.bf16.mxu1 %vm160_vm0, %v823_v23 }
  0x3e   :  { %426 = vmatpush1.bf16.msra.mxu0 %v923_v4  ;;  %547 = vmatpush1.bf16.msra.mxu1 %v923_v4 }
  0x3f   :  { %427 = vmatprep.subr.bf16.mxu0 %v857_v0  ;;  %548 = vmatprep.subr.bf16.mxu1 %v857_v0 }
  0x41   :  { %226 = vmatmul.mubr.bf16.gmra.mrb[8].mxu0 %v825_v24  ;;  %347 = vmatmul.mubr.bf16.gmra.mrb[8].mxu1 %v826_v25 }
  0x42   :  { %428 = vmatpush1.bf16.msra.mxu0 %v933_v6  ;;  %549 = vmatpush1.bf16.msra.mxu1 %v933_v6 }
  0x43   :  { %429 = vmatprep.subr.bf16.mxu0 %v857_v0  ;;  %550 = vmatprep.subr.bf16.mxu1 %v857_v0 }
  0x44   :  { %719 = vmatprep.mubr.msk.bf16.mxu0 %vm160_vm0, %v827_v26  ;;  %731 = vmatprep.mubr.msk.bf16.mxu1 %vm160_vm0, %v829_v27  ;;  %v1188_v27 = vld [vmem:[%s1227_s5] ss:$0 sm:$0xff] }
  0x46   :  { %430 = vmatpush1.bf16.msra.mxu0 %v949_v8  ;;  %551 = vmatpush1.bf16.msra.mxu1 %v949_v8 }
  0x47   :  { %431 = vmatprep.subr.bf16.mxu0 %v857_v0  ;;  %552 = vmatprep.subr.bf16.mxu1 %v857_v0 }
  0x49   :  { %234 = vmatmul.mubr.bf16.gmra.mrb[12].mxu0 %v831_v28  ;;  %355 = vmatmul.mubr.bf16.gmra.mrb[12].mxu1 %v832_v29 }
  0x4a   :  { %432 = vmatpush1.bf16.msra.mxu0 %v958_v9  ;;  %553 = vmatpush1.bf16.msra.mxu1 %v958_v9 }
  0x4b   :  { %433 = vmatprep.subr.bf16.mxu0 %v857_v0  ;;  %554 = vmatprep.subr.bf16.mxu1 %v857_v0 }
  0x4c   :  { %740 = vmatprep.mubr.msk.bf16.mxu0 %vm160_vm0, %v835_v30  ;;  %752 = vmatprep.mubr.msk.bf16.mxu1 %vm160_vm0, %v838_v31 }
  0x4e   :  { %434 = vmatpush1.bf16.msra.mxu0 %v967_v10  ;;  %555 = vmatpush1.bf16.msra.mxu1 %v967_v10 }
  0x4f   :  { %435 = vmatprep.subr.bf16.mxu0 %v857_v0  ;;  %556 = vmatprep.subr.bf16.mxu1 %v857_v0 }
  0x52   :  { %436 = vmatpush1.bf16.msra.mxu0 %v976_v11  ;;  %557 = vmatpush1.bf16.msra.mxu1 %v976_v11 }
  0x53   :  { %437 = vmatprep.subr.bf16.mxu0 %v857_v0  ;;  %558 = vmatprep.subr.bf16.mxu1 %v857_v0 }
  0x56   :  { %438 = vmatpush1.bf16.msra.mxu0 %v985_v12  ;;  %559 = vmatpush1.bf16.msra.mxu1 %v985_v12 }
  0x57   :  { %439 = vmatprep.subr.bf16.mxu0 %v857_v0  ;;  %560 = vmatprep.subr.bf16.mxu1 %v857_v0 }
  0x5a   :  { %440 = vmatpush1.bf16.msra.mxu0 %v994_v13  ;;  %561 = vmatpush1.bf16.msra.mxu1 %v994_v13 }
  0x5b   :  { %441 = vmatprep.subr.bf16.mxu0 %v857_v0  ;;  %562 = vmatprep.subr.bf16.mxu1 %v857_v0 }
  0x5e   :  { %442 = vmatpush1.bf16.msra.mxu0 %v1005_v15  ;;  %563 = vmatpush1.bf16.msra.mxu1 %v1005_v15 }
  0x61   :  { %452 = vmatmul.mubr.bf16.vlgmr.msra.gmra.mrb[16].mxu0 %v833_v32  ;;  %573 = vmatmul.mubr.bf16.vlgmr.msra.gmra.mrb[16].mxu1 %v836_v33 }
  0x62   :  { %741 = vmatprep.mubr.msk.bf16.mxu0 %vm160_vm0, %v839_v34  ;;  %753 = vmatprep.mubr.msk.bf16.mxu1 %vm160_vm0, %v841_v35 }
  0x69   :  { %460 = vmatmul.mubr.bf16.gmra.mrb[20].mxu0 %v843_v36  ;;  %581 = vmatmul.mubr.bf16.gmra.mrb[20].mxu1 %v844_v37 }
  0x6a   :  { %742 = vmatprep.mubr.msk.bf16.mxu0 %vm160_vm0, %v845_v38  ;;  %754 = vmatprep.mubr.msk.bf16.mxu1 %vm160_vm0, %v847_v39 }
  0x71   :  { %468 = vmatmul.mubr.bf16.gmra.mrb[24].mxu0 %v849_v40  ;;  %589 = vmatmul.mubr.bf16.gmra.mrb[24].mxu1 %v850_v41 }
  0x72   :  { %743 = vmatprep.mubr.msk.bf16.mxu0 %vm160_vm0, %v851_v42  ;;  %755 = vmatprep.mubr.msk.bf16.mxu1 %vm160_vm0, %v853_v43 }
  0x79   :  { %476 = vmatmul.mubr.bf16.gmra.mrb[28].mxu0 %v855_v44  ;;  %597 = vmatmul.mubr.bf16.gmra.mrb[28].mxu1 %v856_v45 }
 0x104   :  { %v211_v46 = vpop.f32.mrb[0].mxu0  ;;  %v332_v47 = vpop.f32.mrb[0].mxu1 }
 0x105   :  { %v605_v48 = vmax.f32 %v211_v46, %v332_v47  ;;  %v213_v49 = vpop.f32.mrb[1].mxu0  ;;  %v334_v50 = vpop.f32.mrb[1].mxu1 }
 0x106   :  { %v214_v51 = vpop.f32.mrb[2].mxu0  ;;  %v335_v52 = vpop.f32.mrb[2].mxu1 }
 0x107   :  { %v606_v53 = vmax.f32 %v214_v51, %v335_v52  ;;  %v216_v54 = vpop.f32.mrb[3].mxu0  ;;  %v337_v55 = vpop.f32.mrb[3].mxu1 }
 0x10c   :  { %v219_v56 = vpop.f32.mrb[4].mxu0  ;;  %v340_v57 = vpop.f32.mrb[4].mxu1 }
 0x10d   :  { %v607_v58 = vmax.f32 %v219_v56, %v340_v57  ;;  %v221_v59 = vpop.f32.mrb[5].mxu0  ;;  %v342_v60 = vpop.f32.mrb[5].mxu1 }
 0x10e   :  { %v222_v61 = vpop.f32.mrb[6].mxu0  ;;  %v343_v62 = vpop.f32.mrb[6].mxu1 }
 0x10f   :  { %v608_v63 = vmax.f32 %v222_v61, %v343_v62  ;;  %v224_v0 = vpop.f32.mrb[7].mxu0  ;;  %v345_v1 = vpop.f32.mrb[7].mxu1 }
 0x114   :  { %v1161_v2 = vpop.f32.mrb[8].mxu0  ;;  %v1163_v3 = vpop.f32.mrb[8].mxu1 }
 0x115   :  { %v609_v4 = vmax.f32 %v1161_v2, %v1163_v3  ;;  %v229_v5 = vpop.f32.mrb[9].mxu0  ;;  %v350_v6 = vpop.f32.mrb[9].mxu1 }
 0x116   :  { %v1167_v7 = vpop.f32.mrb[10].mxu0  ;;  %v1169_v8 = vpop.f32.mrb[10].mxu1 }
 0x117   :  { %v610_v9 = vmax.f32 %v1167_v7, %v1169_v8  ;;  %v232_v10 = vpop.f32.mrb[11].mxu0  ;;  %v353_v11 = vpop.f32.mrb[11].mxu1 }
 0x11c   :  { %v1173_v12 = vpop.f32.mrb[12].mxu0  ;;  %v1175_v13 = vpop.f32.mrb[12].mxu1 }
 0x11d   :  { %v611_v14 = vmax.f32 %v1173_v12, %v1175_v13  ;;  %v237_v15 = vpop.f32.mrb[13].mxu0  ;;  %v358_v16 = vpop.f32.mrb[13].mxu1 }
 0x11e   :  { %v1179_v17 = vpop.f32.mrb[14].mxu0  ;;  %v1181_v18 = vpop.f32.mrb[14].mxu1 }
 0x11f   :  { %v612_v19 = vmax.f32 %v1179_v17, %v1181_v18  ;;  %v240_v20 = vpop.f32.mrb[15].mxu0  ;;  %v361_v21 = vpop.f32.mrb[15].mxu1 }
 0x134   :  { %v453_v22 = vpop.f32.mrb[16].mxu0  ;;  %v574_v23 = vpop.f32.mrb[16].mxu1 }
 0x135   :  { %v613_v24 = vmax.f32 %v453_v22, %v574_v23  ;;  %v455_v25 = vpop.f32.mrb[17].mxu0  ;;  %v576_v26 = vpop.f32.mrb[17].mxu1 }
 0x136   :  { %v456_v28 = vpop.f32.mrb[18].mxu0  ;;  %v577_v29 = vpop.f32.mrb[18].mxu1 }
 0x137   :  { %v621_v30 = vmax.f32 %v605_v48, %v613_v24  ;;  %v614_v31 = vmax.f32 %v456_v28, %v577_v29  ;;  %v458_v32 = vpop.f32.mrb[19].mxu0  ;;  %v579_v33 = vpop.f32.mrb[19].mxu1 }
 0x139   :  { %v636_v34 = vadd.f32 %v1188_v27, %v621_v30  ;;  %v622_v35 = vmax.f32 %v606_v53, %v614_v31 }
 0x13b   :  { %v637_v36 = vadd.f32 %v1188_v27, %v622_v35  ;;  %v644_v39 = vmax.f32 %v636_v34, 0.0 }
 0x13c   :  { %v461_v37 = vpop.f32.mrb[20].mxu0  ;;  %v582_v38 = vpop.f32.mrb[20].mxu1 }
 0x13d   :  { %v645_v40 = vmax.f32 %v637_v36, 0.0  ;;  %v615_v41 = vmax.f32 %v461_v37, %v582_v38  ;;  %v463_v42 = vpop.f32.mrb[21].mxu0  ;;  %v584_v43 = vpop.f32.mrb[21].mxu1 }
 0x13e   :  { %v464_v44 = vpop.f32.mrb[22].mxu0  ;;  %v585_v45 = vpop.f32.mrb[22].mxu1 }
 0x13f   :  { %v776_v46 = vpack.c.bf16 %v645_v40, %v644_v39  ;;  %v623_v47 = vmax.f32 %v607_v58, %v615_v41  ;;  %v616_v48 = vmax.f32 %v464_v44, %v585_v45  ;;  %v466_v49 = vpop.f32.mrb[23].mxu0  ;;  %v587_v50 = vpop.f32.mrb[23].mxu1 }
 0x141   :  { %777 = vst [vmem:[%s1228_s6] sm:$0xff] %v776_v46   ;;  %v638_v51 = vadd.f32 %v1188_v27, %v623_v47  ;;  %v624_v52 = vmax.f32 %v608_v63, %v616_v48 }
 0x143   :  { %v639_v53 = vadd.f32 %v1188_v27, %v624_v52  ;;  %v646_v56 = vmax.f32 %v638_v51, 0.0 }
 0x144   :  { %v469_v54 = vpop.f32.mrb[24].mxu0  ;;  %v590_v55 = vpop.f32.mrb[24].mxu1 }
 0x145   :  { %v647_v57 = vmax.f32 %v639_v53, 0.0  ;;  %v617_v59 = vmax.f32 %v469_v54, %v590_v55  ;;  %v471_v60 = vpop.f32.mrb[25].mxu0  ;;  %v592_v61 = vpop.f32.mrb[25].mxu1 }
 0x146   :  { %v472_v58 = vpop.f32.mrb[26].mxu0  ;;  %v593_v62 = vpop.f32.mrb[26].mxu1 }
 0x147   :  { %v781_v0 = vpack.c.bf16 %v647_v57, %v646_v56  ;;  %v625_v1 = vmax.f32 %v609_v4, %v617_v59  ;;  %v618_v5 = vmax.f32 %v472_v58, %v593_v62  ;;  %v474_v6 = vpop.f32.mrb[27].mxu0  ;;  %v595_v10 = vpop.f32.mrb[27].mxu1 }
 0x149   :  { %793 = vst [vmem:[%s1228_s6 + $0x8] sm:$0xff] %v781_v0   ;;  %v640_v63 = vadd.f32 %v1188_v27, %v625_v1  ;;  %v626_v11 = vmax.f32 %v610_v9, %v618_v5 }
 0x14b   :  { %v641_v15 = vadd.f32 %v1188_v27, %v626_v11  ;;  %v648_v21 = vmax.f32 %v640_v63, 0.0 }
 0x14c   :  { %v477_v16 = vpop.f32.mrb[28].mxu0  ;;  %v598_v20 = vpop.f32.mrb[28].mxu1 }
 0x14d   :  { %v649_v2 = vmax.f32 %v641_v15, 0.0  ;;  %v619_v3 = vmax.f32 %v477_v16, %v598_v20  ;;  %v479_v4 = vpop.f32.mrb[29].mxu0  ;;  %v600_v22 = vpop.f32.mrb[29].mxu1 }
 0x14e   :  { %v480_v23 = vpop.f32.mrb[30].mxu0  ;;  %v601_v24 = vpop.f32.mrb[30].mxu1 }
 0x14f   :  { %v786_v25 = vpack.c.bf16 %v649_v2, %v648_v21  ;;  %v627_v26 = vmax.f32 %v611_v14, %v619_v3  ;;  %v620_v28 = vmax.f32 %v480_v23, %v601_v24  ;;  %v482_v29 = vpop.f32.mrb[31].mxu0  ;;  %v603_v7 = vpop.f32.mrb[31].mxu1 }
 0x151   :  { %794 = vst [vmem:[%s1228_s6 + $0x10] sm:$0xff] %v786_v25   ;;  %v642_v8 = vadd.f32 %v1188_v27, %v627_v26  ;;  %v628_v9 = vmax.f32 %v612_v19, %v620_v28 }
 0x153   :  { %v643_v30 = vadd.f32 %v1188_v27, %v628_v9  ;;  %v650_v31 = vmax.f32 %v642_v8, 0.0 }
 0x155   :  { %v651_v32 = vmax.f32 %v643_v30, 0.0 }
 0x157   :  { %v791_v33 = vpack.c.bf16 %v651_v32, %v650_v31 }
 0x159   :  { %795 = vst [vmem:[%s1228_s6 + $0x18] sm:$0xff] %v791_v33  }

// kernel: lenet_forward.5
= control target key start
LH: loop header
LB: loop body
LE: loop exit
PB: predicated region body
PF: predicated region fallthrough
CT: control target
= control target key end

     0   :  { %s11405_s1 = inlined_call_operand.vmem [shape: bf16[3200,512], index: 1, kind: input, shape index: {}]   ;;  %s11406_s0 = inlined_call_operand.vmem [shape: bf16[16,3200], index: 0, kind: input, shape index: {}]   ;;  %s11407_s3 = inlined_call_operand.vmem [shape: bf16[512,128], index: 3, kind: input, shape index: {}]   ;;  %s11408_s2 = inlined_call_operand.vmem [shape: f32[1,512], index: 2, kind: input, shape index: {}]   ;;  %s11409_s4 = inlined_call_operand.vmem [shape: f32[1,128], index: 4, kind: input, shape index: {}]   ;;  %s11410_s5 = inlined_call_operand.vmem [shape: f32[16,128], index: 5, kind: output, shape index: {}]  }
   0x1   :  { %v7510_v0 = vld [vmem:[%s11405_s1 + $0x4] ss:$16 sps:$4 sm:$0xff]   ;;  %v7512_v1 = vld [vmem:[%s11405_s1 + $0xc] ss:$16 sps:$4 sm:$0xff]   ;;  %v7514_v2 = vld [vmem:[%s11405_s1] ss:$16 sps:$4 sm:$0xff]  }
   0x2   :  { %4995 = vmatprep.subr.bf16.mxu0 %v7510_v0  ;;  %v7515_v3 = vld [vmem:[%s11405_s1 + $0x8] ss:$16 sps:$4 sm:$0xff]   ;;  %5554 = vmatprep.subr.bf16.mxu1 %v7512_v1  ;;  %v7516_v4 = vld [vmem:[%s11405_s1 + $0x24] ss:$16 sps:$4 sm:$0xff]   ;;  %v7518_v5 = vld [vmem:[%s11405_s1 + $0x2c] ss:$16 sps:$4 sm:$0xff]  }
   0x3   :  { %4996 = vmatpush1.bf16.msra.mxu0 %v7514_v2  ;;  %5555 = vmatpush1.bf16.msra.mxu1 %v7515_v3  ;;  %v7520_v6 = vld [vmem:[%s11405_s1 + $0x20] ss:$16 sps:$4 sm:$0xff]   ;;  %v7521_v7 = vld [vmem:[%s11405_s1 + $0x28] ss:$16 sps:$4 sm:$0xff]   ;;  %v7522_v8 = vld [vmem:[%s11405_s1 + $0x44] ss:$16 sps:$4 sm:$0xff]  }
   0x4   :  { %4997 = vmatprep.subr.bf16.mxu0 %v7516_v4  ;;  %5556 = vmatprep.subr.bf16.mxu1 %v7518_v5  ;;  %v7524_v9 = vld [vmem:[%s11405_s1 + $0x4c] ss:$16 sps:$4 sm:$0xff]   ;;  %v7526_v10 = vld [vmem:[%s11405_s1 + $0x40] ss:$16 sps:$4 sm:$0xff]   ;;  %v7527_v11 = vld [vmem:[%s11405_s1 + $0x48] ss:$16 sps:$4 sm:$0xff]  }
   0x5   :  { %v7528_v12 = vld [vmem:[%s11405_s1 + $0x64] ss:$16 sps:$4 sm:$0xff]   ;;  %v7530_v13 = vld [vmem:[%s11405_s1 + $0x6c] ss:$16 sps:$4 sm:$0xff]   ;;  %v7532_v14 = vld [vmem:[%s11405_s1 + $0x60] ss:$16 sps:$4 sm:$0xff]  }
   0x6   :  { %v7533_v15 = vld [vmem:[%s11405_s1 + $0x68] ss:$16 sps:$4 sm:$0xff]   ;;  %v7534_v16 = vld [vmem:[%s11405_s1 + $0x84] ss:$16 sps:$4 sm:$0xff]   ;;  %v7536_v17 = vld [vmem:[%s11405_s1 + $0x8c] ss:$16 sps:$4 sm:$0xff]  }
   0x7   :  { %4998 = vmatpush1.bf16.msra.mxu0 %v7520_v6  ;;  %5557 = vmatpush1.bf16.msra.mxu1 %v7521_v7  ;;  %v7538_v18 = vld [vmem:[%s11405_s1 + $0x80] ss:$16 sps:$4 sm:$0xff]   ;;  %v7539_v19 = vld [vmem:[%s11405_s1 + $0x88] ss:$16 sps:$4 sm:$0xff]   ;;  %v7540_v20 = vld [vmem:[%s11405_s1 + $0xa4] ss:$16 sps:$4 sm:$0xff]  }
   0x8   :  { %4999 = vmatprep.subr.bf16.mxu0 %v7522_v8  ;;  %5558 = vmatprep.subr.bf16.mxu1 %v7524_v9  ;;  %v7542_v21 = vld [vmem:[%s11405_s1 + $0xac] ss:$16 sps:$4 sm:$0xff]   ;;  %v7544_v22 = vld [vmem:[%s11405_s1 + $0xa0] ss:$16 sps:$4 sm:$0xff]   ;;  %v7545_v23 = vld [vmem:[%s11405_s1 + $0xa8] ss:$16 sps:$4 sm:$0xff]  }
   0x9   :  { %v7546_v24 = vld [vmem:[%s11405_s1 + $0xc4] ss:$16 sps:$4 sm:$0xff]   ;;  %v7548_v25 = vld [vmem:[%s11405_s1 + $0xcc] ss:$16 sps:$4 sm:$0xff]   ;;  %v7550_v26 = vld [vmem:[%s11405_s1 + $0xc0] ss:$16 sps:$4 sm:$0xff]  }
   0xa   :  { %v7551_v27 = vld [vmem:[%s11405_s1 + $0xc8] ss:$16 sps:$4 sm:$0xff]   ;;  %v7552_v28 = vld [vmem:[%s11405_s1 + $0xe4] ss:$16 sps:$4 sm:$0xff]   ;;  %v7554_v29 = vld [vmem:[%s11405_s1 + $0xec] ss:$16 sps:$4 sm:$0xff]  }
   0xb   :  { %5000 = vmatpush1.bf16.msra.mxu0 %v7526_v10  ;;  %5559 = vmatpush1.bf16.msra.mxu1 %v7527_v11  ;;  %v7556_v30 = vld [vmem:[%s11405_s1 + $0xe0] ss:$16 sps:$4 sm:$0xff]   ;;  %v7557_v31 = vld [vmem:[%s11405_s1 + $0xe8] ss:$16 sps:$4 sm:$0xff]   ;;  %v7558_v32 = vld [vmem:[%s11405_s1 + $0x104] ss:$16 sps:$4 sm:$0xff]  }
   0xc   :  { %5001 = vmatprep.subr.bf16.mxu0 %v7528_v12  ;;  %5560 = vmatprep.subr.bf16.mxu1 %v7530_v13  ;;  %v7560_v33 = vld [vmem:[%s11405_s1 + $0x10c] ss:$16 sps:$4 sm:$0xff]   ;;  %v7562_v34 = vld [vmem:[%s11405_s1 + $0x100] ss:$16 sps:$4 sm:$0xff]   ;;  %v7563_v35 = vld [vmem:[%s11405_s1 + $0x108] ss:$16 sps:$4 sm:$0xff]  }
   0xd   :  { %v7564_v36 = vld [vmem:[%s11405_s1 + $0x124] ss:$16 sps:$4 sm:$0xff]   ;;  %v7566_v37 = vld [vmem:[%s11405_s1 + $0x12c] ss:$16 sps:$4 sm:$0xff]   ;;  %v7568_v38 = vld [vmem:[%s11405_s1 + $0x120] ss:$16 sps:$4 sm:$0xff]  }
   0xe   :  { %v7569_v39 = vld [vmem:[%s11405_s1 + $0x128] ss:$16 sps:$4 sm:$0xff]   ;;  %v7570_v40 = vld [vmem:[%s11405_s1 + $0x144] ss:$16 sps:$4 sm:$0xff]   ;;  %v7572_v41 = vld [vmem:[%s11405_s1 + $0x14c] ss:$16 sps:$4 sm:$0xff]  }
   0xf   :  { %5002 = vmatpush1.bf16.msra.mxu0 %v7532_v14  ;;  %5561 = vmatpush1.bf16.msra.mxu1 %v7533_v15  ;;  %v7574_v42 = vld [vmem:[%s11405_s1 + $0x140] ss:$16 sps:$4 sm:$0xff]   ;;  %v7575_v43 = vld [vmem:[%s11405_s1 + $0x148] ss:$16 sps:$4 sm:$0xff]   ;;  %v7576_v44 = vld [vmem:[%s11405_s1 + $0x164] ss:$16 sps:$4 sm:$0xff]  }
  0x10   :  { %5003 = vmatprep.subr.bf16.mxu0 %v7534_v16  ;;  %5562 = vmatprep.subr.bf16.mxu1 %v7536_v17  ;;  %v7578_v45 = vld [vmem:[%s11405_s1 + $0x16c] ss:$16 sps:$4 sm:$0xff]   ;;  %v7580_v46 = vld [vmem:[%s11405_s1 + $0x160] ss:$16 sps:$4 sm:$0xff]   ;;  %v7581_v47 = vld [vmem:[%s11405_s1 + $0x168] ss:$16 sps:$4 sm:$0xff]  }
  0x11   :  { %v7608_v48 = vld [vmem:[%s11406_s0 + $0x4] ss:$100 sps:$4 sm:$0xff]   ;;  %v7584_v50 = vld [vmem:[%s11405_s1 + $0x18c] ss:$16 sps:$4 sm:$0xff]   ;;  %v7586_v51 = vld [vmem:[%s11405_s1 + $0x180] ss:$16 sps:$4 sm:$0xff]  }
  0x12   :  { %v7582_v49 = vld [vmem:[%s11405_s1 + $0x184] ss:$16 sps:$4 sm:$0xff]   ;;  %5027 = vmatprep.mubr.bf16.mxu0 %v7608_v48  ;;  %5586 = vmatprep.mubr.bf16.mxu1 %v7608_v48  ;;  %v7587_v52 = vld [vmem:[%s11405_s1 + $0x188] ss:$16 sps:$4 sm:$0xff]   ;;  %v7590_v54 = vld [vmem:[%s11405_s1 + $0x1ac] ss:$16 sps:$4 sm:$0xff]  }
  0x13   :  { %5004 = vmatpush1.bf16.msra.mxu0 %v7538_v18  ;;  %5563 = vmatpush1.bf16.msra.mxu1 %v7539_v19  ;;  %v7588_v53 = vld [vmem:[%s11405_s1 + $0x1a4] ss:$16 sps:$4 sm:$0xff]   ;;  %v7592_v55 = vld [vmem:[%s11405_s1 + $0x1a0] ss:$16 sps:$4 sm:$0xff]   ;;  %v7593_v56 = vld [vmem:[%s11405_s1 + $0x1a8] ss:$16 sps:$4 sm:$0xff]  }
  0x14   :  { %5005 = vmatprep.subr.bf16.mxu0 %v7540_v20  ;;  %5564 = vmatprep.subr.bf16.mxu1 %v7542_v21  ;;  %v7594_v57 = vld [vmem:[%s11405_s1 + $0x1c4] ss:$16 sps:$4 sm:$0xff]   ;;  %v7596_v58 = vld [vmem:[%s11405_s1 + $0x1cc] ss:$16 sps:$4 sm:$0xff]   ;;  %v7598_v59 = vld [vmem:[%s11405_s1 + $0x1c0] ss:$16 sps:$4 sm:$0xff]  }
  0x15   :  { %v7599_v60 = vld [vmem:[%s11405_s1 + $0x1c8] ss:$16 sps:$4 sm:$0xff]   ;;  %v7600_v61 = vld [vmem:[%s11405_s1 + $0x1e4] ss:$16 sps:$4 sm:$0xff]   ;;  %v7602_v62 = vld [vmem:[%s11405_s1 + $0x1ec] ss:$16 sps:$4 sm:$0xff]  }
  0x16   :  { %v7604_v63 = vld [vmem:[%s11405_s1 + $0x1e0] ss:$16 sps:$4 sm:$0xff]   ;;  %v7605_v0 = vld [vmem:[%s11405_s1 + $0x1e8] ss:$16 sps:$4 sm:$0xff]   ;;  %v7611_v1 = vld [vmem:[%s11405_s1 + $0x204] ss:$16 sps:$4 sm:$0xff]  }
  0x17   :  { %5006 = vmatpush1.bf16.msra.mxu0 %v7544_v22  ;;  %5565 = vmatpush1.bf16.msra.mxu1 %v7545_v23  ;;  %v7614_v2 = vld [vmem:[%s11405_s1 + $0x20c] ss:$16 sps:$4 sm:$0xff]   ;;  %v7606_v3 = vld [vmem:[%s11406_s0] ss:$100 sps:$4 sm:$0xff]   ;;  %v7612_v5 = vld [vmem:[%s11405_s1 + $0x208] ss:$16 sps:$4 sm:$0xff]  }
  0x18   :  { %5007 = vmatprep.subr.bf16.mxu0 %v7546_v24  ;;  %5566 = vmatprep.subr.bf16.mxu1 %v7548_v25  ;;  %v7609_v4 = vld [vmem:[%s11405_s1 + $0x200] ss:$16 sps:$4 sm:$0xff]   ;;  %v7617_v6 = vld [vmem:[%s11405_s1 + $0x224] ss:$16 sps:$4 sm:$0xff]   ;;  %v7620_v7 = vld [vmem:[%s11405_s1 + $0x22c] ss:$16 sps:$4 sm:$0xff]  }
  0x19   :  { %v7615_v8 = vld [vmem:[%s11405_s1 + $0x220] ss:$16 sps:$4 sm:$0xff]   ;;  %v7618_v9 = vld [vmem:[%s11405_s1 + $0x228] ss:$16 sps:$4 sm:$0xff]   ;;  %v7623_v10 = vld [vmem:[%s11405_s1 + $0x244] ss:$16 sps:$4 sm:$0xff]  }
  0x1a   :  { %v7626_v11 = vld [vmem:[%s11405_s1 + $0x24c] ss:$16 sps:$4 sm:$0xff]   ;;  %v7621_v12 = vld [vmem:[%s11405_s1 + $0x240] ss:$16 sps:$4 sm:$0xff]   ;;  %v7624_v13 = vld [vmem:[%s11405_s1 + $0x248] ss:$16 sps:$4 sm:$0xff]  }
  0x1b   :  { %5008 = vmatpush1.bf16.msra.mxu0 %v7550_v26  ;;  %5567 = vmatpush1.bf16.msra.mxu1 %v7551_v27  ;;  %v7629_v14 = vld [vmem:[%s11405_s1 + $0x264] ss:$16 sps:$4 sm:$0xff]   ;;  %v7632_v15 = vld [vmem:[%s11405_s1 + $0x26c] ss:$16 sps:$4 sm:$0xff]   ;;  %v7627_v16 = vld [vmem:[%s11405_s1 + $0x260] ss:$16 sps:$4 sm:$0xff]  }
  0x1c   :  { %5009 = vmatprep.subr.bf16.mxu0 %v7552_v28  ;;  %5568 = vmatprep.subr.bf16.mxu1 %v7554_v29  ;;  %v7630_v17 = vld [vmem:[%s11405_s1 + $0x268] ss:$16 sps:$4 sm:$0xff]   ;;  %v7635_v18 = vld [vmem:[%s11405_s1 + $0x284] ss:$16 sps:$4 sm:$0xff]   ;;  %v7638_v19 = vld [vmem:[%s11405_s1 + $0x28c] ss:$16 sps:$4 sm:$0xff]  }
  0x1d   :  { %v7633_v20 = vld [vmem:[%s11405_s1 + $0x280] ss:$16 sps:$4 sm:$0xff]   ;;  %v7636_v21 = vld [vmem:[%s11405_s1 + $0x288] ss:$16 sps:$4 sm:$0xff]   ;;  %v7641_v22 = vld [vmem:[%s11405_s1 + $0x2a4] ss:$16 sps:$4 sm:$0xff]  }
  0x1e   :  { %v7644_v23 = vld [vmem:[%s11405_s1 + $0x2ac] ss:$16 sps:$4 sm:$0xff]   ;;  %v7639_v24 = vld [vmem:[%s11405_s1 + $0x2a0] ss:$16 sps:$4 sm:$0xff]   ;;  %v7642_v25 = vld [vmem:[%s11405_s1 + $0x2a8] ss:$16 sps:$4 sm:$0xff]  }
  0x1f   :  { %5010 = vmatpush1.bf16.msra.mxu0 %v7556_v30  ;;  %5569 = vmatpush1.bf16.msra.mxu1 %v7557_v31  ;;  %v7647_v26 = vld [vmem:[%s11405_s1 + $0x2c4] ss:$16 sps:$4 sm:$0xff]   ;;  %v7650_v27 = vld [vmem:[%s11405_s1 + $0x2cc] ss:$16 sps:$4 sm:$0xff]   ;;  %v7645_v28 = vld [vmem:[%s11405_s1 + $0x2c0] ss:$16 sps:$4 sm:$0xff]  }
  0x20   :  { %5011 = vmatprep.subr.bf16.mxu0 %v7558_v32  ;;  %5570 = vmatprep.subr.bf16.mxu1 %v7560_v33  ;;  %v7648_v29 = vld [vmem:[%s11405_s1 + $0x2c8] ss:$16 sps:$4 sm:$0xff]   ;;  %v7707_v30 = vld [vmem:[%s11406_s0 + $0xc] ss:$100 sps:$4 sm:$0xff]   ;;  %v7653_v31 = vld [vmem:[%s11405_s1 + $0x2e4] ss:$16 sps:$4 sm:$0xff]  }
  0x21   :  { %v7656_v32 = vld [vmem:[%s11405_s1 + $0x2ec] ss:$16 sps:$4 sm:$0xff]   ;;  %v7651_v33 = vld [vmem:[%s11405_s1 + $0x2e0] ss:$16 sps:$4 sm:$0xff]  }
  0x22   :  { %v7680_v48 = vld [vmem:[%s11405_s1 + $0x36c] ss:$16 sps:$4 sm:$0xff]  }
  0x23   :  { %5012 = vmatpush1.bf16.msra.mxu0 %v7562_v34  ;;  %5571 = vmatpush1.bf16.msra.mxu1 %v7563_v35  ;;  %v7654_v34 = vld [vmem:[%s11405_s1 + $0x2e8] ss:$16 sps:$4 sm:$0xff]   ;;  %v7659_v35 = vld [vmem:[%s11405_s1 + $0x304] ss:$16 sps:$4 sm:$0xff]  }
  0x24   :  { %5013 = vmatprep.subr.bf16.mxu0 %v7564_v36  ;;  %5572 = vmatprep.subr.bf16.mxu1 %v7566_v37  ;;  %v7662_v36 = vld [vmem:[%s11405_s1 + $0x30c] ss:$16 sps:$4 sm:$0xff]   ;;  %v7657_v37 = vld [vmem:[%s11405_s1 + $0x300] ss:$16 sps:$4 sm:$0xff]  }
  0x27   :  { %5014 = vmatpush1.bf16.msra.mxu0 %v7568_v38  ;;  %5573 = vmatpush1.bf16.msra.mxu1 %v7569_v39  ;;  %v7660_v38 = vld [vmem:[%s11405_s1 + $0x308] ss:$16 sps:$4 sm:$0xff]   ;;  %v7665_v39 = vld [vmem:[%s11405_s1 + $0x324] ss:$16 sps:$4 sm:$0xff]  }
  0x28   :  { %5015 = vmatprep.subr.bf16.mxu0 %v7570_v40  ;;  %5574 = vmatprep.subr.bf16.mxu1 %v7572_v41  ;;  %v7668_v40 = vld [vmem:[%s11405_s1 + $0x32c] ss:$16 sps:$4 sm:$0xff]   ;;  %v7663_v41 = vld [vmem:[%s11405_s1 + $0x320] ss:$16 sps:$4 sm:$0xff]  }
  0x2b   :  { %5016 = vmatpush1.bf16.msra.mxu0 %v7574_v42  ;;  %5575 = vmatpush1.bf16.msra.mxu1 %v7575_v43  ;;  %v7666_v42 = vld [vmem:[%s11405_s1 + $0x328] ss:$16 sps:$4 sm:$0xff]   ;;  %v7671_v43 = vld [vmem:[%s11405_s1 + $0x344] ss:$16 sps:$4 sm:$0xff]  }
  0x2c   :  { %5017 = vmatprep.subr.bf16.mxu0 %v7576_v44  ;;  %5576 = vmatprep.subr.bf16.mxu1 %v7578_v45  ;;  %v7674_v44 = vld [vmem:[%s11405_s1 + $0x34c] ss:$16 sps:$4 sm:$0xff]   ;;  %v7669_v45 = vld [vmem:[%s11405_s1 + $0x340] ss:$16 sps:$4 sm:$0xff]  }
  0x2f   :  { %5018 = vmatpush1.bf16.msra.mxu0 %v7580_v46  ;;  %5577 = vmatpush1.bf16.msra.mxu1 %v7581_v47  ;;  %v7672_v46 = vld [vmem:[%s11405_s1 + $0x348] ss:$16 sps:$4 sm:$0xff]   ;;  %v7677_v47 = vld [vmem:[%s11405_s1 + $0x364] ss:$16 sps:$4 sm:$0xff]  }
  0x30   :  { %5019 = vmatprep.subr.bf16.mxu0 %v7582_v49  ;;  %5578 = vmatprep.subr.bf16.mxu1 %v7584_v50  ;;  %v7675_v49 = vld [vmem:[%s11405_s1 + $0x360] ss:$16 sps:$4 sm:$0xff]   ;;  %v7678_v50 = vld [vmem:[%s11405_s1 + $0x368] ss:$16 sps:$4 sm:$0xff]  }
  0x33   :  { %5020 = vmatpush1.bf16.msra.mxu0 %v7586_v51  ;;  %5579 = vmatpush1.bf16.msra.mxu1 %v7587_v52  ;;  %v7683_v51 = vld [vmem:[%s11405_s1 + $0x384] ss:$16 sps:$4 sm:$0xff]   ;;  %v7686_v52 = vld [vmem:[%s11405_s1 + $0x38c] ss:$16 sps:$4 sm:$0xff]  }
  0x34   :  { %5021 = vmatprep.subr.bf16.mxu0 %v7588_v53  ;;  %5580 = vmatprep.subr.bf16.mxu1 %v7590_v54  ;;  %v7681_v53 = vld [vmem:[%s11405_s1 + $0x380] ss:$16 sps:$4 sm:$0xff]   ;;  %v7684_v54 = vld [vmem:[%s11405_s1 + $0x388] ss:$16 sps:$4 sm:$0xff]  }
  0x37   :  { %5022 = vmatpush1.bf16.msra.mxu0 %v7592_v55  ;;  %5581 = vmatpush1.bf16.msra.mxu1 %v7593_v56  ;;  %v7689_v55 = vld [vmem:[%s11405_s1 + $0x3a4] ss:$16 sps:$4 sm:$0xff]   ;;  %v7692_v56 = vld [vmem:[%s11405_s1 + $0x3ac] ss:$16 sps:$4 sm:$0xff]  }
  0x38   :  { %5023 = vmatprep.subr.bf16.mxu0 %v7594_v57  ;;  %5582 = vmatprep.subr.bf16.mxu1 %v7596_v58  ;;  %v7687_v57 = vld [vmem:[%s11405_s1 + $0x3a0] ss:$16 sps:$4 sm:$0xff]   ;;  %v7690_v58 = vld [vmem:[%s11405_s1 + $0x3a8] ss:$16 sps:$4 sm:$0xff]  }
  0x3b   :  { %5024 = vmatpush1.bf16.msra.mxu0 %v7598_v59  ;;  %5583 = vmatpush1.bf16.msra.mxu1 %v7599_v60  ;;  %v7695_v59 = vld [vmem:[%s11405_s1 + $0x3c4] ss:$16 sps:$4 sm:$0xff]   ;;  %v7698_v60 = vld [vmem:[%s11405_s1 + $0x3cc] ss:$16 sps:$4 sm:$0xff]  }
  0x3c   :  { %5025 = vmatprep.subr.bf16.mxu0 %v7600_v61  ;;  %5584 = vmatprep.subr.bf16.mxu1 %v7602_v62  ;;  %v7693_v61 = vld [vmem:[%s11405_s1 + $0x3c0] ss:$16 sps:$4 sm:$0xff]   ;;  %v7696_v62 = vld [vmem:[%s11405_s1 + $0x3c8] ss:$16 sps:$4 sm:$0xff]  }
  0x3f   :  { %5026 = vmatpush1.bf16.msra.mxu0 %v7604_v63  ;;  %5585 = vmatpush1.bf16.msra.mxu1 %v7605_v0  ;;  %v7701_v63 = vld [vmem:[%s11405_s1 + $0x3e4] ss:$16 sps:$4 sm:$0xff]   ;;  %v7704_v0 = vld [vmem:[%s11405_s1 + $0x3ec] ss:$16 sps:$4 sm:$0xff]  }
  0x40   :  { %5038 = vmatprep.subr.bf16.mxu0 %v7611_v1  ;;  %5597 = vmatprep.subr.bf16.mxu1 %v7614_v2  ;;  %v7699_v1 = vld [vmem:[%s11405_s1 + $0x3e0] ss:$16 sps:$4 sm:$0xff]   ;;  %v7702_v2 = vld [vmem:[%s11405_s1 + $0x3e8] ss:$16 sps:$4 sm:$0xff]  }
  0x42   :  { %5028 = vmatmul.mubr.bf16.vlgmr.msra.gmra.mrb[0].mxu0 %v7606_v3  ;;  %5587 = vmatmul.mubr.bf16.vlgmr.msra.gmra.mrb[0].mxu1 %v7606_v3  ;;  %v7710_v3 = vld [vmem:[%s11405_s1 + $0x404] ss:$16 sps:$4 sm:$0xff]  }
  0x43   :  { %5039 = vmatpush1.bf16.msra.mxu0 %v7609_v4  ;;  %5598 = vmatpush1.bf16.msra.mxu1 %v7612_v5  ;;  %v7713_v4 = vld [vmem:[%s11405_s1 + $0x40c] ss:$16 sps:$4 sm:$0xff]  }
  0x44   :  { %5040 = vmatprep.subr.bf16.mxu0 %v7617_v6  ;;  %5599 = vmatprep.subr.bf16.mxu1 %v7620_v7  ;;  %v7705_v5 = vld [vmem:[%s11406_s0 + $0x8] ss:$100 sps:$4 sm:$0xff]   ;;  %v7708_v6 = vld [vmem:[%s11405_s1 + $0x400] ss:$16 sps:$4 sm:$0xff]  }
  0x45   :  { %5070 = vmatprep.mubr.bf16.mxu0 %v7707_v30  ;;  %5629 = vmatprep.mubr.bf16.mxu1 %v7707_v30  ;;  %v7711_v7 = vld [vmem:[%s11405_s1 + $0x408] ss:$16 sps:$4 sm:$0xff]   ;;  %v7749_v30 = vld [vmem:[%s11405_s1 + $0x4cc] ss:$16 sps:$4 sm:$0xff]  }
  0x47   :  { %5041 = vmatpush1.bf16.msra.mxu0 %v7615_v8  ;;  %5600 = vmatpush1.bf16.msra.mxu1 %v7618_v9  ;;  %v7716_v8 = vld [vmem:[%s11405_s1 + $0x424] ss:$16 sps:$4 sm:$0xff]   ;;  %v7719_v9 = vld [vmem:[%s11405_s1 + $0x42c] ss:$16 sps:$4 sm:$0xff]  }
  0x48   :  { %5042 = vmatprep.subr.bf16.mxu0 %v7623_v10  ;;  %5601 = vmatprep.subr.bf16.mxu1 %v7626_v11  ;;  %v7714_v10 = vld [vmem:[%s11405_s1 + $0x420] ss:$16 sps:$4 sm:$0xff]   ;;  %v7717_v11 = vld [vmem:[%s11405_s1 + $0x428] ss:$16 sps:$4 sm:$0xff]  }
  0x4b   :  { %5043 = vmatpush1.bf16.msra.mxu0 %v7621_v12  ;;  %5602 = vmatpush1.bf16.msra.mxu1 %v7624_v13  ;;  %v7806_v12 = vld [vmem:[%s11406_s0 + $0x14] ss:$100 sps:$4 sm:$0xff]  }
  0x4c   :  { %5044 = vmatprep.subr.bf16.mxu0 %v7629_v14  ;;  %5603 = vmatprep.subr.bf16.mxu1 %v7632_v15  ;;  %v7722_v13 = vld [vmem:[%s11405_s1 + $0x444] ss:$16 sps:$4 sm:$0xff]   ;;  %v7725_v14 = vld [vmem:[%s11405_s1 + $0x44c] ss:$16 sps:$4 sm:$0xff]   ;;  %v7720_v15 = vld [vmem:[%s11405_s1 + $0x440] ss:$16 sps:$4 sm:$0xff]  }
  0x4f   :  { %5045 = vmatpush1.bf16.msra.mxu0 %v7627_v16  ;;  %5604 = vmatpush1.bf16.msra.mxu1 %v7630_v17  ;;  %v7723_v16 = vld [vmem:[%s11405_s1 + $0x448] ss:$16 sps:$4 sm:$0xff]   ;;  %v7728_v17 = vld [vmem:[%s11405_s1 + $0x464] ss:$16 sps:$4 sm:$0xff]  }
  0x50   :  { %5046 = vmatprep.subr.bf16.mxu0 %v7635_v18  ;;  %5605 = vmatprep.subr.bf16.mxu1 %v7638_v19  ;;  %v7731_v18 = vld [vmem:[%s11405_s1 + $0x46c] ss:$16 sps:$4 sm:$0xff]   ;;  %v7726_v19 = vld [vmem:[%s11405_s1 + $0x460] ss:$16 sps:$4 sm:$0xff]  }
  0x53   :  { %5047 = vmatpush1.bf16.msra.mxu0 %v7633_v20  ;;  %5606 = vmatpush1.bf16.msra.mxu1 %v7636_v21  ;;  %v7729_v20 = vld [vmem:[%s11405_s1 + $0x468] ss:$16 sps:$4 sm:$0xff]   ;;  %v7734_v21 = vld [vmem:[%s11405_s1 + $0x484] ss:$16 sps:$4 sm:$0xff]  }
  0x54   :  { %5048 = vmatprep.subr.bf16.mxu0 %v7641_v22  ;;  %5607 = vmatprep.subr.bf16.mxu1 %v7644_v23  ;;  %v7737_v22 = vld [vmem:[%s11405_s1 + $0x48c] ss:$16 sps:$4 sm:$0xff]   ;;  %v7732_v23 = vld [vmem:[%s11405_s1 + $0x480] ss:$16 sps:$4 sm:$0xff]  }
  0x57   :  { %5049 = vmatpush1.bf16.msra.mxu0 %v7639_v24  ;;  %5608 = vmatpush1.bf16.msra.mxu1 %v7642_v25  ;;  %v7735_v24 = vld [vmem:[%s11405_s1 + $0x488] ss:$16 sps:$4 sm:$0xff]   ;;  %v7740_v25 = vld [vmem:[%s11405_s1 + $0x4a4] ss:$16 sps:$4 sm:$0xff]  }
  0x58   :  { %5050 = vmatprep.subr.bf16.mxu0 %v7647_v26  ;;  %5609 = vmatprep.subr.bf16.mxu1 %v7650_v27  ;;  %v7743_v26 = vld [vmem:[%s11405_s1 + $0x4ac] ss:$16 sps:$4 sm:$0xff]   ;;  %v7738_v27 = vld [vmem:[%s11405_s1 + $0x4a0] ss:$16 sps:$4 sm:$0xff]  }
  0x5b   :  { %5051 = vmatpush1.bf16.msra.mxu0 %v7645_v28  ;;  %5610 = vmatpush1.bf16.msra.mxu1 %v7648_v29  ;;  %v7741_v28 = vld [vmem:[%s11405_s1 + $0x4a8] ss:$16 sps:$4 sm:$0xff]   ;;  %v7746_v29 = vld [vmem:[%s11405_s1 + $0x4c4] ss:$16 sps:$4 sm:$0xff]  }
  0x5c   :  { %5052 = vmatprep.subr.bf16.mxu0 %v7653_v31  ;;  %5611 = vmatprep.subr.bf16.mxu1 %v7656_v32  ;;  %v7744_v31 = vld [vmem:[%s11405_s1 + $0x4c0] ss:$16 sps:$4 sm:$0xff]   ;;  %v7747_v32 = vld [vmem:[%s11405_s1 + $0x4c8] ss:$16 sps:$4 sm:$0xff]  }
  0x5f   :  { %5053 = vmatpush1.bf16.msra.mxu0 %v7651_v33  ;;  %5612 = vmatpush1.bf16.msra.mxu1 %v7654_v34  ;;  %v7752_v33 = vld [vmem:[%s11405_s1 + $0x4e4] ss:$16 sps:$4 sm:$0xff]   ;;  %v7755_v34 = vld [vmem:[%s11405_s1 + $0x4ec] ss:$16 sps:$4 sm:$0xff]  }
  0x60   :  { %5054 = vmatprep.subr.bf16.mxu0 %v7659_v35  ;;  %5613 = vmatprep.subr.bf16.mxu1 %v7662_v36  ;;  %v7750_v35 = vld [vmem:[%s11405_s1 + $0x4e0] ss:$16 sps:$4 sm:$0xff]   ;;  %v7753_v36 = vld [vmem:[%s11405_s1 + $0x4e8] ss:$16 sps:$4 sm:$0xff]  }
  0x63   :  { %5055 = vmatpush1.bf16.msra.mxu0 %v7657_v37  ;;  %5614 = vmatpush1.bf16.msra.mxu1 %v7660_v38  ;;  %v7758_v37 = vld [vmem:[%s11405_s1 + $0x504] ss:$16 sps:$4 sm:$0xff]   ;;  %v7761_v38 = vld [vmem:[%s11405_s1 + $0x50c] ss:$16 sps:$4 sm:$0xff]  }
  0x64   :  { %5056 = vmatprep.subr.bf16.mxu0 %v7665_v39  ;;  %5615 = vmatprep.subr.bf16.mxu1 %v7668_v40  ;;  %v7756_v39 = vld [vmem:[%s11405_s1 + $0x500] ss:$16 sps:$4 sm:$0xff]   ;;  %v7759_v40 = vld [vmem:[%s11405_s1 + $0x508] ss:$16 sps:$4 sm:$0xff]  }
  0x67   :  { %5057 = vmatpush1.bf16.msra.mxu0 %v7663_v41  ;;  %5616 = vmatpush1.bf16.msra.mxu1 %v7666_v42  ;;  %v7764_v41 = vld [vmem:[%s11405_s1 + $0x524] ss:$16 sps:$4 sm:$0xff]   ;;  %v7767_v42 = vld [vmem:[%s11405_s1 + $0x52c] ss:$16 sps:$4 sm:$0xff]  }
  0x68   :  { %5058 = vmatprep.subr.bf16.mxu0 %v7671_v43  ;;  %5617 = vmatprep.subr.bf16.mxu1 %v7674_v44  ;;  %v7762_v43 = vld [vmem:[%s11405_s1 + $0x520] ss:$16 sps:$4 sm:$0xff]   ;;  %v7765_v44 = vld [vmem:[%s11405_s1 + $0x528] ss:$16 sps:$4 sm:$0xff]  }
  0x6b   :  { %5059 = vmatpush1.bf16.msra.mxu0 %v7669_v45  ;;  %5618 = vmatpush1.bf16.msra.mxu1 %v7672_v46  ;;  %v7770_v45 = vld [vmem:[%s11405_s1 + $0x544] ss:$16 sps:$4 sm:$0xff]   ;;  %v7773_v46 = vld [vmem:[%s11405_s1 + $0x54c] ss:$16 sps:$4 sm:$0xff]  }
  0x6c   :  { %5060 = vmatprep.subr.bf16.mxu0 %v7677_v47  ;;  %5619 = vmatprep.subr.bf16.mxu1 %v7680_v48  ;;  %v7768_v47 = vld [vmem:[%s11405_s1 + $0x540] ss:$16 sps:$4 sm:$0xff]   ;;  %v7771_v48 = vld [vmem:[%s11405_s1 + $0x548] ss:$16 sps:$4 sm:$0xff]  }
  0x6f   :  { %5061 = vmatpush1.bf16.msra.mxu0 %v7675_v49  ;;  %5620 = vmatpush1.bf16.msra.mxu1 %v7678_v50  ;;  %v7776_v49 = vld [vmem:[%s11405_s1 + $0x564] ss:$16 sps:$4 sm:$0xff]   ;;  %v7779_v50 = vld [vmem:[%s11405_s1 + $0x56c] ss:$16 sps:$4 sm:$0xff]  }
  0x70   :  { %5062 = vmatprep.subr.bf16.mxu0 %v7683_v51  ;;  %5621 = vmatprep.subr.bf16.mxu1 %v7686_v52  ;;  %v7774_v51 = vld [vmem:[%s11405_s1 + $0x560] ss:$16 sps:$4 sm:$0xff]   ;;  %v7777_v52 = vld [vmem:[%s11405_s1 + $0x568] ss:$16 sps:$4 sm:$0xff]  }
  0x73   :  { %5063 = vmatpush1.bf16.msra.mxu0 %v7681_v53  ;;  %5622 = vmatpush1.bf16.msra.mxu1 %v7684_v54  ;;  %v7782_v53 = vld [vmem:[%s11405_s1 + $0x584] ss:$16 sps:$4 sm:$0xff]   ;;  %v7785_v54 = vld [vmem:[%s11405_s1 + $0x58c] ss:$16 sps:$4 sm:$0xff]  }
  0x74   :  { %5064 = vmatprep.subr.bf16.mxu0 %v7689_v55  ;;  %5623 = vmatprep.subr.bf16.mxu1 %v7692_v56  ;;  %v7780_v55 = vld [vmem:[%s11405_s1 + $0x580] ss:$16 sps:$4 sm:$0xff]   ;;  %v7783_v56 = vld [vmem:[%s11405_s1 + $0x588] ss:$16 sps:$4 sm:$0xff]  }
  0x77   :  { %5065 = vmatpush1.bf16.msra.mxu0 %v7687_v57  ;;  %5624 = vmatpush1.bf16.msra.mxu1 %v7690_v58  ;;  %v7788_v57 = vld [vmem:[%s11405_s1 + $0x5a4] ss:$16 sps:$4 sm:$0xff]   ;;  %v7791_v58 = vld [vmem:[%s11405_s1 + $0x5ac] ss:$16 sps:$4 sm:$0xff]  }
  0x78   :  { %5066 = vmatprep.subr.bf16.mxu0 %v7695_v59  ;;  %5625 = vmatprep.subr.bf16.mxu1 %v7698_v60  ;;  %v7786_v59 = vld [vmem:[%s11405_s1 + $0x5a0] ss:$16 sps:$4 sm:$0xff]   ;;  %v7789_v60 = vld [vmem:[%s11405_s1 + $0x5a8] ss:$16 sps:$4 sm:$0xff]  }
  0x7b   :  { %5067 = vmatpush1.bf16.msra.mxu0 %v7693_v61  ;;  %5626 = vmatpush1.bf16.msra.mxu1 %v7696_v62  ;;  %v7794_v61 = vld [vmem:[%s11405_s1 + $0x5c4] ss:$16 sps:$4 sm:$0xff]   ;;  %v7797_v62 = vld [vmem:[%s11405_s1 + $0x5cc] ss:$16 sps:$4 sm:$0xff]  }
  0x7c   :  { %5068 = vmatprep.subr.bf16.mxu0 %v7701_v63  ;;  %5627 = vmatprep.subr.bf16.mxu1 %v7704_v0  ;;  %v7792_v63 = vld [vmem:[%s11405_s1 + $0x5c0] ss:$16 sps:$4 sm:$0xff]   ;;  %v7795_v0 = vld [vmem:[%s11405_s1 + $0x5c8] ss:$16 sps:$4 sm:$0xff]  }
  0x7f   :  { %5069 = vmatpush1.bf16.msra.mxu0 %v7699_v1  ;;  %5628 = vmatpush1.bf16.msra.mxu1 %v7702_v2  ;;  %v7800_v1 = vld [vmem:[%s11405_s1 + $0x5e4] ss:$16 sps:$4 sm:$0xff]   ;;  %v7803_v2 = vld [vmem:[%s11405_s1 + $0x5ec] ss:$16 sps:$4 sm:$0xff]  }
  0x80   :  { %5081 = vmatprep.subr.bf16.mxu0 %v7710_v3  ;;  %5640 = vmatprep.subr.bf16.mxu1 %v7713_v4  ;;  %v7798_v3 = vld [vmem:[%s11405_s1 + $0x5e0] ss:$16 sps:$4 sm:$0xff]   ;;  %v7801_v4 = vld [vmem:[%s11405_s1 + $0x5e8] ss:$16 sps:$4 sm:$0xff]  }
  0x82   :  { %5071 = vmatmul.mubr.bf16.vlgmr.msra.gmra.mrb[0].mxu0 %v7705_v5  ;;  %5630 = vmatmul.mubr.bf16.vlgmr.msra.gmra.mrb[0].mxu1 %v7705_v5  ;;  %v7809_v5 = vld [vmem:[%s11405_s1 + $0x604] ss:$16 sps:$4 sm:$0xff]  }
  0x83   :  { %5082 = vmatpush1.bf16.msra.mxu0 %v7708_v6  ;;  %5641 = vmatpush1.bf16.msra.mxu1 %v7711_v7  ;;  %v7812_v6 = vld [vmem:[%s11405_s1 + $0x60c] ss:$16 sps:$4 sm:$0xff]   ;;  %v7804_v7 = vld [vmem:[%s11406_s0 + $0x10] ss:$100 sps:$4 sm:$0xff]  }
  0x84   :  { %5083 = vmatprep.subr.bf16.mxu0 %v7716_v8  ;;  %5642 = vmatprep.subr.bf16.mxu1 %v7719_v9  ;;  %v7807_v8 = vld [vmem:[%s11405_s1 + $0x600] ss:$16 sps:$4 sm:$0xff]   ;;  %v7810_v9 = vld [vmem:[%s11405_s1 + $0x608] ss:$16 sps:$4 sm:$0xff]  }
  0x85   :  { %5113 = vmatprep.mubr.bf16.mxu0 %v7806_v12  ;;  %5672 = vmatprep.mubr.bf16.mxu1 %v7806_v12  ;;  %v7905_v12 = vld [vmem:[%s11406_s0 + $0x1c] ss:$100 sps:$4 sm:$0xff]  }
  0x87   :  { %5084 = vmatpush1.bf16.msra.mxu0 %v7714_v10  ;;  %5643 = vmatpush1.bf16.msra.mxu1 %v7717_v11  ;;  %v7815_v10 = vld [vmem:[%s11405_s1 + $0x624] ss:$16 sps:$4 sm:$0xff]   ;;  %v7818_v11 = vld [vmem:[%s11405_s1 + $0x62c] ss:$16 sps:$4 sm:$0xff]  }
  0x88   :  { %5085 = vmatprep.subr.bf16.mxu0 %v7722_v13  ;;  %5644 = vmatprep.subr.bf16.mxu1 %v7725_v14  ;;  %v7813_v13 = vld [vmem:[%s11405_s1 + $0x620] ss:$16 sps:$4 sm:$0xff]   ;;  %v7816_v14 = vld [vmem:[%s11405_s1 + $0x628] ss:$16 sps:$4 sm:$0xff]  }
  0x8b   :  { %5086 = vmatpush1.bf16.msra.mxu0 %v7720_v15  ;;  %5645 = vmatpush1.bf16.msra.mxu1 %v7723_v16  ;;  %v7821_v15 = vld [vmem:[%s11405_s1 + $0x644] ss:$16 sps:$4 sm:$0xff]   ;;  %v7824_v16 = vld [vmem:[%s11405_s1 + $0x64c] ss:$16 sps:$4 sm:$0xff]  }
  0x8c   :  { %5087 = vmatprep.subr.bf16.mxu0 %v7728_v17  ;;  %5646 = vmatprep.subr.bf16.mxu1 %v7731_v18  ;;  %v7819_v17 = vld [vmem:[%s11405_s1 + $0x640] ss:$16 sps:$4 sm:$0xff]   ;;  %v7822_v18 = vld [vmem:[%s11405_s1 + $0x648] ss:$16 sps:$4 sm:$0xff]  }
  0x8f   :  { %5088 = vmatpush1.bf16.msra.mxu0 %v7726_v19  ;;  %5647 = vmatpush1.bf16.msra.mxu1 %v7729_v20  ;;  %v7827_v19 = vld [vmem:[%s11405_s1 + $0x664] ss:$16 sps:$4 sm:$0xff]   ;;  %v7830_v20 = vld [vmem:[%s11405_s1 + $0x66c] ss:$16 sps:$4 sm:$0xff]  }
  0x90   :  { %5089 = vmatprep.subr.bf16.mxu0 %v7734_v21  ;;  %5648 = vmatprep.subr.bf16.mxu1 %v7737_v22  ;;  %v7825_v21 = vld [vmem:[%s11405_s1 + $0x660] ss:$16 sps:$4 sm:$0xff]   ;;  %v7828_v22 = vld [vmem:[%s11405_s1 + $0x668] ss:$16 sps:$4 sm:$0xff]  }
  0x93   :  { %5090 = vmatpush1.bf16.msra.mxu0 %v7732_v23  ;;  %5649 = vmatpush1.bf16.msra.mxu1 %v7735_v24  ;;  %v7833_v23 = vld [vmem:[%s11405_s1 + $0x684] ss:$16 sps:$4 sm:$0xff]   ;;  %v7836_v24 = vld [vmem:[%s11405_s1 + $0x68c] ss:$16 sps:$4 sm:$0xff]  }
  0x94   :  { %5091 = vmatprep.subr.bf16.mxu0 %v7740_v25  ;;  %5650 = vmatprep.subr.bf16.mxu1 %v7743_v26  ;;  %v7831_v25 = vld [vmem:[%s11405_s1 + $0x680] ss:$16 sps:$4 sm:$0xff]   ;;  %v7834_v26 = vld [vmem:[%s11405_s1 + $0x688] ss:$16 sps:$4 sm:$0xff]  }
  0x97   :  { %5092 = vmatpush1.bf16.msra.mxu0 %v7738_v27  ;;  %5651 = vmatpush1.bf16.msra.mxu1 %v7741_v28  ;;  %v7839_v27 = vld [vmem:[%s11405_s1 + $0x6a4] ss:$16 sps:$4 sm:$0xff]   ;;  %v7842_v28 = vld [vmem:[%s11405_s1 + $0x6ac] ss:$16 sps:$4 sm:$0xff]  }
  0x98   :  { %5093 = vmatprep.subr.bf16.mxu0 %v7746_v29  ;;  %5652 = vmatprep.subr.bf16.mxu1 %v7749_v30  ;;  %v7837_v29 = vld [vmem:[%s11405_s1 + $0x6a0] ss:$16 sps:$4 sm:$0xff]   ;;  %v7840_v30 = vld [vmem:[%s11405_s1 + $0x6a8] ss:$16 sps:$4 sm:$0xff]  }
  0x9b   :  { %5094 = vmatpush1.bf16.msra.mxu0 %v7744_v31  ;;  %5653 = vmatpush1.bf16.msra.mxu1 %v7747_v32  ;;  %v7845_v31 = vld [vmem:[%s11405_s1 + $0x6c4] ss:$16 sps:$4 sm:$0xff]   ;;  %v7848_v32 = vld [vmem:[%s11405_s1 + $0x6cc] ss:$16 sps:$4 sm:$0xff]  }
  0x9c   :  { %5095 = vmatprep.subr.bf16.mxu0 %v7752_v33  ;;  %5654 = vmatprep.subr.bf16.mxu1 %v7755_v34  ;;  %v7843_v33 = vld [vmem:[%s11405_s1 + $0x6c0] ss:$16 sps:$4 sm:$0xff]   ;;  %v7846_v34 = vld [vmem:[%s11405_s1 + $0x6c8] ss:$16 sps:$4 sm:$0xff]  }
  0x9f   :  { %5096 = vmatpush1.bf16.msra.mxu0 %v7750_v35  ;;  %5655 = vmatpush1.bf16.msra.mxu1 %v7753_v36  ;;  %v7851_v35 = vld [vmem:[%s11405_s1 + $0x6e4] ss:$16 sps:$4 sm:$0xff]   ;;  %v7854_v36 = vld [vmem:[%s11405_s1 + $0x6ec] ss:$16 sps:$4 sm:$0xff]  }
  0xa0   :  { %5097 = vmatprep.subr.bf16.mxu0 %v7758_v37  ;;  %5656 = vmatprep.subr.bf16.mxu1 %v7761_v38  ;;  %v7849_v37 = vld [vmem:[%s11405_s1 + $0x6e0] ss:$16 sps:$4 sm:$0xff]   ;;  %v7852_v38 = vld [vmem:[%s11405_s1 + $0x6e8] ss:$16 sps:$4 sm:$0xff]  }
  0xa3   :  { %5098 = vmatpush1.bf16.msra.mxu0 %v7756_v39  ;;  %5657 = vmatpush1.bf16.msra.mxu1 %v7759_v40  ;;  %v7857_v39 = vld [vmem:[%s11405_s1 + $0x704] ss:$16 sps:$4 sm:$0xff]   ;;  %v7860_v40 = vld [vmem:[%s11405_s1 + $0x70c] ss:$16 sps:$4 sm:$0xff]  }
  0xa4   :  { %5099 = vmatprep.subr.bf16.mxu0 %v7764_v41  ;;  %5658 = vmatprep.subr.bf16.mxu1 %v7767_v42  ;;  %v7855_v41 = vld [vmem:[%s11405_s1 + $0x700] ss:$16 sps:$4 sm:$0xff]   ;;  %v7858_v42 = vld [vmem:[%s11405_s1 + $0x708] ss:$16 sps:$4 sm:$0xff]  }
  0xa7   :  { %5100 = vmatpush1.bf16.msra.mxu0 %v7762_v43  ;;  %5659 = vmatpush1.bf16.msra.mxu1 %v7765_v44  ;;  %v7863_v43 = vld [vmem:[%s11405_s1 + $0x724] ss:$16 sps:$4 sm:$0xff]   ;;  %v7866_v44 = vld [vmem:[%s11405_s1 + $0x72c] ss:$16 sps:$4 sm:$0xff]  }
  0xa8   :  { %5101 = vmatprep.subr.bf16.mxu0 %v7770_v45  ;;  %5660 = vmatprep.subr.bf16.mxu1 %v7773_v46  ;;  %v7861_v45 = vld [vmem:[%s11405_s1 + $0x720] ss:$16 sps:$4 sm:$0xff]   ;;  %v7864_v46 = vld [vmem:[%s11405_s1 + $0x728] ss:$16 sps:$4 sm:$0xff]  }
  0xab   :  { %5102 = vmatpush1.bf16.msra.mxu0 %v7768_v47  ;;  %5661 = vmatpush1.bf16.msra.mxu1 %v7771_v48  ;;  %v7869_v47 = vld [vmem:[%s11405_s1 + $0x744] ss:$16 sps:$4 sm:$0xff]   ;;  %v7872_v48 = vld [vmem:[%s11405_s1 + $0x74c] ss:$16 sps:$4 sm:$0xff]  }
  0xac   :  { %5103 = vmatprep.subr.bf16.mxu0 %v7776_v49  ;;  %5662 = vmatprep.subr.bf16.mxu1 %v7779_v50  ;;  %v7867_v49 = vld [vmem:[%s11405_s1 + $0x740] ss:$16 sps:$4 sm:$0xff]   ;;  %v7870_v50 = vld [vmem:[%s11405_s1 + $0x748] ss:$16 sps:$4 sm:$0xff]  }
  0xaf   :  { %5104 = vmatpush1.bf16.msra.mxu0 %v7774_v51  ;;  %5663 = vmatpush1.bf16.msra.mxu1 %v7777_v52  ;;  %v7875_v51 = vld [vmem:[%s11405_s1 + $0x764] ss:$16 sps:$4 sm:$0xff]   ;;  %v7878_v52 = vld [vmem:[%s11405_s1 + $0x76c] ss:$16 sps:$4 sm:$0xff]  }
  0xb0   :  { %5105 = vmatprep.subr.bf16.mxu0 %v7782_v53  ;;  %5664 = vmatprep.subr.bf16.mxu1 %v7785_v54  ;;  %v7873_v53 = vld [vmem:[%s11405_s1 + $0x760] ss:$16 sps:$4 sm:$0xff]   ;;  %v7876_v54 = vld [vmem:[%s11405_s1 + $0x768] ss:$16 sps:$4 sm:$0xff]  }
  0xb3   :  { %5106 = vmatpush1.bf16.msra.mxu0 %v7780_v55  ;;  %5665 = vmatpush1.bf16.msra.mxu1 %v7783_v56  ;;  %v7881_v55 = vld [vmem:[%s11405_s1 + $0x784] ss:$16 sps:$4 sm:$0xff]   ;;  %v7884_v56 = vld [vmem:[%s11405_s1 + $0x78c] ss:$16 sps:$4 sm:$0xff]  }
  0xb4   :  { %5107 = vmatprep.subr.bf16.mxu0 %v7788_v57  ;;  %5666 = vmatprep.subr.bf16.mxu1 %v7791_v58  ;;  %v7879_v57 = vld [vmem:[%s11405_s1 + $0x780] ss:$16 sps:$4 sm:$0xff]   ;;  %v7882_v58 = vld [vmem:[%s11405_s1 + $0x788] ss:$16 sps:$4 sm:$0xff]  }
  0xb7   :  { %5108 = vmatpush1.bf16.msra.mxu0 %v7786_v59  ;;  %5667 = vmatpush1.bf16.msra.mxu1 %v7789_v60  ;;  %v7887_v59 = vld [vmem:[%s11405_s1 + $0x7a4] ss:$16 sps:$4 sm:$0xff]   ;;  %v7890_v60 = vld [vmem:[%s11405_s1 + $0x7ac] ss:$16 sps:$4 sm:$0xff]  }
  0xb8   :  { %5109 = vmatprep.subr.bf16.mxu0 %v7794_v61  ;;  %5668 = vmatprep.subr.bf16.mxu1 %v7797_v62  ;;  %v7885_v61 = vld [vmem:[%s11405_s1 + $0x7a0] ss:$16 sps:$4 sm:$0xff]   ;;  %v7888_v62 = vld [vmem:[%s11405_s1 + $0x7a8] ss:$16 sps:$4 sm:$0xff]  }
  0xbb   :  { %5110 = vmatpush1.bf16.msra.mxu0 %v7792_v63  ;;  %5669 = vmatpush1.bf16.msra.mxu1 %v7795_v0  ;;  %v7893_v63 = vld [vmem:[%s11405_s1 + $0x7c4] ss:$16 sps:$4 sm:$0xff]   ;;  %v7896_v0 = vld [vmem:[%s11405_s1 + $0x7cc] ss:$16 sps:$4 sm:$0xff]  }
  0xbc   :  { %5111 = vmatprep.subr.bf16.mxu0 %v7800_v1  ;;  %5670 = vmatprep.subr.bf16.mxu1 %v7803_v2  ;;  %v7891_v1 = vld [vmem:[%s11405_s1 + $0x7c0] ss:$16 sps:$4 sm:$0xff]   ;;  %v7894_v2 = vld [vmem:[%s11405_s1 + $0x7c8] ss:$16 sps:$4 sm:$0xff]  }
  0xbf   :  { %5112 = vmatpush1.bf16.msra.mxu0 %v7798_v3  ;;  %5671 = vmatpush1.bf16.msra.mxu1 %v7801_v4  ;;  %v7899_v3 = vld [vmem:[%s11405_s1 + $0x7e4] ss:$16 sps:$4 sm:$0xff]   ;;  %v7902_v4 = vld [vmem:[%s11405_s1 + $0x7ec] ss:$16 sps:$4 sm:$0xff]  }
  0xc0   :  { %5124 = vmatprep.subr.bf16.mxu0 %v7809_v5  ;;  %5683 = vmatprep.subr.bf16.mxu1 %v7812_v6  ;;  %v7897_v5 = vld [vmem:[%s11405_s1 + $0x7e0] ss:$16 sps:$4 sm:$0xff]   ;;  %v7900_v6 = vld [vmem:[%s11405_s1 + $0x7e8] ss:$16 sps:$4 sm:$0xff]  }
  0xc2   :  { %5114 = vmatmul.mubr.bf16.vlgmr.msra.gmra.mrb[0].mxu0 %v7804_v7  ;;  %5673 = vmatmul.mubr.bf16.vlgmr.msra.gmra.mrb[0].mxu1 %v7804_v7  ;;  %v7908_v7 = vld [vmem:[%s11405_s1 + $0x804] ss:$16 sps:$4 sm:$0xff]  }
  0xc3   :  { %5125 = vmatpush1.bf16.msra.mxu0 %v7807_v8  ;;  %5684 = vmatpush1.bf16.msra.mxu1 %v7810_v9  ;;  %v7911_v8 = vld [vmem:[%s11405_s1 + $0x80c] ss:$16 sps:$4 sm:$0xff]  }
  0xc4   :  { %5126 = vmatprep.subr.bf16.mxu0 %v7815_v10  ;;  %5685 = vmatprep.subr.bf16.mxu1 %v7818_v11  ;;  %v7903_v9 = vld [vmem:[%s11406_s0 + $0x18] ss:$100 sps:$4 sm:$0xff]   ;;  %v7906_v10 = vld [vmem:[%s11405_s1 + $0x800] ss:$16 sps:$4 sm:$0xff]  }
  0xc5   :  { %5156 = vmatprep.mubr.bf16.mxu0 %v7905_v12  ;;  %5715 = vmatprep.mubr.bf16.mxu1 %v7905_v12  ;;  %v7909_v11 = vld [vmem:[%s11405_s1 + $0x808] ss:$16 sps:$4 sm:$0xff]   ;;  %v7914_v12 = vld [vmem:[%s11405_s1 + $0x824] ss:$16 sps:$4 sm:$0xff]  }
  0xc7   :  { %5127 = vmatpush1.bf16.msra.mxu0 %v7813_v13  ;;  %5686 = vmatpush1.bf16.msra.mxu1 %v7816_v14  ;;  %v7917_v13 = vld [vmem:[%s11405_s1 + $0x82c] ss:$16 sps:$4 sm:$0xff]   ;;  %v8004_v14 = vld [vmem:[%s11406_s0 + $0x24] ss:$100 sps:$4 sm:$0xff]  }
  0xc8   :  { %5128 = vmatprep.subr.bf16.mxu0 %v7821_v15  ;;  %5687 = vmatprep.subr.bf16.mxu1 %v7824_v16  ;;  %v7912_v15 = vld [vmem:[%s11405_s1 + $0x820] ss:$16 sps:$4 sm:$0xff]   ;;  %v7915_v16 = vld [vmem:[%s11405_s1 + $0x828] ss:$16 sps:$4 sm:$0xff]  }
  0xcb   :  { %5129 = vmatpush1.bf16.msra.mxu0 %v7819_v17  ;;  %5688 = vmatpush1.bf16.msra.mxu1 %v7822_v18  ;;  %v7920_v17 = vld [vmem:[%s11405_s1 + $0x844] ss:$16 sps:$4 sm:$0xff]   ;;  %v7923_v18 = vld [vmem:[%s11405_s1 + $0x84c] ss:$16 sps:$4 sm:$0xff]  }
  0xcc   :  { %5130 = vmatprep.subr.bf16.mxu0 %v7827_v19  ;;  %5689 = vmatprep.subr.bf16.mxu1 %v7830_v20  ;;  %v7918_v19 = vld [vmem:[%s11405_s1 + $0x840] ss:$16 sps:$4 sm:$0xff]   ;;  %v7921_v20 = vld [vmem:[%s11405_s1 + $0x848] ss:$16 sps:$4 sm:$0xff]  }
  0xcf   :  { %5131 = vmatpush1.bf16.msra.mxu0 %v7825_v21  ;;  %5690 = vmatpush1.bf16.msra.mxu1 %v7828_v22  ;;  %v7926_v21 = vld [vmem:[%s11405_s1 + $0x864] ss:$16 sps:$4 sm:$0xff]   ;;  %v7929_v22 = vld [vmem:[%s11405_s1 + $0x86c] ss:$16 sps:$4 sm:$0xff]  }
  0xd0   :  { %5132 = vmatprep.subr.bf16.mxu0 %v7833_v23  ;;  %5691 = vmatprep.subr.bf16.mxu1 %v7836_v24  ;;  %v7924_v23 = vld [vmem:[%s11405_s1 + $0x860] ss:$16 sps:$4 sm:$0xff]   ;;  %v7927_v24 = vld [vmem:[%s11405_s1 + $0x868] ss:$16 sps:$4 sm:$0xff]  }
  0xd3   :  { %5133 = vmatpush1.bf16.msra.mxu0 %v7831_v25  ;;  %5692 = vmatpush1.bf16.msra.mxu1 %v7834_v26  ;;  %v7932_v25 = vld [vmem:[%s11405_s1 + $0x884] ss:$16 sps:$4 sm:$0xff]   ;;  %v7935_v26 = vld [vmem:[%s11405_s1 + $0x88c] ss:$16 sps:$4 sm:$0xff]  }
  0xd4   :  { %5134 = vmatprep.subr.bf16.mxu0 %v7839_v27  ;;  %5693 = vmatprep.subr.bf16.mxu1 %v7842_v28  ;;  %v7930_v27 = vld [vmem:[%s11405_s1 + $0x880] ss:$16 sps:$4 sm:$0xff]   ;;  %v7933_v28 = vld [vmem:[%s11405_s1 + $0x888] ss:$16 sps:$4 sm:$0xff]  }
  0xd7   :  { %5135 = vmatpush1.bf16.msra.mxu0 %v7837_v29  ;;  %5694 = vmatpush1.bf16.msra.mxu1 %v7840_v30  ;;  %v7938_v29 = vld [vmem:[%s11405_s1 + $0x8a4] ss:$16 sps:$4 sm:$0xff]   ;;  %v7941_v30 = vld [vmem:[%s11405_s1 + $0x8ac] ss:$16 sps:$4 sm:$0xff]  }
  0xd8   :  { %5136 = vmatprep.subr.bf16.mxu0 %v7845_v31  ;;  %5695 = vmatprep.subr.bf16.mxu1 %v7848_v32  ;;  %v7936_v31 = vld [vmem:[%s11405_s1 + $0x8a0] ss:$16 sps:$4 sm:$0xff]   ;;  %v7939_v32 = vld [vmem:[%s11405_s1 + $0x8a8] ss:$16 sps:$4 sm:$0xff]  }
  0xdb   :  { %5137 = vmatpush1.bf16.msra.mxu0 %v7843_v33  ;;  %5696 = vmatpush1.bf16.msra.mxu1 %v7846_v34  ;;  %v7944_v33 = vld [vmem:[%s11405_s1 + $0x8c4] ss:$16 sps:$4 sm:$0xff]   ;;  %v7947_v34 = vld [vmem:[%s11405_s1 + $0x8cc] ss:$16 sps:$4 sm:$0xff]  }
  0xdc   :  { %5138 = vmatprep.subr.bf16.mxu0 %v7851_v35  ;;  %5697 = vmatprep.subr.bf16.mxu1 %v7854_v36  ;;  %v7942_v35 = vld [vmem:[%s11405_s1 + $0x8c0] ss:$16 sps:$4 sm:$0xff]   ;;  %v7945_v36 = vld [vmem:[%s11405_s1 + $0x8c8] ss:$16 sps:$4 sm:$0xff]  }
  0xdf   :  { %5139 = vmatpush1.bf16.msra.mxu0 %v7849_v37  ;;  %5698 = vmatpush1.bf16.msra.mxu1 %v7852_v38  ;;  %v7950_v37 = vld [vmem:[%s11405_s1 + $0x8e4] ss:$16 sps:$4 sm:$0xff]   ;;  %v7953_v38 = vld [vmem:[%s11405_s1 + $0x8ec] ss:$16 sps:$4 sm:$0xff]  }
  0xe0   :  { %5140 = vmatprep.subr.bf16.mxu0 %v7857_v39  ;;  %5699 = vmatprep.subr.bf16.mxu1 %v7860_v40  ;;  %v7948_v39 = vld [vmem:[%s11405_s1 + $0x8e0] ss:$16 sps:$4 sm:$0xff]   ;;  %v7951_v40 = vld [vmem:[%s11405_s1 + $0x8e8] ss:$16 sps:$4 sm:$0xff]  }
  0xe3   :  { %5141 = vmatpush1.bf16.msra.mxu0 %v7855_v41  ;;  %5700 = vmatpush1.bf16.msra.mxu1 %v7858_v42  ;;  %v7956_v41 = vld [vmem:[%s11405_s1 + $0x904] ss:$16 sps:$4 sm:$0xff]   ;;  %v7959_v42 = vld [vmem:[%s11405_s1 + $0x90c] ss:$16 sps:$4 sm:$0xff]  }
  0xe4   :  { %5142 = vmatprep.subr.bf16.mxu0 %v7863_v43  ;;  %5701 = vmatprep.subr.bf16.mxu1 %v7866_v44  ;;  %v7954_v43 = vld [vmem:[%s11405_s1 + $0x900] ss:$16 sps:$4 sm:$0xff]   ;;  %v7957_v44 = vld [vmem:[%s11405_s1 + $0x908] ss:$16 sps:$4 sm:$0xff]  }
  0xe7   :  { %5143 = vmatpush1.bf16.msra.mxu0 %v7861_v45  ;;  %5702 = vmatpush1.bf16.msra.mxu1 %v7864_v46  ;;  %v7962_v45 = vld [vmem:[%s11405_s1 + $0x924] ss:$16 sps:$4 sm:$0xff]   ;;  %v7965_v46 = vld [vmem:[%s11405_s1 + $0x92c] ss:$16 sps:$4 sm:$0xff]  }
  0xe8   :  { %5144 = vmatprep.subr.bf16.mxu0 %v7869_v47  ;;  %5703 = vmatprep.subr.bf16.mxu1 %v7872_v48  ;;  %v7960_v47 = vld [vmem:[%s11405_s1 + $0x920] ss:$16 sps:$4 sm:$0xff]   ;;  %v7963_v48 = vld [vmem:[%s11405_s1 + $0x928] ss:$16 sps:$4 sm:$0xff]  }
  0xeb   :  { %5145 = vmatpush1.bf16.msra.mxu0 %v7867_v49  ;;  %5704 = vmatpush1.bf16.msra.mxu1 %v7870_v50  ;;  %v7968_v49 = vld [vmem:[%s11405_s1 + $0x944] ss:$16 sps:$4 sm:$0xff]   ;;  %v7971_v50 = vld [vmem:[%s11405_s1 + $0x94c] ss:$16 sps:$4 sm:$0xff]  }
  0xec   :  { %5146 = vmatprep.subr.bf16.mxu0 %v7875_v51  ;;  %5705 = vmatprep.subr.bf16.mxu1 %v7878_v52  ;;  %v7966_v51 = vld [vmem:[%s11405_s1 + $0x940] ss:$16 sps:$4 sm:$0xff]   ;;  %v7969_v52 = vld [vmem:[%s11405_s1 + $0x948] ss:$16 sps:$4 sm:$0xff]  }
  0xef   :  { %5147 = vmatpush1.bf16.msra.mxu0 %v7873_v53  ;;  %5706 = vmatpush1.bf16.msra.mxu1 %v7876_v54  ;;  %v7974_v53 = vld [vmem:[%s11405_s1 + $0x964] ss:$16 sps:$4 sm:$0xff]   ;;  %v7977_v54 = vld [vmem:[%s11405_s1 + $0x96c] ss:$16 sps:$4 sm:$0xff]  }
  0xf0   :  { %5148 = vmatprep.subr.bf16.mxu0 %v7881_v55  ;;  %5707 = vmatprep.subr.bf16.mxu1 %v7884_v56  ;;  %v7972_v55 = vld [vmem:[%s11405_s1 + $0x960] ss:$16 sps:$4 sm:$0xff]   ;;  %v7975_v56 = vld [vmem:[%s11405_s1 + $0x968] ss:$16 sps:$4 sm:$0xff]  }
  0xf3   :  { %5149 = vmatpush1.bf16.msra.mxu0 %v7879_v57  ;;  %5708 = vmatpush1.bf16.msra.mxu1 %v7882_v58  ;;  %v7980_v57 = vld [vmem:[%s11405_s1 + $0x984] ss:$16 sps:$4 sm:$0xff]   ;;  %v7983_v58 = vld [vmem:[%s11405_s1 + $0x98c] ss:$16 sps:$4 sm:$0xff]  }
  0xf4   :  { %5150 = vmatprep.subr.bf16.mxu0 %v7887_v59  ;;  %5709 = vmatprep.subr.bf16.mxu1 %v7890_v60  ;;  %v7978_v59 = vld [vmem:[%s11405_s1 + $0x980] ss:$16 sps:$4 sm:$0xff]   ;;  %v7981_v60 = vld [vmem:[%s11405_s1 + $0x988] ss:$16 sps:$4 sm:$0xff]  }
  0xf7   :  { %5151 = vmatpush1.bf16.msra.mxu0 %v7885_v61  ;;  %5710 = vmatpush1.bf16.msra.mxu1 %v7888_v62  ;;  %v7986_v61 = vld [vmem:[%s11405_s1 + $0x9a4] ss:$16 sps:$4 sm:$0xff]   ;;  %v7989_v62 = vld [vmem:[%s11405_s1 + $0x9ac] ss:$16 sps:$4 sm:$0xff]  }
  0xf8   :  { %5152 = vmatprep.subr.bf16.mxu0 %v7893_v63  ;;  %5711 = vmatprep.subr.bf16.mxu1 %v7896_v0  ;;  %v7984_v63 = vld [vmem:[%s11405_s1 + $0x9a0] ss:$16 sps:$4 sm:$0xff]   ;;  %v7987_v0 = vld [vmem:[%s11405_s1 + $0x9a8] ss:$16 sps:$4 sm:$0xff]  }
  0xfb   :  { %5153 = vmatpush1.bf16.msra.mxu0 %v7891_v1  ;;  %5712 = vmatpush1.bf16.msra.mxu1 %v7894_v2  ;;  %v7992_v1 = vld [vmem:[%s11405_s1 + $0x9c4] ss:$16 sps:$4 sm:$0xff]   ;;  %v7995_v2 = vld [vmem:[%s11405_s1 + $0x9cc] ss:$16 sps:$4 sm:$0xff]  }
  0xfc   :  { %5154 = vmatprep.subr.bf16.mxu0 %v7899_v3  ;;  %5713 = vmatprep.subr.bf16.mxu1 %v7902_v4  ;;  %v7990_v3 = vld [vmem:[%s11405_s1 + $0x9c0] ss:$16 sps:$4 sm:$0xff]   ;;  %v7993_v4 = vld [vmem:[%s11405_s1 + $0x9c8] ss:$16 sps:$4 sm:$0xff]  }
  0xff   :  { %5155 = vmatpush1.bf16.msra.mxu0 %v7897_v5  ;;  %5714 = vmatpush1.bf16.msra.mxu1 %v7900_v6  ;;  %v7998_v5 = vld [vmem:[%s11405_s1 + $0x9e4] ss:$16 sps:$4 sm:$0xff]   ;;  %v8001_v6 = vld [vmem:[%s11405_s1 + $0x9ec] ss:$16 sps:$4 sm:$0xff]  }
 0x100   :  { %5167 = vmatprep.subr.bf16.mxu0 %v7908_v7  ;;  %5726 = vmatprep.subr.bf16.mxu1 %v7911_v8  ;;  %v7996_v7 = vld [vmem:[%s11405_s1 + $0x9e0] ss:$16 sps:$4 sm:$0xff]   ;;  %v7999_v8 = vld [vmem:[%s11405_s1 + $0x9e8] ss:$16 sps:$4 sm:$0xff]  }
 0x102   :  { %5157 = vmatmul.mubr.bf16.vlgmr.msra.gmra.mrb[0].mxu0 %v7903_v9  ;;  %5716 = vmatmul.mubr.bf16.vlgmr.msra.gmra.mrb[0].mxu1 %v7903_v9  ;;  %v8002_v9 = vld [vmem:[%s11406_s0 + $0x20] ss:$100 sps:$4 sm:$0xff]  }
 0x103   :  { %5168 = vmatpush1.bf16.msra.mxu0 %v7906_v10  ;;  %5727 = vmatpush1.bf16.msra.mxu1 %v7909_v11  ;;  %v8007_v10 = vld [vmem:[%s11405_s1 + $0xa04] ss:$16 sps:$4 sm:$0xff]   ;;  %v8010_v11 = vld [vmem:[%s11405_s1 + $0xa0c] ss:$16 sps:$4 sm:$0xff]  }
 0x104   :  { %5169 = vmatprep.subr.bf16.mxu0 %v7914_v12  ;;  %5728 = vmatprep.subr.bf16.mxu1 %v7917_v13  ;;  %v8005_v12 = vld [vmem:[%s11405_s1 + $0xa00] ss:$16 sps:$4 sm:$0xff]   ;;  %v8008_v13 = vld [vmem:[%s11405_s1 + $0xa08] ss:$16 sps:$4 sm:$0xff]  }
 0x105   :  { %5199 = vmatprep.mubr.bf16.mxu0 %v8004_v14  ;;  %5758 = vmatprep.mubr.bf16.mxu1 %v8004_v14  ;;  %v8013_v14 = vld [vmem:[%s11405_s1 + $0xa24] ss:$16 sps:$4 sm:$0xff]  }
 0x107   :  { %5170 = vmatpush1.bf16.msra.mxu0 %v7912_v15  ;;  %5729 = vmatpush1.bf16.msra.mxu1 %v7915_v16  ;;  %v8016_v15 = vld [vmem:[%s11405_s1 + $0xa2c] ss:$16 sps:$4 sm:$0xff]  }
 0x108   :  { %5171 = vmatprep.subr.bf16.mxu0 %v7920_v17  ;;  %5730 = vmatprep.subr.bf16.mxu1 %v7923_v18  ;;  %v8103_v16 = vld [vmem:[%s11406_s0 + $0x2c] ss:$100 sps:$4 sm:$0xff]   ;;  %v8014_v18 = vld [vmem:[%s11405_s1 + $0xa28] ss:$16 sps:$4 sm:$0xff]  }
 0x109   :  { %v8011_v17 = vld [vmem:[%s11405_s1 + $0xa20] ss:$16 sps:$4 sm:$0xff]  }
 0x10b   :  { %5172 = vmatpush1.bf16.msra.mxu0 %v7918_v19  ;;  %5731 = vmatpush1.bf16.msra.mxu1 %v7921_v20  ;;  %v8019_v19 = vld [vmem:[%s11405_s1 + $0xa44] ss:$16 sps:$4 sm:$0xff]   ;;  %v8022_v20 = vld [vmem:[%s11405_s1 + $0xa4c] ss:$16 sps:$4 sm:$0xff]  }
 0x10c   :  { %5173 = vmatprep.subr.bf16.mxu0 %v7926_v21  ;;  %5732 = vmatprep.subr.bf16.mxu1 %v7929_v22  ;;  %v8017_v21 = vld [vmem:[%s11405_s1 + $0xa40] ss:$16 sps:$4 sm:$0xff]   ;;  %v8020_v22 = vld [vmem:[%s11405_s1 + $0xa48] ss:$16 sps:$4 sm:$0xff]  }
 0x10f   :  { %5174 = vmatpush1.bf16.msra.mxu0 %v7924_v23  ;;  %5733 = vmatpush1.bf16.msra.mxu1 %v7927_v24  ;;  %v8025_v23 = vld [vmem:[%s11405_s1 + $0xa64] ss:$16 sps:$4 sm:$0xff]   ;;  %v8028_v24 = vld [vmem:[%s11405_s1 + $0xa6c] ss:$16 sps:$4 sm:$0xff]  }
 0x110   :  { %5175 = vmatprep.subr.bf16.mxu0 %v7932_v25  ;;  %5734 = vmatprep.subr.bf16.mxu1 %v7935_v26  ;;  %v8023_v25 = vld [vmem:[%s11405_s1 + $0xa60] ss:$16 sps:$4 sm:$0xff]   ;;  %v8026_v26 = vld [vmem:[%s11405_s1 + $0xa68] ss:$16 sps:$4 sm:$0xff]  }
 0x113   :  { %5176 = vmatpush1.bf16.msra.mxu0 %v7930_v27  ;;  %5735 = vmatpush1.bf16.msra.mxu1 %v7933_v28  ;;  %v8031_v27 = vld [vmem:[%s11405_s1 + $0xa84] ss:$16 sps:$4 sm:$0xff]   ;;  %v8034_v28 = vld [vmem:[%s11405_s1 + $0xa8c] ss:$16 sps:$4 sm:$0xff]  }
 0x114   :  { %5177 = vmatprep.subr.bf16.mxu0 %v7938_v29  ;;  %5736 = vmatprep.subr.bf16.mxu1 %v7941_v30  ;;  %v8029_v29 = vld [vmem:[%s11405_s1 + $0xa80] ss:$16 sps:$4 sm:$0xff]   ;;  %v8032_v30 = vld [vmem:[%s11405_s1 + $0xa88] ss:$16 sps:$4 sm:$0xff]  }
 0x117   :  { %5178 = vmatpush1.bf16.msra.mxu0 %v7936_v31  ;;  %5737 = vmatpush1.bf16.msra.mxu1 %v7939_v32  ;;  %v8037_v31 = vld [vmem:[%s11405_s1 + $0xaa4] ss:$16 sps:$4 sm:$0xff]   ;;  %v8040_v32 = vld [vmem:[%s11405_s1 + $0xaac] ss:$16 sps:$4 sm:$0xff]  }
 0x118   :  { %5179 = vmatprep.subr.bf16.mxu0 %v7944_v33  ;;  %5738 = vmatprep.subr.bf16.mxu1 %v7947_v34  ;;  %v8035_v33 = vld [vmem:[%s11405_s1 + $0xaa0] ss:$16 sps:$4 sm:$0xff]   ;;  %v8038_v34 = vld [vmem:[%s11405_s1 + $0xaa8] ss:$16 sps:$4 sm:$0xff]  }
 0x11b   :  { %5180 = vmatpush1.bf16.msra.mxu0 %v7942_v35  ;;  %5739 = vmatpush1.bf16.msra.mxu1 %v7945_v36  ;;  %v8043_v35 = vld [vmem:[%s11405_s1 + $0xac4] ss:$16 sps:$4 sm:$0xff]   ;;  %v8046_v36 = vld [vmem:[%s11405_s1 + $0xacc] ss:$16 sps:$4 sm:$0xff]  }
 0x11c   :  { %5181 = vmatprep.subr.bf16.mxu0 %v7950_v37  ;;  %5740 = vmatprep.subr.bf16.mxu1 %v7953_v38  ;;  %v8041_v37 = vld [vmem:[%s11405_s1 + $0xac0] ss:$16 sps:$4 sm:$0xff]   ;;  %v8044_v38 = vld [vmem:[%s11405_s1 + $0xac8] ss:$16 sps:$4 sm:$0xff]  }
 0x11f   :  { %5182 = vmatpush1.bf16.msra.mxu0 %v7948_v39  ;;  %5741 = vmatpush1.bf16.msra.mxu1 %v7951_v40  ;;  %v8049_v39 = vld [vmem:[%s11405_s1 + $0xae4] ss:$16 sps:$4 sm:$0xff]   ;;  %v8052_v40 = vld [vmem:[%s11405_s1 + $0xaec] ss:$16 sps:$4 sm:$0xff]  }
 0x120   :  { %5183 = vmatprep.subr.bf16.mxu0 %v7956_v41  ;;  %5742 = vmatprep.subr.bf16.mxu1 %v7959_v42  ;;  %v8047_v41 = vld [vmem:[%s11405_s1 + $0xae0] ss:$16 sps:$4 sm:$0xff]   ;;  %v8050_v42 = vld [vmem:[%s11405_s1 + $0xae8] ss:$16 sps:$4 sm:$0xff]  }
 0x123   :  { %5184 = vmatpush1.bf16.msra.mxu0 %v7954_v43  ;;  %5743 = vmatpush1.bf16.msra.mxu1 %v7957_v44  ;;  %v8055_v43 = vld [vmem:[%s11405_s1 + $0xb04] ss:$16 sps:$4 sm:$0xff]   ;;  %v8058_v44 = vld [vmem:[%s11405_s1 + $0xb0c] ss:$16 sps:$4 sm:$0xff]  }
 0x124   :  { %5185 = vmatprep.subr.bf16.mxu0 %v7962_v45  ;;  %5744 = vmatprep.subr.bf16.mxu1 %v7965_v46  ;;  %v8053_v45 = vld [vmem:[%s11405_s1 + $0xb00] ss:$16 sps:$4 sm:$0xff]   ;;  %v8056_v46 = vld [vmem:[%s11405_s1 + $0xb08] ss:$16 sps:$4 sm:$0xff]  }
 0x127   :  { %5186 = vmatpush1.bf16.msra.mxu0 %v7960_v47  ;;  %5745 = vmatpush1.bf16.msra.mxu1 %v7963_v48  ;;  %v8061_v47 = vld [vmem:[%s11405_s1 + $0xb24] ss:$16 sps:$4 sm:$0xff]   ;;  %v8064_v48 = vld [vmem:[%s11405_s1 + $0xb2c] ss:$16 sps:$4 sm:$0xff]  }
 0x128   :  { %5187 = vmatprep.subr.bf16.mxu0 %v7968_v49  ;;  %5746 = vmatprep.subr.bf16.mxu1 %v7971_v50  ;;  %v8059_v49 = vld [vmem:[%s11405_s1 + $0xb20] ss:$16 sps:$4 sm:$0xff]   ;;  %v8062_v50 = vld [vmem:[%s11405_s1 + $0xb28] ss:$16 sps:$4 sm:$0xff]  }
 0x12b   :  { %5188 = vmatpush1.bf16.msra.mxu0 %v7966_v51  ;;  %5747 = vmatpush1.bf16.msra.mxu1 %v7969_v52  ;;  %v8067_v51 = vld [vmem:[%s11405_s1 + $0xb44] ss:$16 sps:$4 sm:$0xff]   ;;  %v8070_v52 = vld [vmem:[%s11405_s1 + $0xb4c] ss:$16 sps:$4 sm:$0xff]  }
 0x12c   :  { %5189 = vmatprep.subr.bf16.mxu0 %v7974_v53  ;;  %5748 = vmatprep.subr.bf16.mxu1 %v7977_v54  ;;  %v8065_v53 = vld [vmem:[%s11405_s1 + $0xb40] ss:$16 sps:$4 sm:$0xff]   ;;  %v8068_v54 = vld [vmem:[%s11405_s1 + $0xb48] ss:$16 sps:$4 sm:$0xff]  }
 0x12f   :  { %5190 = vmatpush1.bf16.msra.mxu0 %v7972_v55  ;;  %5749 = vmatpush1.bf16.msra.mxu1 %v7975_v56  ;;  %v8073_v55 = vld [vmem:[%s11405_s1 + $0xb64] ss:$16 sps:$4 sm:$0xff]   ;;  %v8076_v56 = vld [vmem:[%s11405_s1 + $0xb6c] ss:$16 sps:$4 sm:$0xff]  }
 0x130   :  { %5191 = vmatprep.subr.bf16.mxu0 %v7980_v57  ;;  %5750 = vmatprep.subr.bf16.mxu1 %v7983_v58  ;;  %v8071_v57 = vld [vmem:[%s11405_s1 + $0xb60] ss:$16 sps:$4 sm:$0xff]   ;;  %v8074_v58 = vld [vmem:[%s11405_s1 + $0xb68] ss:$16 sps:$4 sm:$0xff]  }
 0x133   :  { %5192 = vmatpush1.bf16.msra.mxu0 %v7978_v59  ;;  %5751 = vmatpush1.bf16.msra.mxu1 %v7981_v60  ;;  %v8079_v59 = vld [vmem:[%s11405_s1 + $0xb84] ss:$16 sps:$4 sm:$0xff]   ;;  %v8082_v60 = vld [vmem:[%s11405_s1 + $0xb8c] ss:$16 sps:$4 sm:$0xff]  }
 0x134   :  { %5193 = vmatprep.subr.bf16.mxu0 %v7986_v61  ;;  %5752 = vmatprep.subr.bf16.mxu1 %v7989_v62  ;;  %v8077_v61 = vld [vmem:[%s11405_s1 + $0xb80] ss:$16 sps:$4 sm:$0xff]   ;;  %v8080_v62 = vld [vmem:[%s11405_s1 + $0xb88] ss:$16 sps:$4 sm:$0xff]  }
 0x137   :  { %5194 = vmatpush1.bf16.msra.mxu0 %v7984_v63  ;;  %5753 = vmatpush1.bf16.msra.mxu1 %v7987_v0  ;;  %v8085_v63 = vld [vmem:[%s11405_s1 + $0xba4] ss:$16 sps:$4 sm:$0xff]   ;;  %v8088_v0 = vld [vmem:[%s11405_s1 + $0xbac] ss:$16 sps:$4 sm:$0xff]  }
 0x138   :  { %5195 = vmatprep.subr.bf16.mxu0 %v7992_v1  ;;  %5754 = vmatprep.subr.bf16.mxu1 %v7995_v2  ;;  %v8083_v1 = vld [vmem:[%s11405_s1 + $0xba0] ss:$16 sps:$4 sm:$0xff]   ;;  %v8086_v2 = vld [vmem:[%s11405_s1 + $0xba8] ss:$16 sps:$4 sm:$0xff]  }
 0x13b   :  { %5196 = vmatpush1.bf16.msra.mxu0 %v7990_v3  ;;  %5755 = vmatpush1.bf16.msra.mxu1 %v7993_v4  ;;  %v8091_v3 = vld [vmem:[%s11405_s1 + $0xbc4] ss:$16 sps:$4 sm:$0xff]   ;;  %v8094_v4 = vld [vmem:[%s11405_s1 + $0xbcc] ss:$16 sps:$4 sm:$0xff]  }
 0x13c   :  { %5197 = vmatprep.subr.bf16.mxu0 %v7998_v5  ;;  %5756 = vmatprep.subr.bf16.mxu1 %v8001_v6  ;;  %v8089_v5 = vld [vmem:[%s11405_s1 + $0xbc0] ss:$16 sps:$4 sm:$0xff]   ;;  %v8092_v6 = vld [vmem:[%s11405_s1 + $0xbc8] ss:$16 sps:$4 sm:$0xff]  }
 0x13f   :  { %5198 = vmatpush1.bf16.msra.mxu0 %v7996_v7  ;;  %5757 = vmatpush1.bf16.msra.mxu1 %v7999_v8  ;;  %v8097_v7 = vld [vmem:[%s11405_s1 + $0xbe4] ss:$16 sps:$4 sm:$0xff]   ;;  %v8100_v8 = vld [vmem:[%s11405_s1 + $0xbec] ss:$16 sps:$4 sm:$0xff]  }
 0x140   :  { %5210 = vmatprep.subr.bf16.mxu0 %v8007_v10  ;;  %5769 = vmatprep.subr.bf16.mxu1 %v8010_v11  ;;  %v8098_v10 = vld [vmem:[%s11405_s1 + $0xbe8] ss:$16 sps:$4 sm:$0xff]  }
 0x141   :  { %v8101_v11 = vld [vmem:[%s11406_s0 + $0x28] ss:$100 sps:$4 sm:$0xff]  }
 0x142   :  { %5200 = vmatmul.mubr.bf16.vlgmr.msra.gmra.mrb[0].mxu0 %v8002_v9  ;;  %5759 = vmatmul.mubr.bf16.vlgmr.msra.gmra.mrb[0].mxu1 %v8002_v9  ;;  %v8095_v9 = vld [vmem:[%s11405_s1 + $0xbe0] ss:$16 sps:$4 sm:$0xff]  }
 0x143   :  { %5211 = vmatpush1.bf16.msra.mxu0 %v8005_v12  ;;  %5770 = vmatpush1.bf16.msra.mxu1 %v8008_v13  ;;  %v8106_v12 = vld [vmem:[%s11405_s1 + $0xc04] ss:$16 sps:$4 sm:$0xff]   ;;  %v8109_v13 = vld [vmem:[%s11405_s1 + $0xc0c] ss:$16 sps:$4 sm:$0xff]  }
 0x144   :  { %5212 = vmatprep.subr.bf16.mxu0 %v8013_v14  ;;  %5771 = vmatprep.subr.bf16.mxu1 %v8016_v15  ;;  %v8104_v14 = vld [vmem:[%s11405_s1 + $0xc00] ss:$16 sps:$4 sm:$0xff]   ;;  %v8107_v15 = vld [vmem:[%s11405_s1 + $0xc08] ss:$16 sps:$4 sm:$0xff]  }
 0x145   :  { %5242 = vmatprep.mubr.bf16.mxu0 %v8103_v16  ;;  %5801 = vmatprep.mubr.bf16.mxu1 %v8103_v16  ;;  %v8112_v16 = vld [vmem:[%s11405_s1 + $0xc24] ss:$16 sps:$4 sm:$0xff]  }
 0x147   :  { %5213 = vmatpush1.bf16.msra.mxu0 %v8011_v17  ;;  %5772 = vmatpush1.bf16.msra.mxu1 %v8014_v18  ;;  %v8115_v17 = vld [vmem:[%s11405_s1 + $0xc2c] ss:$16 sps:$4 sm:$0xff]   ;;  %v8202_v18 = vld [vmem:[%s11406_s0 + $0x34] ss:$100 sps:$4 sm:$0xff]  }
 0x148   :  { %5214 = vmatprep.subr.bf16.mxu0 %v8019_v19  ;;  %5773 = vmatprep.subr.bf16.mxu1 %v8022_v20  ;;  %v8110_v19 = vld [vmem:[%s11405_s1 + $0xc20] ss:$16 sps:$4 sm:$0xff]   ;;  %v8113_v20 = vld [vmem:[%s11405_s1 + $0xc28] ss:$16 sps:$4 sm:$0xff]  }
 0x14b   :  { %5215 = vmatpush1.bf16.msra.mxu0 %v8017_v21  ;;  %5774 = vmatpush1.bf16.msra.mxu1 %v8020_v22  ;;  %v8118_v21 = vld [vmem:[%s11405_s1 + $0xc44] ss:$16 sps:$4 sm:$0xff]   ;;  %v8121_v22 = vld [vmem:[%s11405_s1 + $0xc4c] ss:$16 sps:$4 sm:$0xff]  }
 0x14c   :  { %5216 = vmatprep.subr.bf16.mxu0 %v8025_v23  ;;  %5775 = vmatprep.subr.bf16.mxu1 %v8028_v24  ;;  %v8116_v23 = vld [vmem:[%s11405_s1 + $0xc40] ss:$16 sps:$4 sm:$0xff]   ;;  %v8119_v24 = vld [vmem:[%s11405_s1 + $0xc48] ss:$16 sps:$4 sm:$0xff]  }
 0x14f   :  { %5217 = vmatpush1.bf16.msra.mxu0 %v8023_v25  ;;  %5776 = vmatpush1.bf16.msra.mxu1 %v8026_v26  ;;  %v8124_v25 = vld [vmem:[%s11405_s1 + $0xc64] ss:$16 sps:$4 sm:$0xff]   ;;  %v8127_v26 = vld [vmem:[%s11405_s1 + $0xc6c] ss:$16 sps:$4 sm:$0xff]  }
 0x150   :  { %5218 = vmatprep.subr.bf16.mxu0 %v8031_v27  ;;  %5777 = vmatprep.subr.bf16.mxu1 %v8034_v28  ;;  %v8122_v27 = vld [vmem:[%s11405_s1 + $0xc60] ss:$16 sps:$4 sm:$0xff]   ;;  %v8125_v28 = vld [vmem:[%s11405_s1 + $0xc68] ss:$16 sps:$4 sm:$0xff]  }
 0x153   :  { %5219 = vmatpush1.bf16.msra.mxu0 %v8029_v29  ;;  %5778 = vmatpush1.bf16.msra.mxu1 %v8032_v30  ;;  %v8130_v29 = vld [vmem:[%s11405_s1 + $0xc84] ss:$16 sps:$4 sm:$0xff]   ;;  %v8133_v30 = vld [vmem:[%s11405_s1 + $0xc8c] ss:$16 sps:$4 sm:$0xff]  }
 0x154   :  { %5220 = vmatprep.subr.bf16.mxu0 %v8037_v31  ;;  %5779 = vmatprep.subr.bf16.mxu1 %v8040_v32  ;;  %v8128_v31 = vld [vmem:[%s11405_s1 + $0xc80] ss:$16 sps:$4 sm:$0xff]   ;;  %v8131_v32 = vld [vmem:[%s11405_s1 + $0xc88] ss:$16 sps:$4 sm:$0xff]  }
 0x157   :  { %5221 = vmatpush1.bf16.msra.mxu0 %v8035_v33  ;;  %5780 = vmatpush1.bf16.msra.mxu1 %v8038_v34  ;;  %v8136_v33 = vld [vmem:[%s11405_s1 + $0xca4] ss:$16 sps:$4 sm:$0xff]   ;;  %v8139_v34 = vld [vmem:[%s11405_s1 + $0xcac] ss:$16 sps:$4 sm:$0xff]  }
 0x158   :  { %5222 = vmatprep.subr.bf16.mxu0 %v8043_v35  ;;  %5781 = vmatprep.subr.bf16.mxu1 %v8046_v36  ;;  %v8134_v35 = vld [vmem:[%s11405_s1 + $0xca0] ss:$16 sps:$4 sm:$0xff]   ;;  %v8137_v36 = vld [vmem:[%s11405_s1 + $0xca8] ss:$16 sps:$4 sm:$0xff]  }
 0x15b   :  { %5223 = vmatpush1.bf16.msra.mxu0 %v8041_v37  ;;  %5782 = vmatpush1.bf16.msra.mxu1 %v8044_v38  ;;  %v8142_v37 = vld [vmem:[%s11405_s1 + $0xcc4] ss:$16 sps:$4 sm:$0xff]   ;;  %v8145_v38 = vld [vmem:[%s11405_s1 + $0xccc] ss:$16 sps:$4 sm:$0xff]  }
 0x15c   :  { %5224 = vmatprep.subr.bf16.mxu0 %v8049_v39  ;;  %5783 = vmatprep.subr.bf16.mxu1 %v8052_v40  ;;  %v8140_v39 = vld [vmem:[%s11405_s1 + $0xcc0] ss:$16 sps:$4 sm:$0xff]   ;;  %v8143_v40 = vld [vmem:[%s11405_s1 + $0xcc8] ss:$16 sps:$4 sm:$0xff]  }
 0x15f   :  { %5225 = vmatpush1.bf16.msra.mxu0 %v8047_v41  ;;  %5784 = vmatpush1.bf16.msra.mxu1 %v8050_v42  ;;  %v8148_v41 = vld [vmem:[%s11405_s1 + $0xce4] ss:$16 sps:$4 sm:$0xff]   ;;  %v8151_v42 = vld [vmem:[%s11405_s1 + $0xcec] ss:$16 sps:$4 sm:$0xff]  }
 0x160   :  { %5226 = vmatprep.subr.bf16.mxu0 %v8055_v43  ;;  %5785 = vmatprep.subr.bf16.mxu1 %v8058_v44  ;;  %v8146_v43 = vld [vmem:[%s11405_s1 + $0xce0] ss:$16 sps:$4 sm:$0xff]   ;;  %v8149_v44 = vld [vmem:[%s11405_s1 + $0xce8] ss:$16 sps:$4 sm:$0xff]  }
 0x163   :  { %5227 = vmatpush1.bf16.msra.mxu0 %v8053_v45  ;;  %5786 = vmatpush1.bf16.msra.mxu1 %v8056_v46  ;;  %v8154_v45 = vld [vmem:[%s11405_s1 + $0xd04] ss:$16 sps:$4 sm:$0xff]   ;;  %v8157_v46 = vld [vmem:[%s11405_s1 + $0xd0c] ss:$16 sps:$4 sm:$0xff]  }
 0x164   :  { %5228 = vmatprep.subr.bf16.mxu0 %v8061_v47  ;;  %5787 = vmatprep.subr.bf16.mxu1 %v8064_v48  ;;  %v8152_v47 = vld [vmem:[%s11405_s1 + $0xd00] ss:$16 sps:$4 sm:$0xff]   ;;  %v8155_v48 = vld [vmem:[%s11405_s1 + $0xd08] ss:$16 sps:$4 sm:$0xff]  }
 0x167   :  { %5229 = vmatpush1.bf16.msra.mxu0 %v8059_v49  ;;  %5788 = vmatpush1.bf16.msra.mxu1 %v8062_v50  ;;  %v8160_v49 = vld [vmem:[%s11405_s1 + $0xd24] ss:$16 sps:$4 sm:$0xff]   ;;  %v8163_v50 = vld [vmem:[%s11405_s1 + $0xd2c] ss:$16 sps:$4 sm:$0xff]  }
 0x168   :  { %5230 = vmatprep.subr.bf16.mxu0 %v8067_v51  ;;  %5789 = vmatprep.subr.bf16.mxu1 %v8070_v52  ;;  %v8158_v51 = vld [vmem:[%s11405_s1 + $0xd20] ss:$16 sps:$4 sm:$0xff]   ;;  %v8161_v52 = vld [vmem:[%s11405_s1 + $0xd28] ss:$16 sps:$4 sm:$0xff]  }
 0x16b   :  { %5231 = vmatpush1.bf16.msra.mxu0 %v8065_v53  ;;  %5790 = vmatpush1.bf16.msra.mxu1 %v8068_v54  ;;  %v8166_v53 = vld [vmem:[%s11405_s1 + $0xd44] ss:$16 sps:$4 sm:$0xff]   ;;  %v8169_v54 = vld [vmem:[%s11405_s1 + $0xd4c] ss:$16 sps:$4 sm:$0xff]  }
 0x16c   :  { %5232 = vmatprep.subr.bf16.mxu0 %v8073_v55  ;;  %5791 = vmatprep.subr.bf16.mxu1 %v8076_v56  ;;  %v8164_v55 = vld [vmem:[%s11405_s1 + $0xd40] ss:$16 sps:$4 sm:$0xff]   ;;  %v8167_v56 = vld [vmem:[%s11405_s1 + $0xd48] ss:$16 sps:$4 sm:$0xff]  }
 0x16f   :  { %5233 = vmatpush1.bf16.msra.mxu0 %v8071_v57  ;;  %5792 = vmatpush1.bf16.msra.mxu1 %v8074_v58  ;;  %v8172_v57 = vld [vmem:[%s11405_s1 + $0xd64] ss:$16 sps:$4 sm:$0xff]   ;;  %v8175_v58 = vld [vmem:[%s11405_s1 + $0xd6c] ss:$16 sps:$4 sm:$0xff]  }
 0x170   :  { %5234 = vmatprep.subr.bf16.mxu0 %v8079_v59  ;;  %5793 = vmatprep.subr.bf16.mxu1 %v8082_v60  ;;  %v8170_v59 = vld [vmem:[%s11405_s1 + $0xd60] ss:$16 sps:$4 sm:$0xff]   ;;  %v8173_v60 = vld [vmem:[%s11405_s1 + $0xd68] ss:$16 sps:$4 sm:$0xff]  }
 0x173   :  { %5235 = vmatpush1.bf16.msra.mxu0 %v8077_v61  ;;  %5794 = vmatpush1.bf16.msra.mxu1 %v8080_v62  ;;  %v8178_v61 = vld [vmem:[%s11405_s1 + $0xd84] ss:$16 sps:$4 sm:$0xff]   ;;  %v8181_v62 = vld [vmem:[%s11405_s1 + $0xd8c] ss:$16 sps:$4 sm:$0xff]  }
 0x174   :  { %5236 = vmatprep.subr.bf16.mxu0 %v8085_v63  ;;  %5795 = vmatprep.subr.bf16.mxu1 %v8088_v0  ;;  %v8176_v63 = vld [vmem:[%s11405_s1 + $0xd80] ss:$16 sps:$4 sm:$0xff]   ;;  %v8179_v0 = vld [vmem:[%s11405_s1 + $0xd88] ss:$16 sps:$4 sm:$0xff]  }
 0x177   :  { %5237 = vmatpush1.bf16.msra.mxu0 %v8083_v1  ;;  %5796 = vmatpush1.bf16.msra.mxu1 %v8086_v2  ;;  %v8184_v1 = vld [vmem:[%s11405_s1 + $0xda4] ss:$16 sps:$4 sm:$0xff]   ;;  %v8187_v2 = vld [vmem:[%s11405_s1 + $0xdac] ss:$16 sps:$4 sm:$0xff]  }
 0x178   :  { %5238 = vmatprep.subr.bf16.mxu0 %v8091_v3  ;;  %5797 = vmatprep.subr.bf16.mxu1 %v8094_v4  ;;  %v8182_v3 = vld [vmem:[%s11405_s1 + $0xda0] ss:$16 sps:$4 sm:$0xff]   ;;  %v8185_v4 = vld [vmem:[%s11405_s1 + $0xda8] ss:$16 sps:$4 sm:$0xff]  }
 0x17b   :  { %5239 = vmatpush1.bf16.msra.mxu0 %v8089_v5  ;;  %5798 = vmatpush1.bf16.msra.mxu1 %v8092_v6  ;;  %v8190_v5 = vld [vmem:[%s11405_s1 + $0xdc4] ss:$16 sps:$4 sm:$0xff]   ;;  %v8193_v6 = vld [vmem:[%s11405_s1 + $0xdcc] ss:$16 sps:$4 sm:$0xff]  }
 0x17c   :  { %5240 = vmatprep.subr.bf16.mxu0 %v8097_v7  ;;  %5799 = vmatprep.subr.bf16.mxu1 %v8100_v8  ;;  %v8188_v7 = vld [vmem:[%s11405_s1 + $0xdc0] ss:$16 sps:$4 sm:$0xff]   ;;  %v8191_v8 = vld [vmem:[%s11405_s1 + $0xdc8] ss:$16 sps:$4 sm:$0xff]  }
 0x17f   :  { %5241 = vmatpush1.bf16.msra.mxu0 %v8095_v9  ;;  %5800 = vmatpush1.bf16.msra.mxu1 %v8098_v10  ;;  %v8196_v9 = vld [vmem:[%s11405_s1 + $0xde4] ss:$16 sps:$4 sm:$0xff]   ;;  %v8199_v10 = vld [vmem:[%s11405_s1 + $0xdec] ss:$16 sps:$4 sm:$0xff]  }
 0x180   :  { %5253 = vmatprep.subr.bf16.mxu0 %v8106_v12  ;;  %5812 = vmatprep.subr.bf16.mxu1 %v8109_v13  ;;  %v8197_v12 = vld [vmem:[%s11405_s1 + $0xde8] ss:$16 sps:$4 sm:$0xff]   ;;  %v8200_v13 = vld [vmem:[%s11406_s0 + $0x30] ss:$100 sps:$4 sm:$0xff]  }
 0x182   :  { %5243 = vmatmul.mubr.bf16.vlgmr.msra.gmra.mrb[0].mxu0 %v8101_v11  ;;  %5802 = vmatmul.mubr.bf16.vlgmr.msra.gmra.mrb[0].mxu1 %v8101_v11  ;;  %v8194_v11 = vld [vmem:[%s11405_s1 + $0xde0] ss:$16 sps:$4 sm:$0xff]  }
 0x183   :  { %5254 = vmatpush1.bf16.msra.mxu0 %v8104_v14  ;;  %5813 = vmatpush1.bf16.msra.mxu1 %v8107_v15  ;;  %v8205_v14 = vld [vmem:[%s11405_s1 + $0xe04] ss:$16 sps:$4 sm:$0xff]   ;;  %v8208_v15 = vld [vmem:[%s11405_s1 + $0xe0c] ss:$16 sps:$4 sm:$0xff]  }
 0x184   :  { %5255 = vmatprep.subr.bf16.mxu0 %v8112_v16  ;;  %5814 = vmatprep.subr.bf16.mxu1 %v8115_v17  ;;  %v8203_v16 = vld [vmem:[%s11405_s1 + $0xe00] ss:$16 sps:$4 sm:$0xff]   ;;  %v8206_v17 = vld [vmem:[%s11405_s1 + $0xe08] ss:$16 sps:$4 sm:$0xff]  }
 0x185   :  { %5285 = vmatprep.mubr.bf16.mxu0 %v8202_v18  ;;  %5844 = vmatprep.mubr.bf16.mxu1 %v8202_v18  ;;  %v8211_v18 = vld [vmem:[%s11405_s1 + $0xe24] ss:$16 sps:$4 sm:$0xff]  }
 0x187   :  { %5256 = vmatpush1.bf16.msra.mxu0 %v8110_v19  ;;  %5815 = vmatpush1.bf16.msra.mxu1 %v8113_v20  ;;  %v8214_v19 = vld [vmem:[%s11405_s1 + $0xe2c] ss:$16 sps:$4 sm:$0xff]  }
 0x188   :  { %5257 = vmatprep.subr.bf16.mxu0 %v8118_v21  ;;  %5816 = vmatprep.subr.bf16.mxu1 %v8121_v22  ;;  %v8301_v20 = vld [vmem:[%s11406_s0 + $0x3c] ss:$100 sps:$4 sm:$0xff]   ;;  %v8212_v22 = vld [vmem:[%s11405_s1 + $0xe28] ss:$16 sps:$4 sm:$0xff]  }
 0x189   :  { %v8209_v21 = vld [vmem:[%s11405_s1 + $0xe20] ss:$16 sps:$4 sm:$0xff]  }
 0x18b   :  { %5258 = vmatpush1.bf16.msra.mxu0 %v8116_v23  ;;  %5817 = vmatpush1.bf16.msra.mxu1 %v8119_v24  ;;  %v8217_v23 = vld [vmem:[%s11405_s1 + $0xe44] ss:$16 sps:$4 sm:$0xff]   ;;  %v8220_v24 = vld [vmem:[%s11405_s1 + $0xe4c] ss:$16 sps:$4 sm:$0xff]  }
 0x18c   :  { %5259 = vmatprep.subr.bf16.mxu0 %v8124_v25  ;;  %5818 = vmatprep.subr.bf16.mxu1 %v8127_v26  ;;  %v8215_v25 = vld [vmem:[%s11405_s1 + $0xe40] ss:$16 sps:$4 sm:$0xff]   ;;  %v8218_v26 = vld [vmem:[%s11405_s1 + $0xe48] ss:$16 sps:$4 sm:$0xff]  }
 0x18f   :  { %5260 = vmatpush1.bf16.msra.mxu0 %v8122_v27  ;;  %5819 = vmatpush1.bf16.msra.mxu1 %v8125_v28  ;;  %v8223_v27 = vld [vmem:[%s11405_s1 + $0xe64] ss:$16 sps:$4 sm:$0xff]   ;;  %v8226_v28 = vld [vmem:[%s11405_s1 + $0xe6c] ss:$16 sps:$4 sm:$0xff]  }
 0x190   :  { %5261 = vmatprep.subr.bf16.mxu0 %v8130_v29  ;;  %5820 = vmatprep.subr.bf16.mxu1 %v8133_v30  ;;  %v8221_v29 = vld [vmem:[%s11405_s1 + $0xe60] ss:$16 sps:$4 sm:$0xff]   ;;  %v8224_v30 = vld [vmem:[%s11405_s1 + $0xe68] ss:$16 sps:$4 sm:$0xff]  }
 0x193   :  { %5262 = vmatpush1.bf16.msra.mxu0 %v8128_v31  ;;  %5821 = vmatpush1.bf16.msra.mxu1 %v8131_v32  ;;  %v8229_v31 = vld [vmem:[%s11405_s1 + $0xe84] ss:$16 sps:$4 sm:$0xff]   ;;  %v8232_v32 = vld [vmem:[%s11405_s1 + $0xe8c] ss:$16 sps:$4 sm:$0xff]  }
 0x194   :  { %5263 = vmatprep.subr.bf16.mxu0 %v8136_v33  ;;  %5822 = vmatprep.subr.bf16.mxu1 %v8139_v34  ;;  %v8227_v33 = vld [vmem:[%s11405_s1 + $0xe80] ss:$16 sps:$4 sm:$0xff]   ;;  %v8230_v34 = vld [vmem:[%s11405_s1 + $0xe88] ss:$16 sps:$4 sm:$0xff]  }
 0x197   :  { %5264 = vmatpush1.bf16.msra.mxu0 %v8134_v35  ;;  %5823 = vmatpush1.bf16.msra.mxu1 %v8137_v36  ;;  %v8235_v35 = vld [vmem:[%s11405_s1 + $0xea4] ss:$16 sps:$4 sm:$0xff]   ;;  %v8238_v36 = vld [vmem:[%s11405_s1 + $0xeac] ss:$16 sps:$4 sm:$0xff]  }
 0x198   :  { %5265 = vmatprep.subr.bf16.mxu0 %v8142_v37  ;;  %5824 = vmatprep.subr.bf16.mxu1 %v8145_v38  ;;  %v8233_v37 = vld [vmem:[%s11405_s1 + $0xea0] ss:$16 sps:$4 sm:$0xff]   ;;  %v8236_v38 = vld [vmem:[%s11405_s1 + $0xea8] ss:$16 sps:$4 sm:$0xff]  }
 0x19b   :  { %5266 = vmatpush1.bf16.msra.mxu0 %v8140_v39  ;;  %5825 = vmatpush1.bf16.msra.mxu1 %v8143_v40  ;;  %v8241_v39 = vld [vmem:[%s11405_s1 + $0xec4] ss:$16 sps:$4 sm:$0xff]   ;;  %v8244_v40 = vld [vmem:[%s11405_s1 + $0xecc] ss:$16 sps:$4 sm:$0xff]  }
 0x19c   :  { %5267 = vmatprep.subr.bf16.mxu0 %v8148_v41  ;;  %5826 = vmatprep.subr.bf16.mxu1 %v8151_v42  ;;  %v8239_v41 = vld [vmem:[%s11405_s1 + $0xec0] ss:$16 sps:$4 sm:$0xff]   ;;  %v8242_v42 = vld [vmem:[%s11405_s1 + $0xec8] ss:$16 sps:$4 sm:$0xff]  }
 0x19f   :  { %5268 = vmatpush1.bf16.msra.mxu0 %v8146_v43  ;;  %5827 = vmatpush1.bf16.msra.mxu1 %v8149_v44  ;;  %v8247_v43 = vld [vmem:[%s11405_s1 + $0xee4] ss:$16 sps:$4 sm:$0xff]   ;;  %v8250_v44 = vld [vmem:[%s11405_s1 + $0xeec] ss:$16 sps:$4 sm:$0xff]  }
 0x1a0   :  { %5269 = vmatprep.subr.bf16.mxu0 %v8154_v45  ;;  %5828 = vmatprep.subr.bf16.mxu1 %v8157_v46  ;;  %v8245_v45 = vld [vmem:[%s11405_s1 + $0xee0] ss:$16 sps:$4 sm:$0xff]   ;;  %v8248_v46 = vld [vmem:[%s11405_s1 + $0xee8] ss:$16 sps:$4 sm:$0xff]  }
 0x1a3   :  { %5270 = vmatpush1.bf16.msra.mxu0 %v8152_v47  ;;  %5829 = vmatpush1.bf16.msra.mxu1 %v8155_v48  ;;  %v8253_v47 = vld [vmem:[%s11405_s1 + $0xf04] ss:$16 sps:$4 sm:$0xff]   ;;  %v8256_v48 = vld [vmem:[%s11405_s1 + $0xf0c] ss:$16 sps:$4 sm:$0xff]  }
 0x1a4   :  { %5271 = vmatprep.subr.bf16.mxu0 %v8160_v49  ;;  %5830 = vmatprep.subr.bf16.mxu1 %v8163_v50  ;;  %v8251_v49 = vld [vmem:[%s11405_s1 + $0xf00] ss:$16 sps:$4 sm:$0xff]   ;;  %v8254_v50 = vld [vmem:[%s11405_s1 + $0xf08] ss:$16 sps:$4 sm:$0xff]  }
 0x1a7   :  { %5272 = vmatpush1.bf16.msra.mxu0 %v8158_v51  ;;  %5831 = vmatpush1.bf16.msra.mxu1 %v8161_v52  ;;  %v8259_v51 = vld [vmem:[%s11405_s1 + $0xf24] ss:$16 sps:$4 sm:$0xff]   ;;  %v8262_v52 = vld [vmem:[%s11405_s1 + $0xf2c] ss:$16 sps:$4 sm:$0xff]  }
 0x1a8   :  { %5273 = vmatprep.subr.bf16.mxu0 %v8166_v53  ;;  %5832 = vmatprep.subr.bf16.mxu1 %v8169_v54  ;;  %v8257_v53 = vld [vmem:[%s11405_s1 + $0xf20] ss:$16 sps:$4 sm:$0xff]   ;;  %v8260_v54 = vld [vmem:[%s11405_s1 + $0xf28] ss:$16 sps:$4 sm:$0xff]  }
 0x1ab   :  { %5274 = vmatpush1.bf16.msra.mxu0 %v8164_v55  ;;  %5833 = vmatpush1.bf16.msra.mxu1 %v8167_v56  ;;  %v8265_v55 = vld [vmem:[%s11405_s1 + $0xf44] ss:$16 sps:$4 sm:$0xff]   ;;  %v8268_v56 = vld [vmem:[%s11405_s1 + $0xf4c] ss:$16 sps:$4 sm:$0xff]  }
 0x1ac   :  { %5275 = vmatprep.subr.bf16.mxu0 %v8172_v57  ;;  %5834 = vmatprep.subr.bf16.mxu1 %v8175_v58  ;;  %v8263_v57 = vld [vmem:[%s11405_s1 + $0xf40] ss:$16 sps:$4 sm:$0xff]   ;;  %v8266_v58 = vld [vmem:[%s11405_s1 + $0xf48] ss:$16 sps:$4 sm:$0xff]  }
 0x1af   :  { %5276 = vmatpush1.bf16.msra.mxu0 %v8170_v59  ;;  %5835 = vmatpush1.bf16.msra.mxu1 %v8173_v60  ;;  %v8271_v59 = vld [vmem:[%s11405_s1 + $0xf64] ss:$16 sps:$4 sm:$0xff]   ;;  %v8274_v60 = vld [vmem:[%s11405_s1 + $0xf6c] ss:$16 sps:$4 sm:$0xff]  }
 0x1b0   :  { %5277 = vmatprep.subr.bf16.mxu0 %v8178_v61  ;;  %5836 = vmatprep.subr.bf16.mxu1 %v8181_v62  ;;  %v8269_v61 = vld [vmem:[%s11405_s1 + $0xf60] ss:$16 sps:$4 sm:$0xff]   ;;  %v8272_v62 = vld [vmem:[%s11405_s1 + $0xf68] ss:$16 sps:$4 sm:$0xff]  }
 0x1b3   :  { %5278 = vmatpush1.bf16.msra.mxu0 %v8176_v63  ;;  %5837 = vmatpush1.bf16.msra.mxu1 %v8179_v0  ;;  %v8277_v63 = vld [vmem:[%s11405_s1 + $0xf84] ss:$16 sps:$4 sm:$0xff]   ;;  %v8280_v0 = vld [vmem:[%s11405_s1 + $0xf8c] ss:$16 sps:$4 sm:$0xff]  }
 0x1b4   :  { %5279 = vmatprep.subr.bf16.mxu0 %v8184_v1  ;;  %5838 = vmatprep.subr.bf16.mxu1 %v8187_v2  ;;  %v8275_v1 = vld [vmem:[%s11405_s1 + $0xf80] ss:$16 sps:$4 sm:$0xff]   ;;  %v8278_v2 = vld [vmem:[%s11405_s1 + $0xf88] ss:$16 sps:$4 sm:$0xff]  }
 0x1b7   :  { %5280 = vmatpush1.bf16.msra.mxu0 %v8182_v3  ;;  %5839 = vmatpush1.bf16.msra.mxu1 %v8185_v4  ;;  %v8283_v3 = vld [vmem:[%s11405_s1 + $0xfa4] ss:$16 sps:$4 sm:$0xff]   ;;  %v8286_v4 = vld [vmem:[%s11405_s1 + $0xfac] ss:$16 sps:$4 sm:$0xff]  }
 0x1b8   :  { %5281 = vmatprep.subr.bf16.mxu0 %v8190_v5  ;;  %5840 = vmatprep.subr.bf16.mxu1 %v8193_v6  ;;  %v8281_v5 = vld [vmem:[%s11405_s1 + $0xfa0] ss:$16 sps:$4 sm:$0xff]   ;;  %v8284_v6 = vld [vmem:[%s11405_s1 + $0xfa8] ss:$16 sps:$4 sm:$0xff]  }
 0x1bb   :  { %5282 = vmatpush1.bf16.msra.mxu0 %v8188_v7  ;;  %5841 = vmatpush1.bf16.msra.mxu1 %v8191_v8  ;;  %v8289_v7 = vld [vmem:[%s11405_s1 + $0xfc4] ss:$16 sps:$4 sm:$0xff]   ;;  %v8292_v8 = vld [vmem:[%s11405_s1 + $0xfcc] ss:$16 sps:$4 sm:$0xff]  }
 0x1bc   :  { %5283 = vmatprep.subr.bf16.mxu0 %v8196_v9  ;;  %5842 = vmatprep.subr.bf16.mxu1 %v8199_v10  ;;  %v8287_v9 = vld [vmem:[%s11405_s1 + $0xfc0] ss:$16 sps:$4 sm:$0xff]   ;;  %v8290_v10 = vld [vmem:[%s11405_s1 + $0xfc8] ss:$16 sps:$4 sm:$0xff]  }
 0x1bf   :  { %5284 = vmatpush1.bf16.msra.mxu0 %v8194_v11  ;;  %5843 = vmatpush1.bf16.msra.mxu1 %v8197_v12  ;;  %v8295_v11 = vld [vmem:[%s11405_s1 + $0xfe4] ss:$16 sps:$4 sm:$0xff]   ;;  %v8298_v12 = vld [vmem:[%s11405_s1 + $0xfec] ss:$16 sps:$4 sm:$0xff]  }
 0x1c0   :  { %5296 = vmatprep.subr.bf16.mxu0 %v8205_v14  ;;  %5855 = vmatprep.subr.bf16.mxu1 %v8208_v15  ;;  %v8296_v14 = vld [vmem:[%s11405_s1 + $0xfe8] ss:$16 sps:$4 sm:$0xff]   ;;  %v8304_v15 = vld [vmem:[%s11405_s1 + $0x1004] ss:$16 sps:$4 sm:$0xff]  }
 0x1c2   :  { %5286 = vmatmul.mubr.bf16.vlgmr.msra.gmra.mrb[0].mxu0 %v8200_v13  ;;  %5845 = vmatmul.mubr.bf16.vlgmr.msra.gmra.mrb[0].mxu1 %v8200_v13  ;;  %v8293_v13 = vld [vmem:[%s11405_s1 + $0xfe0] ss:$16 sps:$4 sm:$0xff]  }
 0x1c3   :  { %5297 = vmatpush1.bf16.msra.mxu0 %v8203_v16  ;;  %5856 = vmatpush1.bf16.msra.mxu1 %v8206_v17  ;;  %v8307_v16 = vld [vmem:[%s11405_s1 + $0x100c] ss:$16 sps:$4 sm:$0xff]  }
 0x1c4   :  { %5298 = vmatprep.subr.bf16.mxu0 %v8211_v18  ;;  %5857 = vmatprep.subr.bf16.mxu1 %v8214_v19  ;;  %v8299_v17 = vld [vmem:[%s11406_s0 + $0x38] ss:$100 sps:$4 sm:$0xff]   ;;  %v8302_v18 = vld [vmem:[%s11405_s1 + $0x1000] ss:$16 sps:$4 sm:$0xff]  }
 0x1c5   :  { %5328 = vmatprep.mubr.bf16.mxu0 %v8301_v20  ;;  %5887 = vmatprep.mubr.bf16.mxu1 %v8301_v20  ;;  %v8305_v19 = vld [vmem:[%s11405_s1 + $0x1008] ss:$16 sps:$4 sm:$0xff]   ;;  %v8310_v20 = vld [vmem:[%s11405_s1 + $0x1024] ss:$16 sps:$4 sm:$0xff]  }
 0x1c7   :  { %5299 = vmatpush1.bf16.msra.mxu0 %v8209_v21  ;;  %5858 = vmatpush1.bf16.msra.mxu1 %v8212_v22  ;;  %v8313_v21 = vld [vmem:[%s11405_s1 + $0x102c] ss:$16 sps:$4 sm:$0xff]   ;;  %v8400_v22 = vld [vmem:[%s11406_s0 + $0x44] ss:$100 sps:$4 sm:$0xff]  }
 0x1c8   :  { %5300 = vmatprep.subr.bf16.mxu0 %v8217_v23  ;;  %5859 = vmatprep.subr.bf16.mxu1 %v8220_v24  ;;  %v8308_v23 = vld [vmem:[%s11405_s1 + $0x1020] ss:$16 sps:$4 sm:$0xff]   ;;  %v8311_v24 = vld [vmem:[%s11405_s1 + $0x1028] ss:$16 sps:$4 sm:$0xff]  }
 0x1cb   :  { %5301 = vmatpush1.bf16.msra.mxu0 %v8215_v25  ;;  %5860 = vmatpush1.bf16.msra.mxu1 %v8218_v26  ;;  %v8316_v25 = vld [vmem:[%s11405_s1 + $0x1044] ss:$16 sps:$4 sm:$0xff]   ;;  %v8319_v26 = vld [vmem:[%s11405_s1 + $0x104c] ss:$16 sps:$4 sm:$0xff]  }
 0x1cc   :  { %5302 = vmatprep.subr.bf16.mxu0 %v8223_v27  ;;  %5861 = vmatprep.subr.bf16.mxu1 %v8226_v28  ;;  %v8314_v27 = vld [vmem:[%s11405_s1 + $0x1040] ss:$16 sps:$4 sm:$0xff]   ;;  %v8317_v28 = vld [vmem:[%s11405_s1 + $0x1048] ss:$16 sps:$4 sm:$0xff]  }
 0x1cf   :  { %5303 = vmatpush1.bf16.msra.mxu0 %v8221_v29  ;;  %5862 = vmatpush1.bf16.msra.mxu1 %v8224_v30  ;;  %v8322_v29 = vld [vmem:[%s11405_s1 + $0x1064] ss:$16 sps:$4 sm:$0xff]   ;;  %v8325_v30 = vld [vmem:[%s11405_s1 + $0x106c] ss:$16 sps:$4 sm:$0xff]  }
 0x1d0   :  { %5304 = vmatprep.subr.bf16.mxu0 %v8229_v31  ;;  %5863 = vmatprep.subr.bf16.mxu1 %v8232_v32  ;;  %v8320_v31 = vld [vmem:[%s11405_s1 + $0x1060] ss:$16 sps:$4 sm:$0xff]   ;;  %v8323_v32 = vld [vmem:[%s11405_s1 + $0x1068] ss:$16 sps:$4 sm:$0xff]  }
 0x1d3   :  { %5305 = vmatpush1.bf16.msra.mxu0 %v8227_v33  ;;  %5864 = vmatpush1.bf16.msra.mxu1 %v8230_v34  ;;  %v8328_v33 = vld [vmem:[%s11405_s1 + $0x1084] ss:$16 sps:$4 sm:$0xff]   ;;  %v8331_v34 = vld [vmem:[%s11405_s1 + $0x108c] ss:$16 sps:$4 sm:$0xff]  }
 0x1d4   :  { %5306 = vmatprep.subr.bf16.mxu0 %v8235_v35  ;;  %5865 = vmatprep.subr.bf16.mxu1 %v8238_v36  ;;  %v8326_v35 = vld [vmem:[%s11405_s1 + $0x1080] ss:$16 sps:$4 sm:$0xff]   ;;  %v8329_v36 = vld [vmem:[%s11405_s1 + $0x1088] ss:$16 sps:$4 sm:$0xff]  }
 0x1d7   :  { %5307 = vmatpush1.bf16.msra.mxu0 %v8233_v37  ;;  %5866 = vmatpush1.bf16.msra.mxu1 %v8236_v38  ;;  %v8334_v37 = vld [vmem:[%s11405_s1 + $0x10a4] ss:$16 sps:$4 sm:$0xff]   ;;  %v8337_v38 = vld [vmem:[%s11405_s1 + $0x10ac] ss:$16 sps:$4 sm:$0xff]  }
 0x1d8   :  { %5308 = vmatprep.subr.bf16.mxu0 %v8241_v39  ;;  %5867 = vmatprep.subr.bf16.mxu1 %v8244_v40  ;;  %v8332_v39 = vld [vmem:[%s11405_s1 + $0x10a0] ss:$16 sps:$4 sm:$0xff]   ;;  %v8335_v40 = vld [vmem:[%s11405_s1 + $0x10a8] ss:$16 sps:$4 sm:$0xff]  }
 0x1db   :  { %5309 = vmatpush1.bf16.msra.mxu0 %v8239_v41  ;;  %5868 = vmatpush1.bf16.msra.mxu1 %v8242_v42  ;;  %v8340_v41 = vld [vmem:[%s11405_s1 + $0x10c4] ss:$16 sps:$4 sm:$0xff]   ;;  %v8343_v42 = vld [vmem:[%s11405_s1 + $0x10cc] ss:$16 sps:$4 sm:$0xff]  }
 0x1dc   :  { %5310 = vmatprep.subr.bf16.mxu0 %v8247_v43  ;;  %5869 = vmatprep.subr.bf16.mxu1 %v8250_v44  ;;  %v8338_v43 = vld [vmem:[%s11405_s1 + $0x10c0] ss:$16 sps:$4 sm:$0xff]   ;;  %v8341_v44 = vld [vmem:[%s11405_s1 + $0x10c8] ss:$16 sps:$4 sm:$0xff]  }
 0x1df   :  { %5311 = vmatpush1.bf16.msra.mxu0 %v8245_v45  ;;  %5870 = vmatpush1.bf16.msra.mxu1 %v8248_v46  ;;  %v8346_v45 = vld [vmem:[%s11405_s1 + $0x10e4] ss:$16 sps:$4 sm:$0xff]   ;;  %v8349_v46 = vld [vmem:[%s11405_s1 + $0x10ec] ss:$16 sps:$4 sm:$0xff]  }
 0x1e0   :  { %5312 = vmatprep.subr.bf16.mxu0 %v8253_v47  ;;  %5871 = vmatprep.subr.bf16.mxu1 %v8256_v48  ;;  %v8344_v47 = vld [vmem:[%s11405_s1 + $0x10e0] ss:$16 sps:$4 sm:$0xff]   ;;  %v8347_v48 = vld [vmem:[%s11405_s1 + $0x10e8] ss:$16 sps:$4 sm:$0xff]  }
 0x1e3   :  { %5313 = vmatpush1.bf16.msra.mxu0 %v8251_v49  ;;  %5872 = vmatpush1.bf16.msra.mxu1 %v8254_v50  ;;  %v8352_v49 = vld [vmem:[%s11405_s1 + $0x1104] ss:$16 sps:$4 sm:$0xff]   ;;  %v8355_v50 = vld [vmem:[%s11405_s1 + $0x110c] ss:$16 sps:$4 sm:$0xff]  }
 0x1e4   :  { %5314 = vmatprep.subr.bf16.mxu0 %v8259_v51  ;;  %5873 = vmatprep.subr.bf16.mxu1 %v8262_v52  ;;  %v8350_v51 = vld [vmem:[%s11405_s1 + $0x1100] ss:$16 sps:$4 sm:$0xff]   ;;  %v8353_v52 = vld [vmem:[%s11405_s1 + $0x1108] ss:$16 sps:$4 sm:$0xff]  }
 0x1e7   :  { %5315 = vmatpush1.bf16.msra.mxu0 %v8257_v53  ;;  %5874 = vmatpush1.bf16.msra.mxu1 %v8260_v54  ;;  %v8358_v53 = vld [vmem:[%s11405_s1 + $0x1124] ss:$16 sps:$4 sm:$0xff]   ;;  %v8361_v54 = vld [vmem:[%s11405_s1 + $0x112c] ss:$16 sps:$4 sm:$0xff]  }
 0x1e8   :  { %5316 = vmatprep.subr.bf16.mxu0 %v8265_v55  ;;  %5875 = vmatprep.subr.bf16.mxu1 %v8268_v56  ;;  %v8356_v55 = vld [vmem:[%s11405_s1 + $0x1120] ss:$16 sps:$4 sm:$0xff]   ;;  %v8359_v56 = vld [vmem:[%s11405_s1 + $0x1128] ss:$16 sps:$4 sm:$0xff]  }
 0x1eb   :  { %5317 = vmatpush1.bf16.msra.mxu0 %v8263_v57  ;;  %5876 = vmatpush1.bf16.msra.mxu1 %v8266_v58  ;;  %v8364_v57 = vld [vmem:[%s11405_s1 + $0x1144] ss:$16 sps:$4 sm:$0xff]   ;;  %v8367_v58 = vld [vmem:[%s11405_s1 + $0x114c] ss:$16 sps:$4 sm:$0xff]  }
 0x1ec   :  { %5318 = vmatprep.subr.bf16.mxu0 %v8271_v59  ;;  %5877 = vmatprep.subr.bf16.mxu1 %v8274_v60  ;;  %v8362_v59 = vld [vmem:[%s11405_s1 + $0x1140] ss:$16 sps:$4 sm:$0xff]   ;;  %v8365_v60 = vld [vmem:[%s11405_s1 + $0x1148] ss:$16 sps:$4 sm:$0xff]  }
 0x1ef   :  { %5319 = vmatpush1.bf16.msra.mxu0 %v8269_v61  ;;  %5878 = vmatpush1.bf16.msra.mxu1 %v8272_v62  ;;  %v8370_v61 = vld [vmem:[%s11405_s1 + $0x1164] ss:$16 sps:$4 sm:$0xff]   ;;  %v8373_v62 = vld [vmem:[%s11405_s1 + $0x116c] ss:$16 sps:$4 sm:$0xff]  }
 0x1f0   :  { %5320 = vmatprep.subr.bf16.mxu0 %v8277_v63  ;;  %5879 = vmatprep.subr.bf16.mxu1 %v8280_v0  ;;  %v8368_v63 = vld [vmem:[%s11405_s1 + $0x1160] ss:$16 sps:$4 sm:$0xff]   ;;  %v8371_v0 = vld [vmem:[%s11405_s1 + $0x1168] ss:$16 sps:$4 sm:$0xff]  }
 0x1f3   :  { %5321 = vmatpush1.bf16.msra.mxu0 %v8275_v1  ;;  %5880 = vmatpush1.bf16.msra.mxu1 %v8278_v2  ;;  %v8376_v1 = vld [vmem:[%s11405_s1 + $0x1184] ss:$16 sps:$4 sm:$0xff]   ;;  %v8379_v2 = vld [vmem:[%s11405_s1 + $0x118c] ss:$16 sps:$4 sm:$0xff]  }
 0x1f4   :  { %5322 = vmatprep.subr.bf16.mxu0 %v8283_v3  ;;  %5881 = vmatprep.subr.bf16.mxu1 %v8286_v4  ;;  %v8374_v3 = vld [vmem:[%s11405_s1 + $0x1180] ss:$16 sps:$4 sm:$0xff]   ;;  %v8377_v4 = vld [vmem:[%s11405_s1 + $0x1188] ss:$16 sps:$4 sm:$0xff]  }
 0x1f7   :  { %5323 = vmatpush1.bf16.msra.mxu0 %v8281_v5  ;;  %5882 = vmatpush1.bf16.msra.mxu1 %v8284_v6  ;;  %v8382_v5 = vld [vmem:[%s11405_s1 + $0x11a4] ss:$16 sps:$4 sm:$0xff]   ;;  %v8385_v6 = vld [vmem:[%s11405_s1 + $0x11ac] ss:$16 sps:$4 sm:$0xff]  }
 0x1f8   :  { %5324 = vmatprep.subr.bf16.mxu0 %v8289_v7  ;;  %5883 = vmatprep.subr.bf16.mxu1 %v8292_v8  ;;  %v8380_v7 = vld [vmem:[%s11405_s1 + $0x11a0] ss:$16 sps:$4 sm:$0xff]   ;;  %v8383_v8 = vld [vmem:[%s11405_s1 + $0x11a8] ss:$16 sps:$4 sm:$0xff]  }
 0x1fb   :  { %5325 = vmatpush1.bf16.msra.mxu0 %v8287_v9  ;;  %5884 = vmatpush1.bf16.msra.mxu1 %v8290_v10  ;;  %v8388_v9 = vld [vmem:[%s11405_s1 + $0x11c4] ss:$16 sps:$4 sm:$0xff]   ;;  %v8391_v10 = vld [vmem:[%s11405_s1 + $0x11cc] ss:$16 sps:$4 sm:$0xff]  }
 0x1fc   :  { %5326 = vmatprep.subr.bf16.mxu0 %v8295_v11  ;;  %5885 = vmatprep.subr.bf16.mxu1 %v8298_v12  ;;  %v8386_v11 = vld [vmem:[%s11405_s1 + $0x11c0] ss:$16 sps:$4 sm:$0xff]   ;;  %v8389_v12 = vld [vmem:[%s11405_s1 + $0x11c8] ss:$16 sps:$4 sm:$0xff]  }
 0x1ff   :  { %5327 = vmatpush1.bf16.msra.mxu0 %v8293_v13  ;;  %5886 = vmatpush1.bf16.msra.mxu1 %v8296_v14  ;;  %v8394_v13 = vld [vmem:[%s11405_s1 + $0x11e4] ss:$16 sps:$4 sm:$0xff]   ;;  %v8397_v14 = vld [vmem:[%s11405_s1 + $0x11ec] ss:$16 sps:$4 sm:$0xff]  }
 0x200   :  { %5339 = vmatprep.subr.bf16.mxu0 %v8304_v15  ;;  %5898 = vmatprep.subr.bf16.mxu1 %v8307_v16  ;;  %v8392_v15 = vld [vmem:[%s11405_s1 + $0x11e0] ss:$16 sps:$4 sm:$0xff]   ;;  %v8395_v16 = vld [vmem:[%s11405_s1 + $0x11e8] ss:$16 sps:$4 sm:$0xff]  }
 0x202   :  { %5329 = vmatmul.mubr.bf16.vlgmr.msra.gmra.mrb[0].mxu0 %v8299_v17  ;;  %5888 = vmatmul.mubr.bf16.vlgmr.msra.gmra.mrb[0].mxu1 %v8299_v17  ;;  %v8403_v17 = vld [vmem:[%s11405_s1 + $0x1204] ss:$16 sps:$4 sm:$0xff]  }
 0x203   :  { %5340 = vmatpush1.bf16.msra.mxu0 %v8302_v18  ;;  %5899 = vmatpush1.bf16.msra.mxu1 %v8305_v19  ;;  %v8406_v18 = vld [vmem:[%s11405_s1 + $0x120c] ss:$16 sps:$4 sm:$0xff]   ;;  %v8398_v19 = vld [vmem:[%s11406_s0 + $0x40] ss:$100 sps:$4 sm:$0xff]  }
 0x204   :  { %5341 = vmatprep.subr.bf16.mxu0 %v8310_v20  ;;  %5900 = vmatprep.subr.bf16.mxu1 %v8313_v21  ;;  %v8401_v20 = vld [vmem:[%s11405_s1 + $0x1200] ss:$16 sps:$4 sm:$0xff]   ;;  %v8404_v21 = vld [vmem:[%s11405_s1 + $0x1208] ss:$16 sps:$4 sm:$0xff]  }
 0x205   :  { %5371 = vmatprep.mubr.bf16.mxu0 %v8400_v22  ;;  %5930 = vmatprep.mubr.bf16.mxu1 %v8400_v22  ;;  %v8409_v22 = vld [vmem:[%s11405_s1 + $0x1224] ss:$16 sps:$4 sm:$0xff]  }
 0x207   :  { %5342 = vmatpush1.bf16.msra.mxu0 %v8308_v23  ;;  %5901 = vmatpush1.bf16.msra.mxu1 %v8311_v24  ;;  %v8412_v23 = vld [vmem:[%s11405_s1 + $0x122c] ss:$16 sps:$4 sm:$0xff]  }
 0x208   :  { %5343 = vmatprep.subr.bf16.mxu0 %v8316_v25  ;;  %5902 = vmatprep.subr.bf16.mxu1 %v8319_v26  ;;  %v8499_v24 = vld [vmem:[%s11406_s0 + $0x4c] ss:$100 sps:$4 sm:$0xff]   ;;  %v8410_v26 = vld [vmem:[%s11405_s1 + $0x1228] ss:$16 sps:$4 sm:$0xff]  }
 0x209   :  { %v8407_v25 = vld [vmem:[%s11405_s1 + $0x1220] ss:$16 sps:$4 sm:$0xff]  }
 0x20b   :  { %5344 = vmatpush1.bf16.msra.mxu0 %v8314_v27  ;;  %5903 = vmatpush1.bf16.msra.mxu1 %v8317_v28  ;;  %v8415_v27 = vld [vmem:[%s11405_s1 + $0x1244] ss:$16 sps:$4 sm:$0xff]   ;;  %v8418_v28 = vld [vmem:[%s11405_s1 + $0x124c] ss:$16 sps:$4 sm:$0xff]  }
 0x20c   :  { %5345 = vmatprep.subr.bf16.mxu0 %v8322_v29  ;;  %5904 = vmatprep.subr.bf16.mxu1 %v8325_v30  ;;  %v8413_v29 = vld [vmem:[%s11405_s1 + $0x1240] ss:$16 sps:$4 sm:$0xff]   ;;  %v8416_v30 = vld [vmem:[%s11405_s1 + $0x1248] ss:$16 sps:$4 sm:$0xff]  }
 0x20f   :  { %5346 = vmatpush1.bf16.msra.mxu0 %v8320_v31  ;;  %5905 = vmatpush1.bf16.msra.mxu1 %v8323_v32  ;;  %v8421_v31 = vld [vmem:[%s11405_s1 + $0x1264] ss:$16 sps:$4 sm:$0xff]   ;;  %v8424_v32 = vld [vmem:[%s11405_s1 + $0x126c] ss:$16 sps:$4 sm:$0xff]  }
 0x210   :  { %5347 = vmatprep.subr.bf16.mxu0 %v8328_v33  ;;  %5906 = vmatprep.subr.bf16.mxu1 %v8331_v34  ;;  %v8419_v33 = vld [vmem:[%s11405_s1 + $0x1260] ss:$16 sps:$4 sm:$0xff]   ;;  %v8422_v34 = vld [vmem:[%s11405_s1 + $0x1268] ss:$16 sps:$4 sm:$0xff]  }
 0x213   :  { %5348 = vmatpush1.bf16.msra.mxu0 %v8326_v35  ;;  %5907 = vmatpush1.bf16.msra.mxu1 %v8329_v36  ;;  %v8427_v35 = vld [vmem:[%s11405_s1 + $0x1284] ss:$16 sps:$4 sm:$0xff]   ;;  %v8430_v36 = vld [vmem:[%s11405_s1 + $0x128c] ss:$16 sps:$4 sm:$0xff]  }
 0x214   :  { %5349 = vmatprep.subr.bf16.mxu0 %v8334_v37  ;;  %5908 = vmatprep.subr.bf16.mxu1 %v8337_v38  ;;  %v8425_v37 = vld [vmem:[%s11405_s1 + $0x1280] ss:$16 sps:$4 sm:$0xff]   ;;  %v8428_v38 = vld [vmem:[%s11405_s1 + $0x1288] ss:$16 sps:$4 sm:$0xff]  }
 0x217   :  { %5350 = vmatpush1.bf16.msra.mxu0 %v8332_v39  ;;  %5909 = vmatpush1.bf16.msra.mxu1 %v8335_v40  ;;  %v8433_v39 = vld [vmem:[%s11405_s1 + $0x12a4] ss:$16 sps:$4 sm:$0xff]   ;;  %v8436_v40 = vld [vmem:[%s11405_s1 + $0x12ac] ss:$16 sps:$4 sm:$0xff]  }
 0x218   :  { %5351 = vmatprep.subr.bf16.mxu0 %v8340_v41  ;;  %5910 = vmatprep.subr.bf16.mxu1 %v8343_v42  ;;  %v8431_v41 = vld [vmem:[%s11405_s1 + $0x12a0] ss:$16 sps:$4 sm:$0xff]   ;;  %v8434_v42 = vld [vmem:[%s11405_s1 + $0x12a8] ss:$16 sps:$4 sm:$0xff]  }
 0x21b   :  { %5352 = vmatpush1.bf16.msra.mxu0 %v8338_v43  ;;  %5911 = vmatpush1.bf16.msra.mxu1 %v8341_v44  ;;  %v8439_v43 = vld [vmem:[%s11405_s1 + $0x12c4] ss:$16 sps:$4 sm:$0xff]   ;;  %v8442_v44 = vld [vmem:[%s11405_s1 + $0x12cc] ss:$16 sps:$4 sm:$0xff]  }
 0x21c   :  { %5353 = vmatprep.subr.bf16.mxu0 %v8346_v45  ;;  %5912 = vmatprep.subr.bf16.mxu1 %v8349_v46  ;;  %v8437_v45 = vld [vmem:[%s11405_s1 + $0x12c0] ss:$16 sps:$4 sm:$0xff]   ;;  %v8440_v46 = vld [vmem:[%s11405_s1 + $0x12c8] ss:$16 sps:$4 sm:$0xff]  }
 0x21f   :  { %5354 = vmatpush1.bf16.msra.mxu0 %v8344_v47  ;;  %5913 = vmatpush1.bf16.msra.mxu1 %v8347_v48  ;;  %v8445_v47 = vld [vmem:[%s11405_s1 + $0x12e4] ss:$16 sps:$4 sm:$0xff]   ;;  %v8448_v48 = vld [vmem:[%s11405_s1 + $0x12ec] ss:$16 sps:$4 sm:$0xff]  }
 0x220   :  { %5355 = vmatprep.subr.bf16.mxu0 %v8352_v49  ;;  %5914 = vmatprep.subr.bf16.mxu1 %v8355_v50  ;;  %v8443_v49 = vld [vmem:[%s11405_s1 + $0x12e0] ss:$16 sps:$4 sm:$0xff]   ;;  %v8446_v50 = vld [vmem:[%s11405_s1 + $0x12e8] ss:$16 sps:$4 sm:$0xff]  }
 0x223   :  { %5356 = vmatpush1.bf16.msra.mxu0 %v8350_v51  ;;  %5915 = vmatpush1.bf16.msra.mxu1 %v8353_v52  ;;  %v8451_v51 = vld [vmem:[%s11405_s1 + $0x1304] ss:$16 sps:$4 sm:$0xff]   ;;  %v8454_v52 = vld [vmem:[%s11405_s1 + $0x130c] ss:$16 sps:$4 sm:$0xff]  }
 0x224   :  { %5357 = vmatprep.subr.bf16.mxu0 %v8358_v53  ;;  %5916 = vmatprep.subr.bf16.mxu1 %v8361_v54  ;;  %v8449_v53 = vld [vmem:[%s11405_s1 + $0x1300] ss:$16 sps:$4 sm:$0xff]   ;;  %v8452_v54 = vld [vmem:[%s11405_s1 + $0x1308] ss:$16 sps:$4 sm:$0xff]  }
 0x227   :  { %5358 = vmatpush1.bf16.msra.mxu0 %v8356_v55  ;;  %5917 = vmatpush1.bf16.msra.mxu1 %v8359_v56  ;;  %v8457_v55 = vld [vmem:[%s11405_s1 + $0x1324] ss:$16 sps:$4 sm:$0xff]   ;;  %v8460_v56 = vld [vmem:[%s11405_s1 + $0x132c] ss:$16 sps:$4 sm:$0xff]  }
 0x228   :  { %5359 = vmatprep.subr.bf16.mxu0 %v8364_v57  ;;  %5918 = vmatprep.subr.bf16.mxu1 %v8367_v58  ;;  %v8455_v57 = vld [vmem:[%s11405_s1 + $0x1320] ss:$16 sps:$4 sm:$0xff]   ;;  %v8458_v58 = vld [vmem:[%s11405_s1 + $0x1328] ss:$16 sps:$4 sm:$0xff]  }
 0x22b   :  { %5360 = vmatpush1.bf16.msra.mxu0 %v8362_v59  ;;  %5919 = vmatpush1.bf16.msra.mxu1 %v8365_v60  ;;  %v8463_v59 = vld [vmem:[%s11405_s1 + $0x1344] ss:$16 sps:$4 sm:$0xff]   ;;  %v8466_v60 = vld [vmem:[%s11405_s1 + $0x134c] ss:$16 sps:$4 sm:$0xff]  }
 0x22c   :  { %5361 = vmatprep.subr.bf16.mxu0 %v8370_v61  ;;  %5920 = vmatprep.subr.bf16.mxu1 %v8373_v62  ;;  %v8461_v61 = vld [vmem:[%s11405_s1 + $0x1340] ss:$16 sps:$4 sm:$0xff]   ;;  %v8464_v62 = vld [vmem:[%s11405_s1 + $0x1348] ss:$16 sps:$4 sm:$0xff]  }
 0x22f   :  { %5362 = vmatpush1.bf16.msra.mxu0 %v8368_v63  ;;  %5921 = vmatpush1.bf16.msra.mxu1 %v8371_v0  ;;  %v8469_v63 = vld [vmem:[%s11405_s1 + $0x1364] ss:$16 sps:$4 sm:$0xff]   ;;  %v8472_v0 = vld [vmem:[%s11405_s1 + $0x136c] ss:$16 sps:$4 sm:$0xff]  }
 0x230   :  { %5363 = vmatprep.subr.bf16.mxu0 %v8376_v1  ;;  %5922 = vmatprep.subr.bf16.mxu1 %v8379_v2  ;;  %v8467_v1 = vld [vmem:[%s11405_s1 + $0x1360] ss:$16 sps:$4 sm:$0xff]   ;;  %v8470_v2 = vld [vmem:[%s11405_s1 + $0x1368] ss:$16 sps:$4 sm:$0xff]  }
 0x233   :  { %5364 = vmatpush1.bf16.msra.mxu0 %v8374_v3  ;;  %5923 = vmatpush1.bf16.msra.mxu1 %v8377_v4  ;;  %v8475_v3 = vld [vmem:[%s11405_s1 + $0x1384] ss:$16 sps:$4 sm:$0xff]   ;;  %v8478_v4 = vld [vmem:[%s11405_s1 + $0x138c] ss:$16 sps:$4 sm:$0xff]  }
 0x234   :  { %5365 = vmatprep.subr.bf16.mxu0 %v8382_v5  ;;  %5924 = vmatprep.subr.bf16.mxu1 %v8385_v6  ;;  %v8473_v5 = vld [vmem:[%s11405_s1 + $0x1380] ss:$16 sps:$4 sm:$0xff]   ;;  %v8476_v6 = vld [vmem:[%s11405_s1 + $0x1388] ss:$16 sps:$4 sm:$0xff]  }
 0x237   :  { %5366 = vmatpush1.bf16.msra.mxu0 %v8380_v7  ;;  %5925 = vmatpush1.bf16.msra.mxu1 %v8383_v8  ;;  %v8481_v7 = vld [vmem:[%s11405_s1 + $0x13a4] ss:$16 sps:$4 sm:$0xff]   ;;  %v8484_v8 = vld [vmem:[%s11405_s1 + $0x13ac] ss:$16 sps:$4 sm:$0xff]  }
 0x238   :  { %5367 = vmatprep.subr.bf16.mxu0 %v8388_v9  ;;  %5926 = vmatprep.subr.bf16.mxu1 %v8391_v10  ;;  %v8479_v9 = vld [vmem:[%s11405_s1 + $0x13a0] ss:$16 sps:$4 sm:$0xff]   ;;  %v8482_v10 = vld [vmem:[%s11405_s1 + $0x13a8] ss:$16 sps:$4 sm:$0xff]  }
 0x23b   :  { %5368 = vmatpush1.bf16.msra.mxu0 %v8386_v11  ;;  %5927 = vmatpush1.bf16.msra.mxu1 %v8389_v12  ;;  %v8487_v11 = vld [vmem:[%s11405_s1 + $0x13c4] ss:$16 sps:$4 sm:$0xff]   ;;  %v8490_v12 = vld [vmem:[%s11405_s1 + $0x13cc] ss:$16 sps:$4 sm:$0xff]  }
 0x23c   :  { %5369 = vmatprep.subr.bf16.mxu0 %v8394_v13  ;;  %5928 = vmatprep.subr.bf16.mxu1 %v8397_v14  ;;  %v8485_v13 = vld [vmem:[%s11405_s1 + $0x13c0] ss:$16 sps:$4 sm:$0xff]   ;;  %v8488_v14 = vld [vmem:[%s11405_s1 + $0x13c8] ss:$16 sps:$4 sm:$0xff]  }
 0x23f   :  { %5370 = vmatpush1.bf16.msra.mxu0 %v8392_v15  ;;  %5929 = vmatpush1.bf16.msra.mxu1 %v8395_v16  ;;  %v8493_v15 = vld [vmem:[%s11405_s1 + $0x13e4] ss:$16 sps:$4 sm:$0xff]   ;;  %v8496_v16 = vld [vmem:[%s11405_s1 + $0x13ec] ss:$16 sps:$4 sm:$0xff]  }
 0x240   :  { %5382 = vmatprep.subr.bf16.mxu0 %v8403_v17  ;;  %5941 = vmatprep.subr.bf16.mxu1 %v8406_v18  ;;  %v8491_v17 = vld [vmem:[%s11405_s1 + $0x13e0] ss:$16 sps:$4 sm:$0xff]   ;;  %v8494_v18 = vld [vmem:[%s11405_s1 + $0x13e8] ss:$16 sps:$4 sm:$0xff]  }
 0x242   :  { %5372 = vmatmul.mubr.bf16.vlgmr.msra.gmra.mrb[0].mxu0 %v8398_v19  ;;  %5931 = vmatmul.mubr.bf16.vlgmr.msra.gmra.mrb[0].mxu1 %v8398_v19  ;;  %v8502_v19 = vld [vmem:[%s11405_s1 + $0x1404] ss:$16 sps:$4 sm:$0xff]  }
 0x243   :  { %5383 = vmatpush1.bf16.msra.mxu0 %v8401_v20  ;;  %5942 = vmatpush1.bf16.msra.mxu1 %v8404_v21  ;;  %v8505_v20 = vld [vmem:[%s11405_s1 + $0x140c] ss:$16 sps:$4 sm:$0xff]  }
 0x244   :  { %5384 = vmatprep.subr.bf16.mxu0 %v8409_v22  ;;  %5943 = vmatprep.subr.bf16.mxu1 %v8412_v23  ;;  %v8497_v21 = vld [vmem:[%s11406_s0 + $0x48] ss:$100 sps:$4 sm:$0xff]   ;;  %v8500_v22 = vld [vmem:[%s11405_s1 + $0x1400] ss:$16 sps:$4 sm:$0xff]  }
 0x245   :  { %5414 = vmatprep.mubr.bf16.mxu0 %v8499_v24  ;;  %5973 = vmatprep.mubr.bf16.mxu1 %v8499_v24  ;;  %v8503_v23 = vld [vmem:[%s11405_s1 + $0x1408] ss:$16 sps:$4 sm:$0xff]   ;;  %v8508_v24 = vld [vmem:[%s11405_s1 + $0x1424] ss:$16 sps:$4 sm:$0xff]  }
 0x247   :  { %5385 = vmatpush1.bf16.msra.mxu0 %v8407_v25  ;;  %5944 = vmatpush1.bf16.msra.mxu1 %v8410_v26  ;;  %v8511_v25 = vld [vmem:[%s11405_s1 + $0x142c] ss:$16 sps:$4 sm:$0xff]   ;;  %v8598_v26 = vld [vmem:[%s11406_s0 + $0x54] ss:$100 sps:$4 sm:$0xff]  }
 0x248   :  { %5386 = vmatprep.subr.bf16.mxu0 %v8415_v27  ;;  %5945 = vmatprep.subr.bf16.mxu1 %v8418_v28  ;;  %v8506_v27 = vld [vmem:[%s11405_s1 + $0x1420] ss:$16 sps:$4 sm:$0xff]   ;;  %v8509_v28 = vld [vmem:[%s11405_s1 + $0x1428] ss:$16 sps:$4 sm:$0xff]  }
 0x24b   :  { %5387 = vmatpush1.bf16.msra.mxu0 %v8413_v29  ;;  %5946 = vmatpush1.bf16.msra.mxu1 %v8416_v30  ;;  %v8514_v29 = vld [vmem:[%s11405_s1 + $0x1444] ss:$16 sps:$4 sm:$0xff]   ;;  %v8517_v30 = vld [vmem:[%s11405_s1 + $0x144c] ss:$16 sps:$4 sm:$0xff]  }
 0x24c   :  { %5388 = vmatprep.subr.bf16.mxu0 %v8421_v31  ;;  %5947 = vmatprep.subr.bf16.mxu1 %v8424_v32  ;;  %v8512_v31 = vld [vmem:[%s11405_s1 + $0x1440] ss:$16 sps:$4 sm:$0xff]   ;;  %v8515_v32 = vld [vmem:[%s11405_s1 + $0x1448] ss:$16 sps:$4 sm:$0xff]  }
 0x24f   :  { %5389 = vmatpush1.bf16.msra.mxu0 %v8419_v33  ;;  %5948 = vmatpush1.bf16.msra.mxu1 %v8422_v34  ;;  %v8520_v33 = vld [vmem:[%s11405_s1 + $0x1464] ss:$16 sps:$4 sm:$0xff]   ;;  %v8523_v34 = vld [vmem:[%s11405_s1 + $0x146c] ss:$16 sps:$4 sm:$0xff]  }
 0x250   :  { %5390 = vmatprep.subr.bf16.mxu0 %v8427_v35  ;;  %5949 = vmatprep.subr.bf16.mxu1 %v8430_v36  ;;  %v8518_v35 = vld [vmem:[%s11405_s1 + $0x1460] ss:$16 sps:$4 sm:$0xff]   ;;  %v8521_v36 = vld [vmem:[%s11405_s1 + $0x1468] ss:$16 sps:$4 sm:$0xff]  }
 0x253   :  { %5391 = vmatpush1.bf16.msra.mxu0 %v8425_v37  ;;  %5950 = vmatpush1.bf16.msra.mxu1 %v8428_v38  ;;  %v8526_v37 = vld [vmem:[%s11405_s1 + $0x1484] ss:$16 sps:$4 sm:$0xff]   ;;  %v8529_v38 = vld [vmem:[%s11405_s1 + $0x148c] ss:$16 sps:$4 sm:$0xff]  }
 0x254   :  { %5392 = vmatprep.subr.bf16.mxu0 %v8433_v39  ;;  %5951 = vmatprep.subr.bf16.mxu1 %v8436_v40  ;;  %v8524_v39 = vld [vmem:[%s11405_s1 + $0x1480] ss:$16 sps:$4 sm:$0xff]   ;;  %v8527_v40 = vld [vmem:[%s11405_s1 + $0x1488] ss:$16 sps:$4 sm:$0xff]  }
 0x257   :  { %5393 = vmatpush1.bf16.msra.mxu0 %v8431_v41  ;;  %5952 = vmatpush1.bf16.msra.mxu1 %v8434_v42  ;;  %v8532_v41 = vld [vmem:[%s11405_s1 + $0x14a4] ss:$16 sps:$4 sm:$0xff]   ;;  %v8535_v42 = vld [vmem:[%s11405_s1 + $0x14ac] ss:$16 sps:$4 sm:$0xff]  }
 0x258   :  { %5394 = vmatprep.subr.bf16.mxu0 %v8439_v43  ;;  %5953 = vmatprep.subr.bf16.mxu1 %v8442_v44  ;;  %v8530_v43 = vld [vmem:[%s11405_s1 + $0x14a0] ss:$16 sps:$4 sm:$0xff]   ;;  %v8533_v44 = vld [vmem:[%s11405_s1 + $0x14a8] ss:$16 sps:$4 sm:$0xff]  }
 0x25b   :  { %5395 = vmatpush1.bf16.msra.mxu0 %v8437_v45  ;;  %5954 = vmatpush1.bf16.msra.mxu1 %v8440_v46  ;;  %v8538_v45 = vld [vmem:[%s11405_s1 + $0x14c4] ss:$16 sps:$4 sm:$0xff]   ;;  %v8541_v46 = vld [vmem:[%s11405_s1 + $0x14cc] ss:$16 sps:$4 sm:$0xff]  }
 0x25c   :  { %5396 = vmatprep.subr.bf16.mxu0 %v8445_v47  ;;  %5955 = vmatprep.subr.bf16.mxu1 %v8448_v48  ;;  %v8536_v47 = vld [vmem:[%s11405_s1 + $0x14c0] ss:$16 sps:$4 sm:$0xff]   ;;  %v8539_v48 = vld [vmem:[%s11405_s1 + $0x14c8] ss:$16 sps:$4 sm:$0xff]  }
 0x25f   :  { %5397 = vmatpush1.bf16.msra.mxu0 %v8443_v49  ;;  %5956 = vmatpush1.bf16.msra.mxu1 %v8446_v50  ;;  %v8544_v49 = vld [vmem:[%s11405_s1 + $0x14e4] ss:$16 sps:$4 sm:$0xff]   ;;  %v8547_v50 = vld [vmem:[%s11405_s1 + $0x14ec] ss:$16 sps:$4 sm:$0xff]  }
 0x260   :  { %5398 = vmatprep.subr.bf16.mxu0 %v8451_v51  ;;  %5957 = vmatprep.subr.bf16.mxu1 %v8454_v52  ;;  %v8542_v51 = vld [vmem:[%s11405_s1 + $0x14e0] ss:$16 sps:$4 sm:$0xff]   ;;  %v8545_v52 = vld [vmem:[%s11405_s1 + $0x14e8] ss:$16 sps:$4 sm:$0xff]  }
 0x263   :  { %5399 = vmatpush1.bf16.msra.mxu0 %v8449_v53  ;;  %5958 = vmatpush1.bf16.msra.mxu1 %v8452_v54  ;;  %v8550_v53 = vld [vmem:[%s11405_s1 + $0x1504] ss:$16 sps:$4 sm:$0xff]   ;;  %v8553_v54 = vld [vmem:[%s11405_s1 + $0x150c] ss:$16 sps:$4 sm:$0xff]  }
 0x264   :  { %5400 = vmatprep.subr.bf16.mxu0 %v8457_v55  ;;  %5959 = vmatprep.subr.bf16.mxu1 %v8460_v56  ;;  %v8548_v55 = vld [vmem:[%s11405_s1 + $0x1500] ss:$16 sps:$4 sm:$0xff]   ;;  %v8551_v56 = vld [vmem:[%s11405_s1 + $0x1508] ss:$16 sps:$4 sm:$0xff]  }
 0x267   :  { %5401 = vmatpush1.bf16.msra.mxu0 %v8455_v57  ;;  %5960 = vmatpush1.bf16.msra.mxu1 %v8458_v58  ;;  %v8556_v57 = vld [vmem:[%s11405_s1 + $0x1524] ss:$16 sps:$4 sm:$0xff]   ;;  %v8559_v58 = vld [vmem:[%s11405_s1 + $0x152c] ss:$16 sps:$4 sm:$0xff]  }
 0x268   :  { %5402 = vmatprep.subr.bf16.mxu0 %v8463_v59  ;;  %5961 = vmatprep.subr.bf16.mxu1 %v8466_v60  ;;  %v8554_v59 = vld [vmem:[%s11405_s1 + $0x1520] ss:$16 sps:$4 sm:$0xff]   ;;  %v8557_v60 = vld [vmem:[%s11405_s1 + $0x1528] ss:$16 sps:$4 sm:$0xff]  }
 0x26b   :  { %5403 = vmatpush1.bf16.msra.mxu0 %v8461_v61  ;;  %5962 = vmatpush1.bf16.msra.mxu1 %v8464_v62  ;;  %v8562_v61 = vld [vmem:[%s11405_s1 + $0x1544] ss:$16 sps:$4 sm:$0xff]   ;;  %v8565_v62 = vld [vmem:[%s11405_s1 + $0x154c] ss:$16 sps:$4 sm:$0xff]  }
 0x26c   :  { %5404 = vmatprep.subr.bf16.mxu0 %v8469_v63  ;;  %5963 = vmatprep.subr.bf16.mxu1 %v8472_v0  ;;  %v8560_v63 = vld [vmem:[%s11405_s1 + $0x1540] ss:$16 sps:$4 sm:$0xff]   ;;  %v8563_v0 = vld [vmem:[%s11405_s1 + $0x1548] ss:$16 sps:$4 sm:$0xff]  }
 0x26f   :  { %5405 = vmatpush1.bf16.msra.mxu0 %v8467_v1  ;;  %5964 = vmatpush1.bf16.msra.mxu1 %v8470_v2  ;;  %v8568_v1 = vld [vmem:[%s11405_s1 + $0x1564] ss:$16 sps:$4 sm:$0xff]   ;;  %v8571_v2 = vld [vmem:[%s11405_s1 + $0x156c] ss:$16 sps:$4 sm:$0xff]  }
 0x270   :  { %5406 = vmatprep.subr.bf16.mxu0 %v8475_v3  ;;  %5965 = vmatprep.subr.bf16.mxu1 %v8478_v4  ;;  %v8566_v3 = vld [vmem:[%s11405_s1 + $0x1560] ss:$16 sps:$4 sm:$0xff]   ;;  %v8569_v4 = vld [vmem:[%s11405_s1 + $0x1568] ss:$16 sps:$4 sm:$0xff]  }
 0x273   :  { %5407 = vmatpush1.bf16.msra.mxu0 %v8473_v5  ;;  %5966 = vmatpush1.bf16.msra.mxu1 %v8476_v6  ;;  %v8574_v5 = vld [vmem:[%s11405_s1 + $0x1584] ss:$16 sps:$4 sm:$0xff]   ;;  %v8577_v6 = vld [vmem:[%s11405_s1 + $0x158c] ss:$16 sps:$4 sm:$0xff]  }
 0x274   :  { %5408 = vmatprep.subr.bf16.mxu0 %v8481_v7  ;;  %5967 = vmatprep.subr.bf16.mxu1 %v8484_v8  ;;  %v8572_v7 = vld [vmem:[%s11405_s1 + $0x1580] ss:$16 sps:$4 sm:$0xff]   ;;  %v8575_v8 = vld [vmem:[%s11405_s1 + $0x1588] ss:$16 sps:$4 sm:$0xff]  }
 0x277   :  { %5409 = vmatpush1.bf16.msra.mxu0 %v8479_v9  ;;  %5968 = vmatpush1.bf16.msra.mxu1 %v8482_v10  ;;  %v8580_v9 = vld [vmem:[%s11405_s1 + $0x15a4] ss:$16 sps:$4 sm:$0xff]   ;;  %v8583_v10 = vld [vmem:[%s11405_s1 + $0x15ac] ss:$16 sps:$4 sm:$0xff]  }
 0x278   :  { %5410 = vmatprep.subr.bf16.mxu0 %v8487_v11  ;;  %5969 = vmatprep.subr.bf16.mxu1 %v8490_v12  ;;  %v8578_v11 = vld [vmem:[%s11405_s1 + $0x15a0] ss:$16 sps:$4 sm:$0xff]   ;;  %v8581_v12 = vld [vmem:[%s11405_s1 + $0x15a8] ss:$16 sps:$4 sm:$0xff]  }
 0x27b   :  { %5411 = vmatpush1.bf16.msra.mxu0 %v8485_v13  ;;  %5970 = vmatpush1.bf16.msra.mxu1 %v8488_v14  ;;  %v8586_v13 = vld [vmem:[%s11405_s1 + $0x15c4] ss:$16 sps:$4 sm:$0xff]   ;;  %v8589_v14 = vld [vmem:[%s11405_s1 + $0x15cc] ss:$16 sps:$4 sm:$0xff]  }
 0x27c   :  { %5412 = vmatprep.subr.bf16.mxu0 %v8493_v15  ;;  %5971 = vmatprep.subr.bf16.mxu1 %v8496_v16  ;;  %v8584_v15 = vld [vmem:[%s11405_s1 + $0x15c0] ss:$16 sps:$4 sm:$0xff]   ;;  %v8587_v16 = vld [vmem:[%s11405_s1 + $0x15c8] ss:$16 sps:$4 sm:$0xff]  }
 0x27f   :  { %5413 = vmatpush1.bf16.msra.mxu0 %v8491_v17  ;;  %5972 = vmatpush1.bf16.msra.mxu1 %v8494_v18  ;;  %v8592_v17 = vld [vmem:[%s11405_s1 + $0x15e4] ss:$16 sps:$4 sm:$0xff]   ;;  %v8595_v18 = vld [vmem:[%s11405_s1 + $0x15ec] ss:$16 sps:$4 sm:$0xff]  }
 0x280   :  { %5425 = vmatprep.subr.bf16.mxu0 %v8502_v19  ;;  %5984 = vmatprep.subr.bf16.mxu1 %v8505_v20  ;;  %v8590_v19 = vld [vmem:[%s11405_s1 + $0x15e0] ss:$16 sps:$4 sm:$0xff]   ;;  %v8593_v20 = vld [vmem:[%s11405_s1 + $0x15e8] ss:$16 sps:$4 sm:$0xff]  }
 0x282   :  { %5415 = vmatmul.mubr.bf16.vlgmr.msra.gmra.mrb[0].mxu0 %v8497_v21  ;;  %5974 = vmatmul.mubr.bf16.vlgmr.msra.gmra.mrb[0].mxu1 %v8497_v21  ;;  %v8601_v21 = vld [vmem:[%s11405_s1 + $0x1604] ss:$16 sps:$4 sm:$0xff]  }
 0x283   :  { %5426 = vmatpush1.bf16.msra.mxu0 %v8500_v22  ;;  %5985 = vmatpush1.bf16.msra.mxu1 %v8503_v23  ;;  %v8604_v22 = vld [vmem:[%s11405_s1 + $0x160c] ss:$16 sps:$4 sm:$0xff]   ;;  %v8596_v23 = vld [vmem:[%s11406_s0 + $0x50] ss:$100 sps:$4 sm:$0xff]  }
 0x284   :  { %5427 = vmatprep.subr.bf16.mxu0 %v8508_v24  ;;  %5986 = vmatprep.subr.bf16.mxu1 %v8511_v25  ;;  %v8599_v24 = vld [vmem:[%s11405_s1 + $0x1600] ss:$16 sps:$4 sm:$0xff]   ;;  %v8602_v25 = vld [vmem:[%s11405_s1 + $0x1608] ss:$16 sps:$4 sm:$0xff]  }
 0x285   :  { %5457 = vmatprep.mubr.bf16.mxu0 %v8598_v26  ;;  %6016 = vmatprep.mubr.bf16.mxu1 %v8598_v26  ;;  %v8607_v26 = vld [vmem:[%s11405_s1 + $0x1624] ss:$16 sps:$4 sm:$0xff]  }
 0x287   :  { %5428 = vmatpush1.bf16.msra.mxu0 %v8506_v27  ;;  %5987 = vmatpush1.bf16.msra.mxu1 %v8509_v28  ;;  %v8610_v27 = vld [vmem:[%s11405_s1 + $0x162c] ss:$16 sps:$4 sm:$0xff]  }
 0x288   :  { %5429 = vmatprep.subr.bf16.mxu0 %v8514_v29  ;;  %5988 = vmatprep.subr.bf16.mxu1 %v8517_v30  ;;  %v8697_v28 = vld [vmem:[%s11406_s0 + $0x5c] ss:$100 sps:$4 sm:$0xff]   ;;  %v8608_v30 = vld [vmem:[%s11405_s1 + $0x1628] ss:$16 sps:$4 sm:$0xff]  }
 0x289   :  { %v8605_v29 = vld [vmem:[%s11405_s1 + $0x1620] ss:$16 sps:$4 sm:$0xff]  }
 0x28b   :  { %5430 = vmatpush1.bf16.msra.mxu0 %v8512_v31  ;;  %5989 = vmatpush1.bf16.msra.mxu1 %v8515_v32  ;;  %v8613_v31 = vld [vmem:[%s11405_s1 + $0x1644] ss:$16 sps:$4 sm:$0xff]   ;;  %v8616_v32 = vld [vmem:[%s11405_s1 + $0x164c] ss:$16 sps:$4 sm:$0xff]  }
 0x28c   :  { %5431 = vmatprep.subr.bf16.mxu0 %v8520_v33  ;;  %5990 = vmatprep.subr.bf16.mxu1 %v8523_v34  ;;  %v8611_v33 = vld [vmem:[%s11405_s1 + $0x1640] ss:$16 sps:$4 sm:$0xff]   ;;  %v8614_v34 = vld [vmem:[%s11405_s1 + $0x1648] ss:$16 sps:$4 sm:$0xff]  }
 0x28f   :  { %5432 = vmatpush1.bf16.msra.mxu0 %v8518_v35  ;;  %5991 = vmatpush1.bf16.msra.mxu1 %v8521_v36  ;;  %v8619_v35 = vld [vmem:[%s11405_s1 + $0x1664] ss:$16 sps:$4 sm:$0xff]   ;;  %v8622_v36 = vld [vmem:[%s11405_s1 + $0x166c] ss:$16 sps:$4 sm:$0xff]  }
 0x290   :  { %5433 = vmatprep.subr.bf16.mxu0 %v8526_v37  ;;  %5992 = vmatprep.subr.bf16.mxu1 %v8529_v38  ;;  %v8617_v37 = vld [vmem:[%s11405_s1 + $0x1660] ss:$16 sps:$4 sm:$0xff]   ;;  %v8620_v38 = vld [vmem:[%s11405_s1 + $0x1668] ss:$16 sps:$4 sm:$0xff]  }
 0x293   :  { %5434 = vmatpush1.bf16.msra.mxu0 %v8524_v39  ;;  %5993 = vmatpush1.bf16.msra.mxu1 %v8527_v40  ;;  %v8625_v39 = vld [vmem:[%s11405_s1 + $0x1684] ss:$16 sps:$4 sm:$0xff]   ;;  %v8628_v40 = vld [vmem:[%s11405_s1 + $0x168c] ss:$16 sps:$4 sm:$0xff]  }
 0x294   :  { %5435 = vmatprep.subr.bf16.mxu0 %v8532_v41  ;;  %5994 = vmatprep.subr.bf16.mxu1 %v8535_v42  ;;  %v8623_v41 = vld [vmem:[%s11405_s1 + $0x1680] ss:$16 sps:$4 sm:$0xff]   ;;  %v8626_v42 = vld [vmem:[%s11405_s1 + $0x1688] ss:$16 sps:$4 sm:$0xff]  }
 0x297   :  { %5436 = vmatpush1.bf16.msra.mxu0 %v8530_v43  ;;  %5995 = vmatpush1.bf16.msra.mxu1 %v8533_v44  ;;  %v8631_v43 = vld [vmem:[%s11405_s1 + $0x16a4] ss:$16 sps:$4 sm:$0xff]   ;;  %v8634_v44 = vld [vmem:[%s11405_s1 + $0x16ac] ss:$16 sps:$4 sm:$0xff]  }
 0x298   :  { %5437 = vmatprep.subr.bf16.mxu0 %v8538_v45  ;;  %5996 = vmatprep.subr.bf16.mxu1 %v8541_v46  ;;  %v8629_v45 = vld [vmem:[%s11405_s1 + $0x16a0] ss:$16 sps:$4 sm:$0xff]   ;;  %v8632_v46 = vld [vmem:[%s11405_s1 + $0x16a8] ss:$16 sps:$4 sm:$0xff]  }
 0x29b   :  { %5438 = vmatpush1.bf16.msra.mxu0 %v8536_v47  ;;  %5997 = vmatpush1.bf16.msra.mxu1 %v8539_v48  ;;  %v8637_v47 = vld [vmem:[%s11405_s1 + $0x16c4] ss:$16 sps:$4 sm:$0xff]   ;;  %v8640_v48 = vld [vmem:[%s11405_s1 + $0x16cc] ss:$16 sps:$4 sm:$0xff]  }
 0x29c   :  { %5439 = vmatprep.subr.bf16.mxu0 %v8544_v49  ;;  %5998 = vmatprep.subr.bf16.mxu1 %v8547_v50  ;;  %v8635_v49 = vld [vmem:[%s11405_s1 + $0x16c0] ss:$16 sps:$4 sm:$0xff]   ;;  %v8638_v50 = vld [vmem:[%s11405_s1 + $0x16c8] ss:$16 sps:$4 sm:$0xff]  }
 0x29f   :  { %5440 = vmatpush1.bf16.msra.mxu0 %v8542_v51  ;;  %5999 = vmatpush1.bf16.msra.mxu1 %v8545_v52  ;;  %v8643_v51 = vld [vmem:[%s11405_s1 + $0x16e4] ss:$16 sps:$4 sm:$0xff]   ;;  %v8646_v52 = vld [vmem:[%s11405_s1 + $0x16ec] ss:$16 sps:$4 sm:$0xff]  }
 0x2a0   :  { %5441 = vmatprep.subr.bf16.mxu0 %v8550_v53  ;;  %6000 = vmatprep.subr.bf16.mxu1 %v8553_v54  ;;  %v8641_v53 = vld [vmem:[%s11405_s1 + $0x16e0] ss:$16 sps:$4 sm:$0xff]   ;;  %v8644_v54 = vld [vmem:[%s11405_s1 + $0x16e8] ss:$16 sps:$4 sm:$0xff]  }
 0x2a3   :  { %5442 = vmatpush1.bf16.msra.mxu0 %v8548_v55  ;;  %6001 = vmatpush1.bf16.msra.mxu1 %v8551_v56  ;;  %v8649_v55 = vld [vmem:[%s11405_s1 + $0x1704] ss:$16 sps:$4 sm:$0xff]   ;;  %v8652_v56 = vld [vmem:[%s11405_s1 + $0x170c] ss:$16 sps:$4 sm:$0xff]  }
 0x2a4   :  { %5443 = vmatprep.subr.bf16.mxu0 %v8556_v57  ;;  %6002 = vmatprep.subr.bf16.mxu1 %v8559_v58  ;;  %v8647_v57 = vld [vmem:[%s11405_s1 + $0x1700] ss:$16 sps:$4 sm:$0xff]   ;;  %v8650_v58 = vld [vmem:[%s11405_s1 + $0x1708] ss:$16 sps:$4 sm:$0xff]  }
 0x2a7   :  { %5444 = vmatpush1.bf16.msra.mxu0 %v8554_v59  ;;  %6003 = vmatpush1.bf16.msra.mxu1 %v8557_v60  ;;  %v8655_v59 = vld [vmem:[%s11405_s1 + $0x1724] ss:$16 sps:$4 sm:$0xff]   ;;  %v8658_v60 = vld [vmem:[%s11405_s1 + $0x172c] ss:$16 sps:$4 sm:$0xff]  }
 0x2a8   :  { %5445 = vmatprep.subr.bf16.mxu0 %v8562_v61  ;;  %6004 = vmatprep.subr.bf16.mxu1 %v8565_v62  ;;  %v8653_v61 = vld [vmem:[%s11405_s1 + $0x1720] ss:$16 sps:$4 sm:$0xff]   ;;  %v8656_v62 = vld [vmem:[%s11405_s1 + $0x1728] ss:$16 sps:$4 sm:$0xff]  }
 0x2ab   :  { %5446 = vmatpush1.bf16.msra.mxu0 %v8560_v63  ;;  %6005 = vmatpush1.bf16.msra.mxu1 %v8563_v0  ;;  %v8661_v63 = vld [vmem:[%s11405_s1 + $0x1744] ss:$16 sps:$4 sm:$0xff]   ;;  %v8664_v0 = vld [vmem:[%s11405_s1 + $0x174c] ss:$16 sps:$4 sm:$0xff]  }
 0x2ac   :  { %5447 = vmatprep.subr.bf16.mxu0 %v8568_v1  ;;  %6006 = vmatprep.subr.bf16.mxu1 %v8571_v2  ;;  %v8659_v1 = vld [vmem:[%s11405_s1 + $0x1740] ss:$16 sps:$4 sm:$0xff]   ;;  %v8662_v2 = vld [vmem:[%s11405_s1 + $0x1748] ss:$16 sps:$4 sm:$0xff]  }
 0x2af   :  { %5448 = vmatpush1.bf16.msra.mxu0 %v8566_v3  ;;  %6007 = vmatpush1.bf16.msra.mxu1 %v8569_v4  ;;  %v8667_v3 = vld [vmem:[%s11405_s1 + $0x1764] ss:$16 sps:$4 sm:$0xff]   ;;  %v8670_v4 = vld [vmem:[%s11405_s1 + $0x176c] ss:$16 sps:$4 sm:$0xff]  }
 0x2b0   :  { %5449 = vmatprep.subr.bf16.mxu0 %v8574_v5  ;;  %6008 = vmatprep.subr.bf16.mxu1 %v8577_v6  ;;  %v8665_v5 = vld [vmem:[%s11405_s1 + $0x1760] ss:$16 sps:$4 sm:$0xff]   ;;  %v8668_v6 = vld [vmem:[%s11405_s1 + $0x1768] ss:$16 sps:$4 sm:$0xff]  }
 0x2b3   :  { %5450 = vmatpush1.bf16.msra.mxu0 %v8572_v7  ;;  %6009 = vmatpush1.bf16.msra.mxu1 %v8575_v8  ;;  %v8673_v7 = vld [vmem:[%s11405_s1 + $0x1784] ss:$16 sps:$4 sm:$0xff]   ;;  %v8676_v8 = vld [vmem:[%s11405_s1 + $0x178c] ss:$16 sps:$4 sm:$0xff]  }
 0x2b4   :  { %5451 = vmatprep.subr.bf16.mxu0 %v8580_v9  ;;  %6010 = vmatprep.subr.bf16.mxu1 %v8583_v10  ;;  %v8671_v9 = vld [vmem:[%s11405_s1 + $0x1780] ss:$16 sps:$4 sm:$0xff]   ;;  %v8674_v10 = vld [vmem:[%s11405_s1 + $0x1788] ss:$16 sps:$4 sm:$0xff]  }
 0x2b7   :  { %5452 = vmatpush1.bf16.msra.mxu0 %v8578_v11  ;;  %6011 = vmatpush1.bf16.msra.mxu1 %v8581_v12  ;;  %v8679_v11 = vld [vmem:[%s11405_s1 + $0x17a4] ss:$16 sps:$4 sm:$0xff]   ;;  %v8682_v12 = vld [vmem:[%s11405_s1 + $0x17ac] ss:$16 sps:$4 sm:$0xff]  }
 0x2b8   :  { %5453 = vmatprep.subr.bf16.mxu0 %v8586_v13  ;;  %6012 = vmatprep.subr.bf16.mxu1 %v8589_v14  ;;  %v8677_v13 = vld [vmem:[%s11405_s1 + $0x17a0] ss:$16 sps:$4 sm:$0xff]   ;;  %v8680_v14 = vld [vmem:[%s11405_s1 + $0x17a8] ss:$16 sps:$4 sm:$0xff]  }
 0x2bb   :  { %5454 = vmatpush1.bf16.msra.mxu0 %v8584_v15  ;;  %6013 = vmatpush1.bf16.msra.mxu1 %v8587_v16  ;;  %v8685_v15 = vld [vmem:[%s11405_s1 + $0x17c4] ss:$16 sps:$4 sm:$0xff]   ;;  %v8688_v16 = vld [vmem:[%s11405_s1 + $0x17cc] ss:$16 sps:$4 sm:$0xff]  }
 0x2bc   :  { %5455 = vmatprep.subr.bf16.mxu0 %v8592_v17  ;;  %6014 = vmatprep.subr.bf16.mxu1 %v8595_v18  ;;  %v8683_v17 = vld [vmem:[%s11405_s1 + $0x17c0] ss:$16 sps:$4 sm:$0xff]   ;;  %v8686_v18 = vld [vmem:[%s11405_s1 + $0x17c8] ss:$16 sps:$4 sm:$0xff]  }
 0x2bf   :  { %5456 = vmatpush1.bf16.msra.mxu0 %v8590_v19  ;;  %6015 = vmatpush1.bf16.msra.mxu1 %v8593_v20  ;;  %v8691_v19 = vld [vmem:[%s11405_s1 + $0x17e4] ss:$16 sps:$4 sm:$0xff]   ;;  %v8694_v20 = vld [vmem:[%s11405_s1 + $0x17ec] ss:$16 sps:$4 sm:$0xff]  }
 0x2c0   :  { %5468 = vmatprep.subr.bf16.mxu0 %v8601_v21  ;;  %6027 = vmatprep.subr.bf16.mxu1 %v8604_v22  ;;  %v8689_v21 = vld [vmem:[%s11405_s1 + $0x17e0] ss:$16 sps:$4 sm:$0xff]   ;;  %v8692_v22 = vld [vmem:[%s11405_s1 + $0x17e8] ss:$16 sps:$4 sm:$0xff]  }
 0x2c2   :  { %5458 = vmatmul.mubr.bf16.vlgmr.msra.gmra.mrb[0].mxu0 %v8596_v23  ;;  %6017 = vmatmul.mubr.bf16.vlgmr.msra.gmra.mrb[0].mxu1 %v8596_v23  ;;  %v8700_v23 = vld [vmem:[%s11405_s1 + $0x1804] ss:$16 sps:$4 sm:$0xff]  }
 0x2c3   :  { %5469 = vmatpush1.bf16.msra.mxu0 %v8599_v24  ;;  %6028 = vmatpush1.bf16.msra.mxu1 %v8602_v25  ;;  %v8703_v24 = vld [vmem:[%s11405_s1 + $0x180c] ss:$16 sps:$4 sm:$0xff]  }
 0x2c4   :  { %5470 = vmatprep.subr.bf16.mxu0 %v8607_v26  ;;  %6029 = vmatprep.subr.bf16.mxu1 %v8610_v27  ;;  %v8695_v25 = vld [vmem:[%s11406_s0 + $0x58] ss:$100 sps:$4 sm:$0xff]   ;;  %v8698_v26 = vld [vmem:[%s11405_s1 + $0x1800] ss:$16 sps:$4 sm:$0xff]  }
 0x2c5   :  { %5500 = vmatprep.mubr.bf16.mxu0 %v8697_v28  ;;  %6059 = vmatprep.mubr.bf16.mxu1 %v8697_v28  ;;  %v8701_v27 = vld [vmem:[%s11405_s1 + $0x1808] ss:$16 sps:$4 sm:$0xff]   ;;  %v8706_v28 = vld [vmem:[%s11405_s1 + $0x1824] ss:$16 sps:$4 sm:$0xff]  }
 0x2c7   :  { %5471 = vmatpush1.bf16.msra.mxu0 %v8605_v29  ;;  %6030 = vmatpush1.bf16.msra.mxu1 %v8608_v30  ;;  %v8709_v29 = vld [vmem:[%s11405_s1 + $0x182c] ss:$16 sps:$4 sm:$0xff]   ;;  %v8704_v30 = vld [vmem:[%s11405_s1 + $0x1820] ss:$16 sps:$4 sm:$0xff]  }
 0x2c8   :  { %5472 = vmatprep.subr.bf16.mxu0 %v8613_v31  ;;  %6031 = vmatprep.subr.bf16.mxu1 %v8616_v32  ;;  %v8707_v31 = vld [vmem:[%s11405_s1 + $0x1828] ss:$16 sps:$4 sm:$0xff]   ;;  %v8712_v32 = vld [vmem:[%s11405_s1 + $0x1844] ss:$16 sps:$4 sm:$0xff]  }
 0x2cb   :  { %5473 = vmatpush1.bf16.msra.mxu0 %v8611_v33  ;;  %6032 = vmatpush1.bf16.msra.mxu1 %v8614_v34  ;;  %v8715_v33 = vld [vmem:[%s11405_s1 + $0x184c] ss:$16 sps:$4 sm:$0xff]   ;;  %v8787_v34 = vmov 0  }
 0x2cc   :  { %5474 = vmatprep.subr.bf16.mxu0 %v8619_v35  ;;  %6033 = vmatprep.subr.bf16.mxu1 %v8622_v36  ;;  %v8710_v35 = vld [vmem:[%s11405_s1 + $0x1840] ss:$16 sps:$4 sm:$0xff]   ;;  %v8713_v36 = vld [vmem:[%s11405_s1 + $0x1848] ss:$16 sps:$4 sm:$0xff]  }
 0x2cf   :  { %5475 = vmatpush1.bf16.msra.mxu0 %v8617_v37  ;;  %6034 = vmatpush1.bf16.msra.mxu1 %v8620_v38  ;;  %v8718_v37 = vld [vmem:[%s11405_s1 + $0x1864] ss:$16 sps:$4 sm:$0xff]   ;;  %v8721_v38 = vld [vmem:[%s11405_s1 + $0x186c] ss:$16 sps:$4 sm:$0xff]  }
 0x2d0   :  { %5476 = vmatprep.subr.bf16.mxu0 %v8625_v39  ;;  %6035 = vmatprep.subr.bf16.mxu1 %v8628_v40  ;;  %v8716_v39 = vld [vmem:[%s11405_s1 + $0x1860] ss:$16 sps:$4 sm:$0xff]   ;;  %v8719_v40 = vld [vmem:[%s11405_s1 + $0x1868] ss:$16 sps:$4 sm:$0xff]  }
 0x2d3   :  { %5477 = vmatpush1.bf16.msra.mxu0 %v8623_v41  ;;  %6036 = vmatpush1.bf16.msra.mxu1 %v8626_v42  ;;  %v8724_v41 = vld [vmem:[%s11405_s1 + $0x1884] ss:$16 sps:$4 sm:$0xff]   ;;  %v8727_v42 = vld [vmem:[%s11405_s1 + $0x188c] ss:$16 sps:$4 sm:$0xff]  }
 0x2d4   :  { %5478 = vmatprep.subr.bf16.mxu0 %v8631_v43  ;;  %6037 = vmatprep.subr.bf16.mxu1 %v8634_v44  ;;  %v8722_v43 = vld [vmem:[%s11405_s1 + $0x1880] ss:$16 sps:$4 sm:$0xff]   ;;  %v8725_v44 = vld [vmem:[%s11405_s1 + $0x1888] ss:$16 sps:$4 sm:$0xff]  }
 0x2d7   :  { %5479 = vmatpush1.bf16.msra.mxu0 %v8629_v45  ;;  %6038 = vmatpush1.bf16.msra.mxu1 %v8632_v46  ;;  %v8730_v45 = vld [vmem:[%s11405_s1 + $0x18a4] ss:$16 sps:$4 sm:$0xff]   ;;  %v8733_v46 = vld [vmem:[%s11405_s1 + $0x18ac] ss:$16 sps:$4 sm:$0xff]  }
 0x2d8   :  { %5480 = vmatprep.subr.bf16.mxu0 %v8637_v47  ;;  %6039 = vmatprep.subr.bf16.mxu1 %v8640_v48  ;;  %v8728_v47 = vld [vmem:[%s11405_s1 + $0x18a0] ss:$16 sps:$4 sm:$0xff]   ;;  %v8731_v48 = vld [vmem:[%s11405_s1 + $0x18a8] ss:$16 sps:$4 sm:$0xff]  }
 0x2db   :  { %5481 = vmatpush1.bf16.msra.mxu0 %v8635_v49  ;;  %6040 = vmatpush1.bf16.msra.mxu1 %v8638_v50  ;;  %v8736_v49 = vld [vmem:[%s11405_s1 + $0x18c4] ss:$16 sps:$4 sm:$0xff]   ;;  %v8739_v50 = vld [vmem:[%s11405_s1 + $0x18cc] ss:$16 sps:$4 sm:$0xff]  }
 0x2dc   :  { %5482 = vmatprep.subr.bf16.mxu0 %v8643_v51  ;;  %6041 = vmatprep.subr.bf16.mxu1 %v8646_v52  ;;  %v8734_v51 = vld [vmem:[%s11405_s1 + $0x18c0] ss:$16 sps:$4 sm:$0xff]   ;;  %v8737_v52 = vld [vmem:[%s11405_s1 + $0x18c8] ss:$16 sps:$4 sm:$0xff]  }
 0x2df   :  { %5483 = vmatpush1.bf16.msra.mxu0 %v8641_v53  ;;  %6042 = vmatpush1.bf16.msra.mxu1 %v8644_v54  ;;  %v8742_v53 = vld [vmem:[%s11405_s1 + $0x18e4] ss:$16 sps:$4 sm:$0xff]   ;;  %v8745_v54 = vld [vmem:[%s11405_s1 + $0x18ec] ss:$16 sps:$4 sm:$0xff]  }
 0x2e0   :  { %5484 = vmatprep.subr.bf16.mxu0 %v8649_v55  ;;  %6043 = vmatprep.subr.bf16.mxu1 %v8652_v56  ;;  %v8740_v55 = vld [vmem:[%s11405_s1 + $0x18e0] ss:$16 sps:$4 sm:$0xff]   ;;  %v8743_v56 = vld [vmem:[%s11405_s1 + $0x18e8] ss:$16 sps:$4 sm:$0xff]  }
 0x2e3   :  { %5485 = vmatpush1.bf16.msra.mxu0 %v8647_v57  ;;  %6044 = vmatpush1.bf16.msra.mxu1 %v8650_v58  ;;  %v8747_v57 = vld [vmem:[%s11407_s3 + $0x40] sm:$0xff]  }
 0x2e4   :  { %5486 = vmatprep.subr.bf16.mxu0 %v8655_v59  ;;  %6045 = vmatprep.subr.bf16.mxu1 %v8658_v60  ;;  %v8748_v58 = vld [vmem:[%s11407_s3 + $0xc0] sm:$0xff]  }
 0x2e5   :  { %v8746_v59 = vld [vmem:[%s11406_s0 + $0x60] ss:$100 sps:$4 sm:$0xff]  }
 0x2e6   :  { %v8749_v60 = vld [vmem:[%s11407_s3] sm:$0xff]  }
 0x2e7   :  { %5487 = vmatpush1.bf16.msra.mxu0 %v8653_v61  ;;  %6046 = vmatpush1.bf16.msra.mxu1 %v8656_v62  ;;  %v8750_v61 = vld [vmem:[%s11407_s3 + $0x80] sm:$0xff]   ;;  %v8751_v62 = vld [vmem:[%s11407_s3 + $0x48] sm:$0xff]  }
 0x2e8   :  { %5488 = vmatprep.subr.bf16.mxu0 %v8661_v63  ;;  %6047 = vmatprep.subr.bf16.mxu1 %v8664_v0  ;;  %v8752_v63 = vld [vmem:[%s11407_s3 + $0xc8] sm:$0xff]  }
 0x2e9   :  { %v8753_v0 = vld [vmem:[%s11407_s3 + $0x8] sm:$0xff]  }
 0x2eb   :  { %5489 = vmatpush1.bf16.msra.mxu0 %v8659_v1  ;;  %6048 = vmatpush1.bf16.msra.mxu1 %v8662_v2  ;;  %v8754_v1 = vld [vmem:[%s11407_s3 + $0x88] sm:$0xff]   ;;  %v8755_v2 = vld [vmem:[%s11407_s3 + $0x50] sm:$0xff]  }
 0x2ec   :  { %5490 = vmatprep.subr.bf16.mxu0 %v8667_v3  ;;  %6049 = vmatprep.subr.bf16.mxu1 %v8670_v4  ;;  %v8756_v3 = vld [vmem:[%s11407_s3 + $0xd0] sm:$0xff]  }
 0x2ed   :  { %v8757_v4 = vld [vmem:[%s11407_s3 + $0x10] sm:$0xff]  }
 0x2ef   :  { %5491 = vmatpush1.bf16.msra.mxu0 %v8665_v5  ;;  %6050 = vmatpush1.bf16.msra.mxu1 %v8668_v6  ;;  %v8758_v5 = vld [vmem:[%s11407_s3 + $0x90] sm:$0xff]   ;;  %v8759_v6 = vld [vmem:[%s11407_s3 + $0x58] sm:$0xff]  }
 0x2f0   :  { %5492 = vmatprep.subr.bf16.mxu0 %v8673_v7  ;;  %6051 = vmatprep.subr.bf16.mxu1 %v8676_v8  ;;  %v8760_v7 = vld [vmem:[%s11407_s3 + $0xd8] sm:$0xff]  }
 0x2f1   :  { %v8761_v8 = vld [vmem:[%s11407_s3 + $0x18] sm:$0xff]  }
 0x2f3   :  { %5493 = vmatpush1.bf16.msra.mxu0 %v8671_v9  ;;  %6052 = vmatpush1.bf16.msra.mxu1 %v8674_v10  ;;  %v8762_v9 = vld [vmem:[%s11407_s3 + $0x98] sm:$0xff]   ;;  %v8763_v10 = vld [vmem:[%s11407_s3 + $0x60] sm:$0xff]  }
 0x2f4   :  { %5494 = vmatprep.subr.bf16.mxu0 %v8679_v11  ;;  %6053 = vmatprep.subr.bf16.mxu1 %v8682_v12  ;;  %v8764_v11 = vld [vmem:[%s11407_s3 + $0xe0] sm:$0xff]  }
 0x2f5   :  { %v8765_v12 = vld [vmem:[%s11407_s3 + $0x20] sm:$0xff]  }
 0x2f7   :  { %5495 = vmatpush1.bf16.msra.mxu0 %v8677_v13  ;;  %6054 = vmatpush1.bf16.msra.mxu1 %v8680_v14  ;;  %v8766_v13 = vld [vmem:[%s11407_s3 + $0xa0] sm:$0xff]   ;;  %v8767_v14 = vld [vmem:[%s11407_s3 + $0x68] sm:$0xff]  }
 0x2f8   :  { %5496 = vmatprep.subr.bf16.mxu0 %v8685_v15  ;;  %6055 = vmatprep.subr.bf16.mxu1 %v8688_v16  ;;  %v8768_v15 = vld [vmem:[%s11407_s3 + $0xe8] sm:$0xff]  }
 0x2f9   :  { %v8769_v16 = vld [vmem:[%s11407_s3 + $0x28] sm:$0xff]  }
 0x2fb   :  { %5497 = vmatpush1.bf16.msra.mxu0 %v8683_v17  ;;  %6056 = vmatpush1.bf16.msra.mxu1 %v8686_v18  ;;  %v8770_v17 = vld [vmem:[%s11407_s3 + $0xa8] sm:$0xff]   ;;  %v8771_v18 = vld [vmem:[%s11407_s3 + $0x70] sm:$0xff]  }
 0x2fc   :  { %5498 = vmatprep.subr.bf16.mxu0 %v8691_v19  ;;  %6057 = vmatprep.subr.bf16.mxu1 %v8694_v20  ;;  %v8772_v19 = vld [vmem:[%s11407_s3 + $0xf0] sm:$0xff]  }
 0x2fd   :  { %v8773_v20 = vld [vmem:[%s11407_s3 + $0x30] sm:$0xff]  }
 0x2ff   :  { %5499 = vmatpush1.bf16.msra.mxu0 %v8689_v21  ;;  %6058 = vmatpush1.bf16.msra.mxu1 %v8692_v22  ;;  %v8774_v21 = vld [vmem:[%s11407_s3 + $0xb0] sm:$0xff]   ;;  %v8775_v22 = vld [vmem:[%s11407_s3 + $0x78] sm:$0xff]  }
 0x300   :  { %5511 = vmatprep.subr.bf16.mxu0 %v8700_v23  ;;  %6070 = vmatprep.subr.bf16.mxu1 %v8703_v24  ;;  %v8776_v23 = vld [vmem:[%s11407_s3 + $0xf8] sm:$0xff]  }
 0x301   :  { %v8777_v24 = vld [vmem:[%s11407_s3 + $0x38] sm:$0xff]  }
 0x302   :  { %5501 = vmatmul.mubr.bf16.vlgmr.msra.gmra.mrb[0].mxu0 %v8695_v25  ;;  %6060 = vmatmul.mubr.bf16.vlgmr.msra.gmra.mrb[0].mxu1 %v8695_v25  ;;  %v8778_v25 = vld [vmem:[%s11407_s3 + $0xb8] sm:$0xff]  }
 0x303   :  { %5512 = vmatpush1.bf16.msra.mxu0 %v8698_v26  ;;  %6071 = vmatpush1.bf16.msra.mxu1 %v8701_v27  ;;  %v849_v26 = vlaneseq }
 0x304   :  { %5513 = vmatprep.subr.bf16.mxu0 %v8706_v28  ;;  %6072 = vmatprep.subr.bf16.mxu1 %v8709_v29 }
 0x305   :  { %5543 = vmatprep.mubr.bf16.mxu0 %v8787_v34  ;;  %6102 = vmatprep.mubr.bf16.mxu1 %v8787_v34  ;;  %v850_v27 = vshrl.u32 %v849_v26, 7 }
 0x307   :  { %5514 = vmatpush1.bf16.msra.mxu0 %v8704_v30  ;;  %6073 = vmatpush1.bf16.msra.mxu1 %v8707_v31  ;;  %v851_v28 = vsub.s32 0, %v850_v27  ;;  %v859_v29 = vsub.s32 2, %v850_v27  ;;  %v847_v30 = vld [vmem:[%s11408_s2] sm:$0xf]  ;;  %v855_v31 = vsub.s32 1, %v850_v27 }
 0x308   :  { %5515 = vmatprep.subr.bf16.mxu0 %v8712_v32  ;;  %6074 = vmatprep.subr.bf16.mxu1 %v8715_v33  ;;  %v863_v32 = vsub.s32 3, %v850_v27 }
 0x309   :  { %v852_v33 = vrot.slane %v847_v30, %v851_v28  ;;  %v860_v34 = vrot.slane %v847_v30, %v859_v29 }
 0x30b   :  { %5516 = vmatpush1.bf16.msra.mxu0 %v8710_v35  ;;  %6075 = vmatpush1.bf16.msra.mxu1 %v8713_v36  ;;  %v856_v35 = vrot.slane %v847_v30, %v855_v31  ;;  %v864_v36 = vrot.slane %v847_v30, %v863_v32 }
 0x30c   :  { %5517 = vmatprep.subr.bf16.mxu0 %v8718_v37  ;;  %6076 = vmatprep.subr.bf16.mxu1 %v8721_v38 }
 0x30f   :  { %5518 = vmatpush1.bf16.msra.mxu0 %v8716_v39  ;;  %6077 = vmatpush1.bf16.msra.mxu1 %v8719_v40 }
 0x310   :  { %5519 = vmatprep.subr.bf16.mxu0 %v8724_v41  ;;  %6078 = vmatprep.subr.bf16.mxu1 %v8727_v42 }
 0x313   :  { %5520 = vmatpush1.bf16.msra.mxu0 %v8722_v43  ;;  %6079 = vmatpush1.bf16.msra.mxu1 %v8725_v44 }
 0x314   :  { %5521 = vmatprep.subr.bf16.mxu0 %v8730_v45  ;;  %6080 = vmatprep.subr.bf16.mxu1 %v8733_v46 }
 0x317   :  { %5522 = vmatpush1.bf16.msra.mxu0 %v8728_v47  ;;  %6081 = vmatpush1.bf16.msra.mxu1 %v8731_v48 }
 0x318   :  { %5523 = vmatprep.subr.bf16.mxu0 %v8736_v49  ;;  %6082 = vmatprep.subr.bf16.mxu1 %v8739_v50 }
 0x31b   :  { %5524 = vmatpush1.bf16.msra.mxu0 %v8734_v51  ;;  %6083 = vmatpush1.bf16.msra.mxu1 %v8737_v52 }
 0x31c   :  { %5525 = vmatprep.subr.bf16.mxu0 %v8742_v53  ;;  %6084 = vmatprep.subr.bf16.mxu1 %v8745_v54 }
 0x31f   :  { %5526 = vmatpush1.bf16.msra.mxu0 %v8740_v55  ;;  %6085 = vmatpush1.bf16.msra.mxu1 %v8743_v56 }
 0x320   :  { %7361 = vmatprep.subr.bf16.mxu0 %v8747_v57  ;;  %7383 = vmatprep.subr.bf16.mxu1 %v8748_v58 }
 0x322   :  { %5544 = vmatmul.mubr.bf16.vlgmr.msra.gmra.mrb[0].mxu0 %v8746_v59  ;;  %6103 = vmatmul.mubr.bf16.vlgmr.msra.gmra.mrb[0].mxu1 %v8746_v59 }
 0x323   :  { %7362 = vmatpush3.bf16.msra.mxu0 %v8749_v60  ;;  %7384 = vmatpush3.bf16.msra.mxu1 %v8750_v61 }
 0x324   :  { %7363 = vmatprep.subr.bf16.mxu0 %v8751_v62  ;;  %7385 = vmatprep.subr.bf16.mxu1 %v8752_v63 }
 0x327   :  { %7364 = vmatpush3.bf16.msra.mxu0 %v8753_v0  ;;  %7386 = vmatpush3.bf16.msra.mxu1 %v8754_v1 }
 0x328   :  { %7365 = vmatprep.subr.bf16.mxu0 %v8755_v2  ;;  %7387 = vmatprep.subr.bf16.mxu1 %v8756_v3  ;;  %v7328_v3 = vld [vmem:[%s11409_s4] ss:$0 sm:$0xff] }
 0x32b   :  { %7366 = vmatpush3.bf16.msra.mxu0 %v8757_v4  ;;  %7388 = vmatpush3.bf16.msra.mxu1 %v8758_v5 }
 0x32c   :  { %7367 = vmatprep.subr.bf16.mxu0 %v8759_v6  ;;  %7389 = vmatprep.subr.bf16.mxu1 %v8760_v7  ;;  %v6471_v6 = vand.u32 127, %v849_v26 }
 0x32e   :  { %vm6472_vm0 = vcmp.lt.s32.totalorder %v6471_v6, 10 }
 0x32f   :  { %7368 = vmatpush3.bf16.msra.mxu0 %v8761_v8  ;;  %7390 = vmatpush3.bf16.msra.mxu1 %v8762_v9 }
 0x330   :  { %7369 = vmatprep.subr.bf16.mxu0 %v8763_v10  ;;  %7391 = vmatprep.subr.bf16.mxu1 %v8764_v11 }
 0x333   :  { %7370 = vmatpush3.bf16.msra.mxu0 %v8765_v12  ;;  %7392 = vmatpush3.bf16.msra.mxu1 %v8766_v13 }
 0x334   :  { %7371 = vmatprep.subr.bf16.mxu0 %v8767_v14  ;;  %7393 = vmatprep.subr.bf16.mxu1 %v8768_v15 }
 0x337   :  { %7372 = vmatpush3.bf16.msra.mxu0 %v8769_v16  ;;  %7394 = vmatpush3.bf16.msra.mxu1 %v8770_v17 }
 0x338   :  { %7373 = vmatprep.subr.bf16.mxu0 %v8771_v18  ;;  %7395 = vmatprep.subr.bf16.mxu1 %v8772_v19 }
 0x33b   :  { %7374 = vmatpush3.bf16.msra.mxu0 %v8773_v20  ;;  %7396 = vmatpush3.bf16.msra.mxu1 %v8774_v21 }
 0x33c   :  { %7375 = vmatprep.subr.bf16.mxu0 %v8775_v22  ;;  %7397 = vmatprep.subr.bf16.mxu1 %v8776_v23 }
 0x33f   :  { %7376 = vmatpush3.bf16.msra.mxu0 %v8777_v24  ;;  %7398 = vmatpush3.bf16.msra.mxu1 %v8778_v25 }
 0x3f5   :  { %v5545_v37 = vpop.f32.mrb[0].mxu0  ;;  %v6104_v38 = vpop.f32.mrb[0].mxu1 }
 0x3f6   :  { %v7405_v39 = vadd.f32 %v5545_v37, %v852_v33  ;;  %v7409_v40 = vadd.f32 %v6104_v38, %v860_v34  ;;  %v5547_v41 = vpop.f32.mrb[1].mxu0  ;;  %v6106_v42 = vpop.f32.mrb[1].mxu1 }
 0x3f7   :  { %v7406_v43 = vadd.f32 %v5547_v41, %v856_v35  ;;  %v7410_v44 = vadd.f32 %v6106_v42, %v864_v36  ;;  %v5549_v45 = vpop.f32.mrb[2].mxu0  ;;  %v6108_v46 = vpop.f32.mrb[2].mxu1 }
 0x3f8   :  { %v7407_v47 = vadd.f32 %v5549_v45, %v852_v33  ;;  %v7411_v48 = vadd.f32 %v6108_v46, %v860_v34  ;;  %v5551_v49 = vpop.f32.mrb[3].mxu0  ;;  %v6110_v50 = vpop.f32.mrb[3].mxu1  ;;  %v6113_v53 = vmax.f32 %v7405_v39, 0.0  ;;  %v6115_v54 = vmax.f32 %v7409_v40, 0.0 }
 0x3f9   :  { %v7408_v51 = vadd.f32 %v5551_v49, %v856_v35  ;;  %v7412_v52 = vadd.f32 %v6110_v50, %v864_v36  ;;  %v6114_v57 = vmax.f32 %v7406_v43, 0.0  ;;  %v6116_v58 = vmax.f32 %v7410_v44, 0.0 }
 0x3fa   :  { %v6117_v55 = vmax.f32 %v7407_v47, 0.0  ;;  %v6119_v56 = vmax.f32 %v7411_v48, 0.0 }
 0x3fb   :  { %v6118_v59 = vmax.f32 %v7408_v51, 0.0  ;;  %v6120_v60 = vmax.f32 %v7412_v52, 0.0 }
 0x3fc   :  { %v6121_v61 = vpack.c.bf16 %v6117_v55, %v6113_v53  ;;  %v6123_v62 = vpack.c.bf16 %v6119_v56, %v6115_v54 }
 0x3fd   :  { %v6122_v63 = vpack.c.bf16 %v6118_v59, %v6114_v57  ;;  %v6124_v0 = vpack.c.bf16 %v6120_v60, %v6116_v58 }
 0x3ff   :  { %6420 = vmatprep.mubr.bf16.mxu0 %v6122_v63  ;;  %6461 = vmatprep.mubr.bf16.mxu1 %v6124_v0 }
 0x400   :  { %6421 = vmatmul.mubr.bf16.vlgmr.msra.gmra.mrb[4].mxu0 %v6121_v61  ;;  %6462 = vmatmul.mubr.bf16.vlgmr.msra.gmra.mrb[4].mxu1 %v6123_v62 }
 0x4d3   :  { %v7377_v1 = vpop.f32.mrb[4].mxu0  ;;  %v7399_v2 = vpop.f32.mrb[4].mxu1 }
 0x4d4   :  { %v7378_v4 = vpop.f32.mrb[5].mxu0  ;;  %v7400_v5 = vpop.f32.mrb[5].mxu1 }
 0x4d5   :  { %v7379_v7 = vadd.f32 %v7378_v4, %v7377_v1  ;;  %v7401_v8 = vadd.f32 %v7400_v5, %v7399_v2  ;;  %v7380_v9 = vpop.f32.mrb[6].mxu0  ;;  %v7402_v10 = vpop.f32.mrb[6].mxu1 }
 0x4d6   :  { %v7381_v11 = vpop.f32.mrb[7].mxu0  ;;  %v7403_v12 = vpop.f32.mrb[7].mxu1 }
 0x4d7   :  { %v6423_v13 = vadd.f32 %v7379_v7, %v7328_v3  ;;  %v7382_v14 = vadd.f32 %v7381_v11, %v7380_v9  ;;  %v7404_v15 = vadd.f32 %v7403_v12, %v7402_v10 }
 0x4d9   :  { %v6426_v16 = vadd.f32 %v7382_v14, %v7328_v3  ;;  %v6464_v17 = vadd.f32 %v7401_v8, %v6423_v13 }
 0x4db   :  { %v6473_v18 = vsel %vm6472_vm0, %v6464_v17, -inf  ;;  %v6467_v19 = vadd.f32 %v7404_v15, %v6426_v16 }
 0x4dc   :  { %6475 = vmax.xlane.f32.xlu0 %v6473_v18 }
 0x4dd   :  { %v6474_v20 = vsel %vm6472_vm0, %v6467_v19, -inf }
 0x4e0   :  { %6477 = vmax.xlane.f32.xlu0 %v6474_v20 }
 0x569   :  { %v6476_v21 = vpop.xlane.xlu0 %6475 }
 0x56a   :  { %v6479_v22 = vsub.f32 %v6473_v18, %v6476_v21 }
 0x56c   :  { %v6481_v23 = vmul.f32 1.442695, %v6479_v22 }
 0x56d   :  { %v6478_v24 = vpop.xlane.xlu0 %6477 }
 0x56e   :  { %8779 = vpow2.f32 %v6481_v23  ;;  %v6480_v25 = vsub.f32 %v6474_v20, %v6478_v24 }
 0x570   :  { %v6483_v26 = vmul.f32 1.442695, %v6480_v25 }
 0x572   :  { %8781 = vpow2.f32 %v6483_v26 }
 0x578   :  { %v8780_v27 = vpop.eup %8779 }
 0x579   :  { %v6485_v28 = vsel %vm6472_vm0, %v8780_v27, 0.0 }
 0x57a   :  { %6487 = vadd.xlane.f32.xlu1 %v6485_v28 }
 0x57c   :  { %v8782_v29 = vpop.eup %8781 }
 0x57d   :  { %v6486_v30 = vsel %vm6472_vm0, %v8782_v29, 0.0 }
 0x57e   :  { %6489 = vadd.xlane.f32.xlu1 %v6486_v30 }
 0x607   :  { %v6488_v31 = vpop.xlane.xlu1 %6487 }
 0x608   :  { %8783 = vlog2.f32 %v6488_v31 }
 0x60b   :  { %v6490_v32 = vpop.xlane.xlu1 %6489 }
 0x60c   :  { %8785 = vlog2.f32 %v6490_v32 }
 0x612   :  { %v8784_v33 = vpop.eup %8783 }
 0x613   :  { %v6492_v34 = vmul.f32 0.6931472, %v8784_v33 }
 0x615   :  { %v6495_v35 = vsub.f32 %v6479_v22, %v6492_v34 }
 0x616   :  { %v8786_v36 = vpop.eup %8785 }
 0x617   :  { %6497 = vst [vmem:[%s11410_s5] sm:$0xff] %v6495_v35  ;;  %v6494_v37 = vmul.f32 0.6931472, %v8786_v36 }
 0x619   :  { %v6496_v38 = vsub.f32 %v6480_v25, %v6494_v37 }
 0x61b   :  { %6498 = vst [vmem:[%s11410_s5 + $0x8] sm:$0xff] %v6496_v38 }

</bundles_post_ra>
